<compile_context>
chip_gen: v7x
topology: tpu7x:2x2x1
jax: 0.10.0
libtpu: 0.0.40
codegen_flags: <defaults>
</compile_context>

<pallas_src>
import functools

import jax
import jax.numpy as jnp
import numpy as np
from jax import lax
from jax.experimental import pallas as pl
from jax.experimental.pallas import tpu as pltpu


def _basic_block_kernel(x_ref, w1_ref, b1_ref, w2_ref, b2_ref, out_ref,
                        xpad_s, mid_s, *, H, W, C, compute_dtype):
    """Fused BasicBlock for one batch element (NHWC, stride=1, no downsample).

    x_ref  : (1, H, W, C)        input tile (also the residual identity)
    w1_ref : (9*C, C)            conv1 weights, im2col layout, BN1 scale folded
    b1_ref : (1, C)   f32        BN1 bias (beta - mean*scale)
    w2_ref : (9*C, C)            conv2 weights, im2col layout, BN2 scale folded
    b2_ref : (1, C)   f32        BN2 bias
    out_ref: (1, H, W, C)
    xpad_s : (H+2, W+2, C) VMEM  zero-bordered padded input
    mid_s  : (H+2, W+2, C) VMEM  zero-bordered padded conv1 output
    """
    f32 = jnp.float32

    def conv3x3(src_ref, w_ref):
        # Full im2col: one fat K = 9*C MXU matmul per conv instead of nine
        # thin K = C matmuls (much better MXU contraction-dim fill).
        patches = [src_ref[kh:kh + H, kw:kw + W, :]
                   for kh in range(3) for kw in range(3)]
        p = jnp.concatenate(patches, axis=-1).reshape(H * W, 9 * C)
        return jnp.dot(p, w_ref[...], preferred_element_type=f32)

    # Stage the zero-padded input in VMEM (padding folded into the kernel).
    xpad_s[...] = jnp.zeros_like(xpad_s)
    xpad_s[1:H + 1, 1:W + 1, :] = x_ref[0].astype(compute_dtype)

    # conv1 + bn1 + relu (epilogue in f32; BN scale already in the weights).
    h1 = conv3x3(xpad_s, w1_ref) + b1_ref[...]
    h1 = jnp.maximum(h1, 0.0)

    # Intermediate stays in VMEM, already zero-padded for conv2.
    mid_s[...] = jnp.zeros_like(mid_s)
    mid_s[1:H + 1, 1:W + 1, :] = h1.reshape(H, W, C).astype(compute_dtype)

    # conv2 + bn2 + residual add + relu.
    h2 = conv3x3(mid_s, w2_ref) + b2_ref[...]
    h2 = h2 + x_ref[0].reshape(H * W, C).astype(f32)
    h2 = jnp.maximum(h2, 0.0)
    out_ref[0] = h2.reshape(H, W, C).astype(out_ref.dtype)


def _fold_bn(w_hwio, gamma, beta, mean, var, eps=1e-5):
    """Fold eval-mode BatchNorm into the conv: w' = w*scale, b = beta - mean*scale."""
    scale = gamma / jnp.sqrt(var + eps)
    w_eff = w_hwio * scale[None, None, None, :]
    bias = beta - mean * scale
    return w_eff, bias


def _vmem_limit_bytes(h, w, c, compute_dtype):
    it = jnp.dtype(compute_dtype).itemsize
    io_blocks = 2 * 2 * h * w * c * 4                       # double-buffered x / out (f32)
    weights = 2 * (2 * 9 * c * c * it + 2 * c * 4)
    scratch = 2 * (h + 2) * (w + 2) * c * it
    live = h * w * 9 * c * it + h * w * c * 4               # im2col patch + f32 acc
    est = io_blocks + weights + scratch + 2 * live
    # Stay within v7x's 64 MiB physical VMEM; v5e/v6e have 128 MiB headroom.
    return int(min(max(2 * est, 32 * 2 ** 20), 64 * 2 ** 20))


def basic_block_forward_nhwc(x_nhwc, params, *, compute_dtype=jnp.bfloat16):
    """Fused BasicBlock forward, NHWC layout (preferred entry point)."""
    n, h, w, c = x_nhwc.shape
    if params["w1"].shape != (3, 3, c, c):
        # TODO(synk): downsample / channel-change path not implemented.
        raise ValueError("stride=1 / no-downsample BasicBlock needs inplanes == planes")

    w1_eff, b1 = _fold_bn(params["w1"], params["bn1_gamma"], params["bn1_beta"],
                          params["bn1_mean"], params["bn1_var"])
    w2_eff, b2 = _fold_bn(params["w2"], params["bn2_gamma"], params["bn2_beta"],
                          params["bn2_mean"], params["bn2_var"])

    # (3,3,Cin,Cout) -> (9*Cin, Cout) matching the kernel's (kh, kw, cin) patch
    # order; MXU operands in compute_dtype (bf16 by default), bias kept in f32.
    w1_mat = w1_eff.reshape(9 * c, c).astype(compute_dtype)
    w2_mat = w2_eff.reshape(9 * c, c).astype(compute_dtype)
    b1 = b1.reshape(1, c).astype(jnp.float32)
    b2 = b2.reshape(1, c).astype(jnp.float32)

    kernel = functools.partial(_basic_block_kernel, H=h, W=w, C=c,
                               compute_dtype=compute_dtype)

    grid_spec = pltpu.PrefetchScalarGridSpec(
        num_scalar_prefetch=0,
        grid=(n,),                                          # one image per grid step
        in_specs=[
            pl.BlockSpec((1, h, w, c), lambda i: (i, 0, 0, 0)),
            pl.BlockSpec((9 * c, c), lambda i: (0, 0)),     # weights stay resident
            pl.BlockSpec((1, c), lambda i: (0, 0)),
            pl.BlockSpec((9 * c, c), lambda i: (0, 0)),
            pl.BlockSpec((1, c), lambda i: (0, 0)),
        ],
        out_specs=pl.BlockSpec((1, h, w, c), lambda i: (i, 0, 0, 0)),
        scratch_shapes=[
            pltpu.VMEM((h + 2, w + 2, c), compute_dtype),   # padded input
            pltpu.VMEM((h + 2, w + 2, c), compute_dtype),   # padded conv1 output
        ],
    )

    return pl.pallas_call(
        kernel,
        out_shape=jax.ShapeDtypeStruct((n, h, w, c), x_nhwc.dtype),
        grid_spec=grid_spec,
        compiler_params=pltpu.CompilerParams(
            dimension_semantics=("parallel",),              # megacore sharding on v7x
            vmem_limit_bytes=_vmem_limit_bytes(h, w, c, compute_dtype),
        ),
    )(x_nhwc, w1_mat, b1, w2_mat, b2)


def basic_block_forward(x_nchw, params, *, compute_dtype=jnp.bfloat16):
    """PyTorch-facing NCHW wrapper (keep the model NHWC end-to-end when possible)."""
    x = jnp.transpose(x_nchw, (0, 2, 3, 1))                 # NCHW -> NHWC
    y = basic_block_forward_nhwc(x, params, compute_dtype=compute_dtype)
    return jnp.transpose(y, (0, 3, 1, 2))                   # NHWC -> NCHW


def _reference_forward(x_nchw, params, eps=1e-5):
    """Pure-JAX f32 reference (lax conv) matching the PyTorch module."""
    def conv(x, w_hwio):
        w_oihw = jnp.transpose(w_hwio, (3, 2, 0, 1))
        return lax.conv_general_dilated(
            x, w_oihw, window_strides=(1, 1), padding=((1, 1), (1, 1)),
            dimension_numbers=("NCHW", "OIHW", "NCHW"))

    def bn(x, g, b, m, v):
        g = g.reshape(1, -1, 1, 1); b = b.reshape(1, -1, 1, 1)
        m = m.reshape(1, -1, 1, 1); v = v.reshape(1, -1, 1, 1)
        return (x - m) / jnp.sqrt(v + eps) * g + b

    out = conv(x_nchw, params["w1"])
    out = jnp.maximum(bn(out, params["bn1_gamma"], params["bn1_beta"],
                         params["bn1_mean"], params["bn1_var"]), 0.0)
    out = conv(out, params["w2"])
    out = bn(out, params["bn2_gamma"], params["bn2_beta"],
             params["bn2_mean"], params["bn2_var"])
    out = out + x_nchw
    return jnp.maximum(out, 0.0)


if __name__ == "__main__":
    key = jax.random.PRNGKey(0)
    N, C, H, W = 2, 4, 16, 16          # inplanes = planes = 4 (stride=1, no downsample)
    planes = C

    ks = jax.random.split(key, 8)
    x = jax.random.normal(ks[0], (N, C, H, W), jnp.float32)

    params = {
        # conv weights stored HWIO (kh, kw, cin, cout)
        "w1": jax.random.normal(ks[1], (3, 3, C, planes), jnp.float32) * 0.1,
        "w2": jax.random.normal(ks[2], (3, 3, planes, planes), jnp.float32) * 0.1,
        # BatchNorm (eval-mode running-stat semantics)
        "bn1_gamma": 1.0 + 0.1 * jax.random.normal(ks[3], (planes,), jnp.float32),
        "bn1_beta": 0.1 * jax.random.normal(ks[4], (planes,), jnp.float32),
        "bn1_mean": jnp.zeros((planes,), jnp.float32),
        "bn1_var": jnp.ones((planes,), jnp.float32),
        "bn2_gamma": 1.0 + 0.1 * jax.random.normal(ks[5], (planes,), jnp.float32),
        "bn2_beta": 0.1 * jax.random.normal(ks[6], (planes,), jnp.float32),
        "bn2_mean": jnp.zeros((planes,), jnp.float32),
        "bn2_var": jnp.ones((planes,), jnp.float32),
    }

    fwd_f32 = jax.jit(functools.partial(basic_block_forward, compute_dtype=jnp.float32))
    fwd_bf16 = jax.jit(functools.partial(basic_block_forward, compute_dtype=jnp.bfloat16))

    out_f32 = jax.block_until_ready(fwd_f32(x, params))
    out_bf16 = jax.block_until_ready(fwd_bf16(x, params))
    ref = jax.block_until_ready(_reference_forward(x, params))

    # f32 MXU path: strict check against the reference.
    np.testing.assert_allclose(np.asarray(out_f32), np.asarray(ref),
                               rtol=1e-4, atol=1e-4)
    # bf16 MXU path (default, faster): looser tolerance for bf16 operand rounding.
    np.testing.assert_allclose(np.asarray(out_bf16), np.asarray(ref),
                               rtol=5e-2, atol=5e-2)

    print("KERNEL_OK")
</pallas_src>

<mosaic_0001>
module attributes {stable_mosaic.version = 11 : i64} {
  func.func @_basic_block_kernel(%arg0: i32, %arg1: memref<1x16x16x4xf32, #tpu.memory_space<vmem>>, %arg2: memref<36x4xf32, #tpu.memory_space<vmem>>, %arg3: memref<1x4xf32, #tpu.memory_space<vmem>>, %arg4: memref<36x4xf32, #tpu.memory_space<vmem>>, %arg5: memref<1x4xf32, #tpu.memory_space<vmem>>, %arg6: memref<1x16x16x4xf32, #tpu.memory_space<vmem>>, %arg7: memref<18x18x4xf32, #tpu.memory_space<vmem>>, %arg8: memref<18x18x4xf32, #tpu.memory_space<vmem>>) attributes {dimension_semantics = [#tpu.dimension_semantics<parallel>], iteration_bounds = array<i64: 2>, scalar_prefetch = 0 : i64, scratch_operands = 2 : i64, tpu.core_type = #tpu.core_type<tc>, window_params = [{transform_indices = @transform_0, window_bounds = array<i64: 1, 16, 16, 4>}, {pipeline_mode = #tpu.pipeline_mode<synchronous>, transform_indices = @transform_1, window_bounds = array<i64: 36, 4>}, {pipeline_mode = #tpu.pipeline_mode<synchronous>, transform_indices = @transform_2, window_bounds = array<i64: 1, 4>}, {pipeline_mode = #tpu.pipeline_mode<synchronous>, transform_indices = @transform_3, window_bounds = array<i64: 36, 4>}, {pipeline_mode = #tpu.pipeline_mode<synchronous>, transform_indices = @transform_4, window_bounds = array<i64: 1, 4>}, {transform_indices = @transform_5, window_bounds = array<i64: 1, 16, 16, 4>}]} {
    %cst = arith.constant 0.000000e+00 : f32
    %0 = vector.broadcast %cst : f32 to vector<18x18x4xf32>
    %c0 = arith.constant 0 : index
    %c0_0 = arith.constant 0 : index
    %c0_1 = arith.constant 0 : index
    %1 = vector.load %arg7[%c0, %c0_0, %c0_1] : memref<18x18x4xf32, #tpu.memory_space<vmem>>, vector<18x18x4xf32>
    tpu.vector_store %arg7[%c0, %c0_0, %c0_1], %0 {strides = array<i32>} : memref<18x18x4xf32, #tpu.memory_space<vmem>>, vector<18x18x4xf32>,
    %c0_2 = arith.constant 0 : index
    %c0_3 = arith.constant 0 : index
    %c0_4 = arith.constant 0 : index
    %c0_5 = arith.constant 0 : index
    %2 = vector.load %arg1[%c0_2, %c0_3, %c0_4, %c0_5] : memref<1x16x16x4xf32, #tpu.memory_space<vmem>>, vector<1x16x16x4xf32>
    %3 = vector.shape_cast %2 : vector<1x16x16x4xf32> to vector<16x16x4xf32>
    %c1 = arith.constant 1 : index
    %c1_6 = arith.constant 1 : index
    %c0_7 = arith.constant 0 : index
    %4 = vector.load %arg7[%c1, %c1_6, %c0_7] : memref<18x18x4xf32, #tpu.memory_space<vmem>>, vector<16x16x4xf32>
    tpu.vector_store %arg7[%c1, %c1_6, %c0_7], %3 {strides = array<i32>} : memref<18x18x4xf32, #tpu.memory_space<vmem>>, vector<16x16x4xf32>,
    %c0_8 = arith.constant 0 : index
    %c0_9 = arith.constant 0 : index
    %c0_10 = arith.constant 0 : index
    %5 = vector.load %arg7[%c0_8, %c0_9, %c0_10] : memref<18x18x4xf32, #tpu.memory_space<vmem>>, vector<16x16x4xf32>
    %c0_11 = arith.constant 0 : index
    %c1_12 = arith.constant 1 : index
    %c0_13 = arith.constant 0 : index
    %6 = vector.load %arg7[%c0_11, %c1_12, %c0_13] : memref<18x18x4xf32, #tpu.memory_space<vmem>>, vector<16x16x4xf32>
    %c0_14 = arith.constant 0 : index
    %c2 = arith.constant 2 : index
    %c0_15 = arith.constant 0 : index
    %7 = vector.load %arg7[%c0_14, %c2, %c0_15] : memref<18x18x4xf32, #tpu.memory_space<vmem>>, vector<16x16x4xf32>
    %c1_16 = arith.constant 1 : index
    %c0_17 = arith.constant 0 : index
    %c0_18 = arith.constant 0 : index
    %8 = vector.load %arg7[%c1_16, %c0_17, %c0_18] : memref<18x18x4xf32, #tpu.memory_space<vmem>>, vector<16x16x4xf32>
    %c1_19 = arith.constant 1 : index
    %c1_20 = arith.constant 1 : index
    %c0_21 = arith.constant 0 : index
    %9 = vector.load %arg7[%c1_19, %c1_20, %c0_21] : memref<18x18x4xf32, #tpu.memory_space<vmem>>, vector<16x16x4xf32>
    %c1_22 = arith.constant 1 : index
    %c2_23 = arith.constant 2 : index
    %c0_24 = arith.constant 0 : index
    %10 = vector.load %arg7[%c1_22, %c2_23, %c0_24] : memref<18x18x4xf32, #tpu.memory_space<vmem>>, vector<16x16x4xf32>
    %c2_25 = arith.constant 2 : index
    %c0_26 = arith.constant 0 : index
    %c0_27 = arith.constant 0 : index
    %11 = vector.load %arg7[%c2_25, %c0_26, %c0_27] : memref<18x18x4xf32, #tpu.memory_space<vmem>>, vector<16x16x4xf32>
    %c2_28 = arith.constant 2 : index
    %c1_29 = arith.constant 1 : index
    %c0_30 = arith.constant 0 : index
    %12 = vector.load %arg7[%c2_28, %c1_29, %c0_30] : memref<18x18x4xf32, #tpu.memory_space<vmem>>, vector<16x16x4xf32>
    %c2_31 = arith.constant 2 : index
    %c2_32 = arith.constant 2 : index
    %c0_33 = arith.constant 0 : index
    %13 = vector.load %arg7[%c2_31, %c2_32, %c0_33] : memref<18x18x4xf32, #tpu.memory_space<vmem>>, vector<16x16x4xf32>
    %14 = tpu.concatenate %5, %6, %7, %8, %9, %10, %11, %12, %13 in 2 : vector<16x16x4xf32>, vector<16x16x4xf32>, vector<16x16x4xf32>, vector<16x16x4xf32>, vector<16x16x4xf32>, vector<16x16x4xf32>, vector<16x16x4xf32>, vector<16x16x4xf32>, vector<16x16x4xf32> -> vector<16x16x36xf32>
    %15 = vector.shape_cast %14 : vector<16x16x36xf32> to vector<256x36xf32>
    %c0_34 = arith.constant 0 : index
    %c0_35 = arith.constant 0 : index
    %16 = vector.load %arg2[%c0_34, %c0_35] : memref<36x4xf32, #tpu.memory_space<vmem>>, vector<36x4xf32>
    %cst_36 = arith.constant dense<0.000000e+00> : vector<256x4xf32>
    %17 = tpu.matmul %15, %16, %cst_36 {dimension_numbers = #tpu.dot_dimension_numbers<[1], [0], [0], [1], [0, 0, 1, 1], [], []>} : vector<256x36xf32>, vector<36x4xf32>, vector<256x4xf32> -> vector<256x4xf32>
    %c0_37 = arith.constant 0 : index
    %c0_38 = arith.constant 0 : index
    %18 = vector.load %arg3[%c0_37, %c0_38] : memref<1x4xf32, #tpu.memory_space<vmem>>, vector<1x4xf32>
    %19 = vector.broadcast %18 : vector<1x4xf32> to vector<256x4xf32>
    %20 = arith.addf %17, %19 : vector<256x4xf32>
    %cst_39 = arith.constant 0.000000e+00 : f32
    %21 = vector.broadcast %cst_39 : f32 to vector<256x4xf32>
    %22 = arith.maximumf %20, %21 : vector<256x4xf32>
    %cst_40 = arith.constant 0.000000e+00 : f32
    %23 = vector.broadcast %cst_40 : f32 to vector<18x18x4xf32>
    %c0_41 = arith.constant 0 : index
    %c0_42 = arith.constant 0 : index
    %c0_43 = arith.constant 0 : index
    %24 = vector.load %arg8[%c0_41, %c0_42, %c0_43] : memref<18x18x4xf32, #tpu.memory_space<vmem>>, vector<18x18x4xf32>
    tpu.vector_store %arg8[%c0_41, %c0_42, %c0_43], %23 {strides = array<i32>} : memref<18x18x4xf32, #tpu.memory_space<vmem>>, vector<18x18x4xf32>,
    %25 = vector.shape_cast %22 : vector<256x4xf32> to vector<16x16x4xf32>
    %c1_44 = arith.constant 1 : index
    %c1_45 = arith.constant 1 : index
    %c0_46 = arith.constant 0 : index
    %26 = vector.load %arg8[%c1_44, %c1_45, %c0_46] : memref<18x18x4xf32, #tpu.memory_space<vmem>>, vector<16x16x4xf32>
    tpu.vector_store %arg8[%c1_44, %c1_45, %c0_46], %25 {strides = array<i32>} : memref<18x18x4xf32, #tpu.memory_space<vmem>>, vector<16x16x4xf32>,
    %c0_47 = arith.constant 0 : index
    %c0_48 = arith.constant 0 : index
    %c0_49 = arith.constant 0 : index
    %27 = vector.load %arg8[%c0_47, %c0_48, %c0_49] : memref<18x18x4xf32, #tpu.memory_space<vmem>>, vector<16x16x4xf32>
    %c0_50 = arith.constant 0 : index
    %c1_51 = arith.constant 1 : index
    %c0_52 = arith.constant 0 : index
    %28 = vector.load %arg8[%c0_50, %c1_51, %c0_52] : memref<18x18x4xf32, #tpu.memory_space<vmem>>, vector<16x16x4xf32>
    %c0_53 = arith.constant 0 : index
    %c2_54 = arith.constant 2 : index
    %c0_55 = arith.constant 0 : index
    %29 = vector.load %arg8[%c0_53, %c2_54, %c0_55] : memref<18x18x4xf32, #tpu.memory_space<vmem>>, vector<16x16x4xf32>
    %c1_56 = arith.constant 1 : index
    %c0_57 = arith.constant 0 : index
    %c0_58 = arith.constant 0 : index
    %30 = vector.load %arg8[%c1_56, %c0_57, %c0_58] : memref<18x18x4xf32, #tpu.memory_space<vmem>>, vector<16x16x4xf32>
    %c1_59 = arith.constant 1 : index
    %c1_60 = arith.constant 1 : index
    %c0_61 = arith.constant 0 : index
    %31 = vector.load %arg8[%c1_59, %c1_60, %c0_61] : memref<18x18x4xf32, #tpu.memory_space<vmem>>, vector<16x16x4xf32>
    %c1_62 = arith.constant 1 : index
    %c2_63 = arith.constant 2 : index
    %c0_64 = arith.constant 0 : index
    %32 = vector.load %arg8[%c1_62, %c2_63, %c0_64] : memref<18x18x4xf32, #tpu.memory_space<vmem>>, vector<16x16x4xf32>
    %c2_65 = arith.constant 2 : index
    %c0_66 = arith.constant 0 : index
    %c0_67 = arith.constant 0 : index
    %33 = vector.load %arg8[%c2_65, %c0_66, %c0_67] : memref<18x18x4xf32, #tpu.memory_space<vmem>>, vector<16x16x4xf32>
    %c2_68 = arith.constant 2 : index
    %c1_69 = arith.constant 1 : index
    %c0_70 = arith.constant 0 : index
    %34 = vector.load %arg8[%c2_68, %c1_69, %c0_70] : memref<18x18x4xf32, #tpu.memory_space<vmem>>, vector<16x16x4xf32>
    %c2_71 = arith.constant 2 : index
    %c2_72 = arith.constant 2 : index
    %c0_73 = arith.constant 0 : index
    %35 = vector.load %arg8[%c2_71, %c2_72, %c0_73] : memref<18x18x4xf32, #tpu.memory_space<vmem>>, vector<16x16x4xf32>
    %36 = tpu.concatenate %27, %28, %29, %30, %31, %32, %33, %34, %35 in 2 : vector<16x16x4xf32>, vector<16x16x4xf32>, vector<16x16x4xf32>, vector<16x16x4xf32>, vector<16x16x4xf32>, vector<16x16x4xf32>, vector<16x16x4xf32>, vector<16x16x4xf32>, vector<16x16x4xf32> -> vector<16x16x36xf32>
    %37 = vector.shape_cast %36 : vector<16x16x36xf32> to vector<256x36xf32>
    %c0_74 = arith.constant 0 : index
    %c0_75 = arith.constant 0 : index
    %38 = vector.load %arg4[%c0_74, %c0_75] : memref<36x4xf32, #tpu.memory_space<vmem>>, vector<36x4xf32>
    %cst_76 = arith.constant dense<0.000000e+00> : vector<256x4xf32>
    %39 = tpu.matmul %37, %38, %cst_76 {dimension_numbers = #tpu.dot_dimension_numbers<[1], [0], [0], [1], [0, 0, 1, 1], [], []>} : vector<256x36xf32>, vector<36x4xf32>, vector<256x4xf32> -> vector<256x4xf32>
    %c0_77 = arith.constant 0 : index
    %c0_78 = arith.constant 0 : index
    %40 = vector.load %arg5[%c0_77, %c0_78] : memref<1x4xf32, #tpu.memory_space<vmem>>, vector<1x4xf32>
    %41 = vector.broadcast %40 : vector<1x4xf32> to vector<256x4xf32>
    %42 = arith.addf %39, %41 : vector<256x4xf32>
    %c0_79 = arith.constant 0 : index
    %c0_80 = arith.constant 0 : index
    %c0_81 = arith.constant 0 : index
    %c0_82 = arith.constant 0 : index
    %43 = vector.load %arg1[%c0_79, %c0_80, %c0_81, %c0_82] : memref<1x16x16x4xf32, #tpu.memory_space<vmem>>, vector<1x16x16x4xf32>
    %44 = vector.shape_cast %43 : vector<1x16x16x4xf32> to vector<16x16x4xf32>
    %45 = vector.shape_cast %44 : vector<16x16x4xf32> to vector<256x4xf32>
    %46 = arith.addf %42, %45 : vector<256x4xf32>
    %cst_83 = arith.constant 0.000000e+00 : f32
    %47 = vector.broadcast %cst_83 : f32 to vector<256x4xf32>
    %48 = arith.maximumf %46, %47 : vector<256x4xf32>
    %49 = vector.shape_cast %48 : vector<256x4xf32> to vector<16x16x4xf32>
    %c0_84 = arith.constant 0 : index
    %c0_85 = arith.constant 0 : index
    %c0_86 = arith.constant 0 : index
    %c0_87 = arith.constant 0 : index
    %50 = vector.load %arg6[%c0_84, %c0_85, %c0_86, %c0_87] : memref<1x16x16x4xf32, #tpu.memory_space<vmem>>, vector<1x16x16x4xf32>
    %51 = vector.shape_cast %50 : vector<1x16x16x4xf32> to vector<16x16x4xf32>
    %52 = vector.shape_cast %49 : vector<16x16x4xf32> to vector<1x16x16x4xf32>
    tpu.vector_store %arg6[%c0_84, %c0_85, %c0_86, %c0_87], %52 {strides = array<i32>} : memref<1x16x16x4xf32, #tpu.memory_space<vmem>>, vector<1x16x16x4xf32>,
    return
  }
  func.func @transform_0(%arg0: i32) -> (i32, i32, i32, i32) {
    %c0_i32 = arith.constant 0 : i32
    %c0_i32_0 = arith.constant 0 : i32
    %c0_i32_1 = arith.constant 0 : i32
    %c0_i32_2 = arith.constant 0 : i32
    return %arg0, %c0_i32, %c0_i32_0, %c0_i32_1 : i32, i32, i32, i32
  }
  func.func @transform_1(%arg0: i32) -> (i32, i32) {
    %c0_i32 = arith.constant 0 : i32
    %c0_i32_0 = arith.constant 0 : i32
    %c0_i32_1 = arith.constant 0 : i32
    return %c0_i32, %c0_i32_0 : i32, i32
  }
  func.func @transform_2(%arg0: i32) -> (i32, i32) {
    %c0_i32 = arith.constant 0 : i32
    %c0_i32_0 = arith.constant 0 : i32
    %c0_i32_1 = arith.constant 0 : i32
    return %c0_i32, %c0_i32_0 : i32, i32
  }
  func.func @transform_3(%arg0: i32) -> (i32, i32) {
    %c0_i32 = arith.constant 0 : i32
    %c0_i32_0 = arith.constant 0 : i32
    %c0_i32_1 = arith.constant 0 : i32
    return %c0_i32, %c0_i32_0 : i32, i32
  }
  func.func @transform_4(%arg0: i32) -> (i32, i32) {
    %c0_i32 = arith.constant 0 : i32
    %c0_i32_0 = arith.constant 0 : i32
    %c0_i32_1 = arith.constant 0 : i32
    return %c0_i32, %c0_i32_0 : i32, i32
  }
  func.func @transform_5(%arg0: i32) -> (i32, i32, i32, i32) {
    %c0_i32 = arith.constant 0 : i32
    %c0_i32_0 = arith.constant 0 : i32
    %c0_i32_1 = arith.constant 0 : i32
    %c0_i32_2 = arith.constant 0 : i32
    return %arg0, %c0_i32, %c0_i32_0, %c0_i32_1 : i32, i32, i32, i32
  }
}

</mosaic_0001>

<bundles_post_ra>
// kernel: basic_block_forward.1
= control target key start
LH: loop header
LB: loop body
LE: loop exit
PB: predicated region body
PF: predicated region fallthrough
CT: control target
= control target key end

     0   :  { %s4850_s18 = smov 0   ;;  %s7997_s0 = inlined_call_operand.vmem [shape: f32[2,16,16,4], index: 0, kind: input, shape index: {}]   ;;  %s7998_s1 = inlined_call_operand.vmem [shape: f32[36,4], index: 1, kind: input, shape index: {}]   ;;  %s7999_s2 = inlined_call_operand.vmem [shape: f32[1,4], index: 2, kind: input, shape index: {}]   ;;  %s8000_s3 = inlined_call_operand.vmem [shape: f32[36,4], index: 3, kind: input, shape index: {}]   ;;  %s8001_s4 = inlined_call_operand.vmem [shape: f32[1,4], index: 4, kind: input, shape index: {}]   ;;  %s8002_s5 = inlined_call_operand.vmem [shape: f32[2,16,16,4], index: 5, kind: output, shape index: {}]  }
   0x1 LB: > { %s4467_s19 = sadd.s32 4294967295, %s4809_s18   ;;  %p4471_p0 = scmp.ge.s32.totalorder %s4809_s18, 1  ;;  %s4809_s18 = sphi %s4850_s18, %s15_s18  }
   0x2   : > { %p187_p1 = scmp.lt.s32.totalorder %s4809_s18, 3 }
   0x4   : > { %p188_p2 = pnand %p4471_p0, %p187_p1 }
   0x6   : > { %191 = sbr.rel (%p188_p2) target bundleno = 1702 (0x6a6), region = 40 }
   0xd   : > { %vm225_vm0 = vcmask 31744   ;;  %vm228_vm1 = vcmask 25600   ;;  %p4860_p3 = scmp.lt.s32.totalorder %s4467_s19, 1  ;;  %v4811_v0 = vmov 0.0   ;;  %s4812_s25 = smov 4   ;;  %vm2031_vm2 = vcmask 1043456  }
   0xe   : > { %226 = vst.msk [vmem:[#allocation2] sm:$0xff] %vm225_vm0, %v4811_v0  ;;  %227 = vst.msk [vmem:[#allocation2 + $0x8] sm:$0xff] %vm225_vm0, %v4811_v0  ;;  %s4813_s26 = smov 8   ;;  %s4814_s27 = smov 12   ;;  %vm1691_vm3 = vcmask 64512   ;;  %vm1724_vm4 = vcmask 97280  }
   0xf   : > { %230 = vst.msk [vmem:[#allocation2 + $0x18] sm:$0xff] %vm225_vm0, %v4811_v0  ;;  %231 = vst.msk [vmem:[#allocation2 + $0x20] sm:$0xff] %vm225_vm0, %v4811_v0  ;;  %s8542_s19 = smov (!%p4860_p3, %s4467_s19), 1  ;;  %s4815_s28 = smov 16   ;;  %vm1757_vm5 = vcmask 130048   ;;  %vm1790_vm6 = vcmask 162816  }
  0x10   : > { %233 = vst.msk [vmem:[#allocation2 + $0x30] sm:$0xff] %vm225_vm0, %v4811_v0  ;;  %234 = vst.msk [vmem:[#allocation2 + $0x38] sm:$0xff] %vm225_vm0, %v4811_v0  ;;  %s4546_s21 = sshll.u32 %s8542_s19, 8  ;;  %s4816_s29 = smov 20   ;;  %vm1823_vm7 = vcmask 195584   ;;  %vm1856_vm8 = vcmask 228352  }
  0x11   : > { %236 = vst.msk [vmem:[#allocation2 + $0x48] sm:$0xff] %vm225_vm0, %v4811_v0  ;;  %237 = vst.msk [vmem:[#allocation2 + $0x50] sm:$0xff] %vm225_vm0, %v4811_v0  ;;  %s5092_s24 = scalar_lea.vmem %s7997_s0, %s4546_s21  ;;  %s4817_s30 = smov 24   ;;  %vm1889_vm9 = vcmask 261120   ;;  %vm1934_vm10 = vcmask 293888  }
  0x12   : > { %239 = vst.msk [vmem:[#allocation2 + $0x60] sm:$0xff] %vm225_vm0, %v4811_v0  ;;  %240 = vst.msk [vmem:[#allocation2 + $0x68] sm:$0xff] %vm225_vm0, %v4811_v0  ;;  %v281_v1 = vld [vmem:[%s5092_s24] sm:$0xff]  ;;  %v283_v2 = vld [vmem:[%s5092_s24 + $0x10] sm:$0xff]  ;;  %s4818_s14 = smov 28   ;;  %s4819_s17 = smov 32  }
  0x13   : > { %242 = vst.msk [vmem:[#allocation2 + $0x78] sm:$0xff] %vm225_vm0, %v4811_v0  ;;  %243 = vst.msk [vmem:[#allocation2 + $0x80] sm:$0xff] %vm225_vm0, %v4811_v0  ;;  %v282_v3 = vld [vmem:[%s5092_s24 + $0x8] sm:$0xff]  ;;  %v285_v4 = vld [vmem:[%s5092_s24 + $0x20] sm:$0xff]  ;;  %s7748_s13 = scalar_lea.vmem %s8002_s5, %s4546_s21 }
  0x14   : > { %245 = vst.msk [vmem:[#allocation2 + $0x90] sm:$0xff] %vm225_vm0, %v4811_v0  ;;  %246 = vst.msk [vmem:[#allocation2 + $0x98] sm:$0xff] %vm225_vm0, %v4811_v0  ;;  %v284_v5 = vld [vmem:[%s5092_s24 + $0x18] sm:$0xff]  ;;  %v287_v6 = vld [vmem:[%s5092_s24 + $0x30] sm:$0xff] }
  0x15   : > { %248 = vst.msk [vmem:[#allocation2 + $0xa8] sm:$0xff] %vm225_vm0, %v4811_v0  ;;  %249 = vst.msk [vmem:[#allocation2 + $0xb0] sm:$0xff] %vm225_vm0, %v4811_v0  ;;  %v378_v7 = vld [vmem:[#allocation2 + $0x1] sm:$0xff]  ;;  %v288_v11 = vld [vmem:[%s5092_s24 + $0x38] sm:$0xff] }
  0x16   : > { %251 = vst.msk [vmem:[#allocation2 + $0xc0] sm:$0xff] %vm225_vm0, %v4811_v0  ;;  %252 = vst.msk [vmem:[#allocation2 + $0xc8] sm:$0xff] %vm225_vm0, %v4811_v0  ;;  %v286_v9 = vld [vmem:[%s5092_s24 + $0x28] sm:$0xff]  ;;  %667 = vrot.lane.b32.xlu0 %v378_v7, %s4812_s25  ;;  %v289_v10 = vld [vmem:[%s5092_s24 + $0x40] sm:$0xff] }
  0x17   : > { %254 = vst.msk [vmem:[#allocation2 + $0xd8] sm:$0xff] %vm225_vm0, %v4811_v0  ;;  %255 = vst.msk [vmem:[#allocation2 + $0xe0] sm:$0xff] %vm225_vm0, %v4811_v0  ;;  %v291_v12 = vld [vmem:[%s5092_s24 + $0x50] sm:$0xff]  ;;  %v290_v13 = vld [vmem:[%s5092_s24 + $0x48] sm:$0xff] }
  0x18   : > { %257 = vst.msk [vmem:[#allocation2 + $0xf0] sm:$0xff] %vm225_vm0, %v4811_v0  ;;  %258 = vst.msk [vmem:[#allocation2 + $0xf8] sm:$0xff] %vm225_vm0, %v4811_v0  ;;  %v293_v14 = vld [vmem:[%s5092_s24 + $0x60] sm:$0xff]  ;;  %v292_v15 = vld [vmem:[%s5092_s24 + $0x58] sm:$0xff] }
  0x19   : > { %260 = vst.msk [vmem:[#allocation2 + $0x108] sm:$0xff] %vm225_vm0, %v4811_v0  ;;  %261 = vst.msk [vmem:[#allocation2 + $0x110] sm:$0xff] %vm225_vm0, %v4811_v0  ;;  %v295_v16 = vld [vmem:[%s5092_s24 + $0x70] sm:$0xff]  ;;  %v294_v17 = vld [vmem:[%s5092_s24 + $0x68] sm:$0xff] }
  0x1a   : > { %263 = vst.msk [vmem:[#allocation2 + $0x120] sm:$0xff] %vm225_vm0, %v4811_v0  ;;  %264 = vst.msk [vmem:[#allocation2 + $0x128] sm:$0xff] %vm225_vm0, %v4811_v0  ;;  %v297_v18 = vld [vmem:[%s5092_s24 + $0x80] sm:$0xff]  ;;  %v296_v19 = vld [vmem:[%s5092_s24 + $0x78] sm:$0xff] }
  0x1b   : > { %266 = vst.msk [vmem:[#allocation2 + $0x138] sm:$0xff] %vm225_vm0, %v4811_v0  ;;  %267 = vst.msk [vmem:[#allocation2 + $0x140] sm:$0xff] %vm225_vm0, %v4811_v0  ;;  %v299_v20 = vld [vmem:[%s5092_s24 + $0x90] sm:$0xff]  ;;  %v298_v21 = vld [vmem:[%s5092_s24 + $0x88] sm:$0xff] }
  0x1c   : > { %269 = vst.msk [vmem:[#allocation2 + $0x150] sm:$0xff] %vm225_vm0, %v4811_v0  ;;  %270 = vst.msk [vmem:[#allocation2 + $0x158] sm:$0xff] %vm225_vm0, %v4811_v0  ;;  %v301_v22 = vld [vmem:[%s5092_s24 + $0xa0] sm:$0xff]  ;;  %v300_v23 = vld [vmem:[%s5092_s24 + $0x98] sm:$0xff] }
  0x1d   : > { %272 = vst.msk [vmem:[#allocation2 + $0x168] sm:$0xff] %vm225_vm0, %v4811_v0  ;;  %273 = vst.msk [vmem:[#allocation2 + $0x170] sm:$0xff] %vm225_vm0, %v4811_v0  ;;  %v303_v24 = vld [vmem:[%s5092_s24 + $0xb0] sm:$0xff]  ;;  %v302_v28 = vld [vmem:[%s5092_s24 + $0xa8] sm:$0xff] }
  0x1e   : > { %275 = vst.msk [vmem:[#allocation2 + $0x180] sm:$0xff] %vm225_vm0, %v4811_v0  ;;  %276 = vst.msk [vmem:[#allocation2 + $0x188] sm:$0xff] %vm225_vm0, %v4811_v0  ;;  %v305_v29 = vld [vmem:[%s5092_s24 + $0xc0] sm:$0xff]  ;;  %v304_v33 = vld [vmem:[%s5092_s24 + $0xb8] sm:$0xff] }
  0x1f   : > { %278 = vst.msk [vmem:[#allocation2 + $0x198] sm:$0xff] %vm225_vm0, %v4811_v0  ;;  %279 = vst.msk [vmem:[#allocation2 + $0x1a0] sm:$0xff] %vm225_vm0, %v4811_v0  ;;  %v307_v34 = vld [vmem:[%s5092_s24 + $0xd0] sm:$0xff]  ;;  %v306_v35 = vld [vmem:[%s5092_s24 + $0xc8] sm:$0xff] }
  0x20   : > { %2292 = vst.msk [vmem:[#allocation3] sm:$0xff] %vm225_vm0, %v4811_v0  ;;  %2293 = vst.msk [vmem:[#allocation3 + $0x8] sm:$0xff] %vm225_vm0, %v4811_v0  ;;  %v309_v36 = vld [vmem:[%s5092_s24 + $0xe0] sm:$0xff]  ;;  %v308_v37 = vld [vmem:[%s5092_s24 + $0xd8] sm:$0xff] }
  0x21   : > { %2295 = vst.msk [vmem:[#allocation3 + $0x18] sm:$0xff] %vm225_vm0, %v4811_v0  ;;  %2296 = vst.msk [vmem:[#allocation3 + $0x20] sm:$0xff] %vm225_vm0, %v4811_v0  ;;  %v310_v39 = vld [vmem:[%s5092_s24 + $0xe8] sm:$0xff]  ;;  %v311_v58 = vld [vmem:[%s5092_s24 + $0xf0] sm:$0xff] }
  0x22   : > { %2298 = vst.msk [vmem:[#allocation3 + $0x30] sm:$0xff] %vm225_vm0, %v4811_v0  ;;  %2299 = vst.msk [vmem:[#allocation3 + $0x38] sm:$0xff] %vm225_vm0, %v4811_v0  ;;  %v312_v62 = vld [vmem:[%s5092_s24 + $0xf8] sm:$0xff] }
  0x23   : > { %2301 = vst.msk [vmem:[#allocation3 + $0x48] sm:$0xff] %vm225_vm0, %v4811_v0  ;;  %2302 = vst.msk [vmem:[#allocation3 + $0x50] sm:$0xff] %vm225_vm0, %v4811_v0 }
  0x24   : > { %2304 = vst.msk [vmem:[#allocation3 + $0x60] sm:$0xff] %vm225_vm0, %v4811_v0  ;;  %2305 = vst.msk [vmem:[#allocation3 + $0x68] sm:$0xff] %vm225_vm0, %v4811_v0 }
  0x25   : > { %2307 = vst.msk [vmem:[#allocation3 + $0x78] sm:$0xff] %vm225_vm0, %v4811_v0  ;;  %2308 = vst.msk [vmem:[#allocation3 + $0x80] sm:$0xff] %vm225_vm0, %v4811_v0 }
  0x26   : > { %2310 = vst.msk [vmem:[#allocation3 + $0x90] sm:$0xff] %vm225_vm0, %v4811_v0  ;;  %2311 = vst.msk [vmem:[#allocation3 + $0x98] sm:$0xff] %vm225_vm0, %v4811_v0 }
  0x27   : > { %2313 = vst.msk [vmem:[#allocation3 + $0xa8] sm:$0xff] %vm225_vm0, %v4811_v0  ;;  %2314 = vst.msk [vmem:[#allocation3 + $0xb0] sm:$0xff] %vm225_vm0, %v4811_v0 }
  0x28   : > { %2316 = vst.msk [vmem:[#allocation3 + $0xc0] sm:$0xff] %vm225_vm0, %v4811_v0  ;;  %2317 = vst.msk [vmem:[#allocation3 + $0xc8] sm:$0xff] %vm225_vm0, %v4811_v0 }
  0x29   : > { %2319 = vst.msk [vmem:[#allocation3 + $0xd8] sm:$0xff] %vm225_vm0, %v4811_v0  ;;  %2320 = vst.msk [vmem:[#allocation3 + $0xe0] sm:$0xff] %vm225_vm0, %v4811_v0 }
  0x2a   : > { %2322 = vst.msk [vmem:[#allocation3 + $0xf0] sm:$0xff] %vm225_vm0, %v4811_v0  ;;  %2323 = vst.msk [vmem:[#allocation3 + $0xf8] sm:$0xff] %vm225_vm0, %v4811_v0 }
  0x2b   : > { %2325 = vst.msk [vmem:[#allocation3 + $0x108] sm:$0xff] %vm225_vm0, %v4811_v0  ;;  %2326 = vst.msk [vmem:[#allocation3 + $0x110] sm:$0xff] %vm225_vm0, %v4811_v0 }
  0x2c   : > { %2328 = vst.msk [vmem:[#allocation3 + $0x120] sm:$0xff] %vm225_vm0, %v4811_v0  ;;  %2329 = vst.msk [vmem:[#allocation3 + $0x128] sm:$0xff] %vm225_vm0, %v4811_v0 }
  0x2d   : > { %2331 = vst.msk [vmem:[#allocation3 + $0x138] sm:$0xff] %vm225_vm0, %v4811_v0  ;;  %2332 = vst.msk [vmem:[#allocation3 + $0x140] sm:$0xff] %vm225_vm0, %v4811_v0 }
  0x2e   : > { %2334 = vst.msk [vmem:[#allocation3 + $0x150] sm:$0xff] %vm225_vm0, %v4811_v0  ;;  %2335 = vst.msk [vmem:[#allocation3 + $0x158] sm:$0xff] %vm225_vm0, %v4811_v0 }
  0x2f   : > { %2337 = vst.msk [vmem:[#allocation3 + $0x168] sm:$0xff] %vm225_vm0, %v4811_v0  ;;  %2338 = vst.msk [vmem:[#allocation3 + $0x170] sm:$0xff] %vm225_vm0, %v4811_v0 }
  0x30   : > { %2340 = vst.msk [vmem:[#allocation3 + $0x180] sm:$0xff] %vm225_vm0, %v4811_v0  ;;  %2341 = vst.msk [vmem:[#allocation3 + $0x188] sm:$0xff] %vm225_vm0, %v4811_v0 }
  0x31   : > { %2343 = vst.msk [vmem:[#allocation3 + $0x198] sm:$0xff] %vm225_vm0, %v4811_v0  ;;  %2344 = vst.msk [vmem:[#allocation3 + $0x1a0] sm:$0xff] %vm225_vm0, %v4811_v0 }
  0x32   : > { %229 = vst.msk [vmem:[#allocation2 + $0x10] sm:$0x3] %vm228_vm1, %v4811_v0  ;;  %232 = vst.msk [vmem:[#allocation2 + $0x28] sm:$0x3] %vm228_vm1, %v4811_v0 }
  0x33   : > { %235 = vst.msk [vmem:[#allocation2 + $0x40] sm:$0x3] %vm228_vm1, %v4811_v0  ;;  %238 = vst.msk [vmem:[#allocation2 + $0x58] sm:$0x3] %vm228_vm1, %v4811_v0 }
  0x34   : > { %241 = vst.msk [vmem:[#allocation2 + $0x70] sm:$0x3] %vm228_vm1, %v4811_v0  ;;  %244 = vst.msk [vmem:[#allocation2 + $0x88] sm:$0x3] %vm228_vm1, %v4811_v0 }
  0x35   : > { %247 = vst.msk [vmem:[#allocation2 + $0xa0] sm:$0x3] %vm228_vm1, %v4811_v0  ;;  %250 = vst.msk [vmem:[#allocation2 + $0xb8] sm:$0x3] %vm228_vm1, %v4811_v0 }
  0x36   : > { %253 = vst.msk [vmem:[#allocation2 + $0xd0] sm:$0x3] %vm228_vm1, %v4811_v0  ;;  %256 = vst.msk [vmem:[#allocation2 + $0xe8] sm:$0x3] %vm228_vm1, %v4811_v0 }
  0x37   : > { %259 = vst.msk [vmem:[#allocation2 + $0x100] sm:$0x3] %vm228_vm1, %v4811_v0  ;;  %262 = vst.msk [vmem:[#allocation2 + $0x118] sm:$0x3] %vm228_vm1, %v4811_v0 }
  0x38   : > { %265 = vst.msk [vmem:[#allocation2 + $0x130] sm:$0x3] %vm228_vm1, %v4811_v0  ;;  %268 = vst.msk [vmem:[#allocation2 + $0x148] sm:$0x3] %vm228_vm1, %v4811_v0 }
  0x39   : > { %271 = vst.msk [vmem:[#allocation2 + $0x160] sm:$0x3] %vm228_vm1, %v4811_v0  ;;  %274 = vst.msk [vmem:[#allocation2 + $0x178] sm:$0x3] %vm228_vm1, %v4811_v0  ;;  %v379_v8 = vld [vmem:[#allocation2 + $0x9] sm:$0xff] }
  0x3a   : > { %277 = vst.msk [vmem:[#allocation2 + $0x190] sm:$0x3] %vm228_vm1, %v4811_v0  ;;  %280 = vst.msk [vmem:[#allocation2 + $0x1a8] sm:$0x3] %vm228_vm1, %v4811_v0  ;;  %669 = vrot.lane.b32.xlu0 %v379_v8, %s4812_s25 }
  0x3b   : > { %2294 = vst.msk [vmem:[#allocation3 + $0x10] sm:$0x3] %vm228_vm1, %v4811_v0  ;;  %2297 = vst.msk [vmem:[#allocation3 + $0x28] sm:$0x3] %vm228_vm1, %v4811_v0 }
  0x3c   : > { %2300 = vst.msk [vmem:[#allocation3 + $0x40] sm:$0x3] %vm228_vm1, %v4811_v0  ;;  %2303 = vst.msk [vmem:[#allocation3 + $0x58] sm:$0x3] %vm228_vm1, %v4811_v0 }
  0x3d   : > { %2306 = vst.msk [vmem:[#allocation3 + $0x70] sm:$0x3] %vm228_vm1, %v4811_v0  ;;  %2309 = vst.msk [vmem:[#allocation3 + $0x88] sm:$0x3] %vm228_vm1, %v4811_v0 }
  0x3e   : > { %2312 = vst.msk [vmem:[#allocation3 + $0xa0] sm:$0x3] %vm228_vm1, %v4811_v0  ;;  %2315 = vst.msk [vmem:[#allocation3 + $0xb8] sm:$0x3] %vm228_vm1, %v4811_v0 }
  0x3f   : > { %2318 = vst.msk [vmem:[#allocation3 + $0xd0] sm:$0x3] %vm228_vm1, %v4811_v0  ;;  %2321 = vst.msk [vmem:[#allocation3 + $0xe8] sm:$0x3] %vm228_vm1, %v4811_v0 }
  0x40   : > { %2324 = vst.msk [vmem:[#allocation3 + $0x100] sm:$0x3] %vm228_vm1, %v4811_v0  ;;  %2327 = vst.msk [vmem:[#allocation3 + $0x118] sm:$0x3] %vm228_vm1, %v4811_v0 }
  0x41   : > { %2330 = vst.msk [vmem:[#allocation3 + $0x130] sm:$0x3] %vm228_vm1, %v4811_v0  ;;  %2333 = vst.msk [vmem:[#allocation3 + $0x148] sm:$0x3] %vm228_vm1, %v4811_v0 }
  0x42   : > { %2336 = vst.msk [vmem:[#allocation3 + $0x160] sm:$0x3] %vm228_vm1, %v4811_v0  ;;  %2339 = vst.msk [vmem:[#allocation3 + $0x178] sm:$0x3] %vm228_vm1, %v4811_v0 }
  0x43   : > { %2342 = vst.msk [vmem:[#allocation3 + $0x190] sm:$0x3] %vm228_vm1, %v4811_v0  ;;  %2345 = vst.msk [vmem:[#allocation3 + $0x1a8] sm:$0x3] %vm228_vm1, %v4811_v0  ;;  %v410_v0 = vld [vmem:[#allocation2 + $0x2] sm:$0xff] }
  0x44   : > { %314 = vst.msk [vmem:[#allocation2 + $0x19] sm:$0xff] %vm225_vm0, %v281_v1  ;;  %316 = vst.msk [vmem:[#allocation2 + $0x31] sm:$0xff] %vm225_vm0, %v283_v2 }
  0x45   : > { %315 = vst.msk [vmem:[#allocation2 + $0x21] sm:$0xff] %vm225_vm0, %v282_v3  ;;  %318 = vst.msk [vmem:[#allocation2 + $0x49] sm:$0xff] %vm225_vm0, %v285_v4  ;;  %v411_v3 = vld [vmem:[#allocation2 + $0xa] sm:$0xff] }
  0x46   : > { %317 = vst.msk [vmem:[#allocation2 + $0x39] sm:$0xff] %vm225_vm0, %v284_v5  ;;  %320 = vst.msk [vmem:[#allocation2 + $0x61] sm:$0xff] %vm225_vm0, %v287_v6 }
  0x47   : > { %319 = vst.msk [vmem:[#allocation2 + $0x51] sm:$0xff] %vm225_vm0, %v286_v9  ;;  %322 = vst.msk [vmem:[#allocation2 + $0x79] sm:$0xff] %vm225_vm0, %v289_v10 }
  0x48   : > { %321 = vst.msk [vmem:[#allocation2 + $0x69] sm:$0xff] %vm225_vm0, %v288_v11  ;;  %324 = vst.msk [vmem:[#allocation2 + $0x91] sm:$0xff] %vm225_vm0, %v291_v12 }
  0x49   : > { %323 = vst.msk [vmem:[#allocation2 + $0x81] sm:$0xff] %vm225_vm0, %v290_v13  ;;  %326 = vst.msk [vmem:[#allocation2 + $0xa9] sm:$0xff] %vm225_vm0, %v293_v14 }
  0x4a   : > { %325 = vst.msk [vmem:[#allocation2 + $0x99] sm:$0xff] %vm225_vm0, %v292_v15  ;;  %328 = vst.msk [vmem:[#allocation2 + $0xc1] sm:$0xff] %vm225_vm0, %v295_v16 }
  0x4b   : > { %327 = vst.msk [vmem:[#allocation2 + $0xb1] sm:$0xff] %vm225_vm0, %v294_v17  ;;  %330 = vst.msk [vmem:[#allocation2 + $0xd9] sm:$0xff] %vm225_vm0, %v297_v18  ;;  %v5137_v25 = vld [vmem:[#allocation2 + $0x19] sm:$0xff]  ;;  %v5139_v26 = vld [vmem:[#allocation2 + $0x31] sm:$0xff] }
  0x4c   : > { %329 = vst.msk [vmem:[#allocation2 + $0xc9] sm:$0xff] %vm225_vm0, %v296_v19  ;;  %332 = vst.msk [vmem:[#allocation2 + $0xf1] sm:$0xff] %vm225_vm0, %v299_v20  ;;  %671 = vrot.lane.b32.xlu1 %v5137_v25, %s4812_s25  ;;  %v5146_v27 = vld [vmem:[#allocation2 + $0x21] sm:$0xff]  ;;  %675 = vrot.lane.b32.xlu0 %v5139_v26, %s4812_s25  ;;  %v5154_v30 = vld [vmem:[#allocation2 + $0x49] sm:$0xff] }
  0x4d   : > { %331 = vst.msk [vmem:[#allocation2 + $0xe1] sm:$0xff] %vm225_vm0, %v298_v21  ;;  %334 = vst.msk [vmem:[#allocation2 + $0x109] sm:$0xff] %vm225_vm0, %v301_v22  ;;  %v5158_v31 = vld [vmem:[#allocation2 + $0x39] sm:$0xff]  ;;  %v5162_v32 = vld [vmem:[#allocation2 + $0x61] sm:$0xff] }
  0x4e   : > { %333 = vst.msk [vmem:[#allocation2 + $0xf9] sm:$0xff] %vm225_vm0, %v300_v23  ;;  %336 = vst.msk [vmem:[#allocation2 + $0x121] sm:$0xff] %vm225_vm0, %v303_v24  ;;  %v5174_v38 = vld [vmem:[#allocation2 + $0x51] sm:$0xff]  ;;  %v5182_v40 = vld [vmem:[#allocation2 + $0x79] sm:$0xff] }
  0x4f   : > { %335 = vst.msk [vmem:[#allocation2 + $0x111] sm:$0xff] %vm225_vm0, %v302_v28  ;;  %338 = vst.msk [vmem:[#allocation2 + $0x139] sm:$0xff] %vm225_vm0, %v305_v29  ;;  %v5186_v41 = vld [vmem:[#allocation2 + $0x69] sm:$0xff]  ;;  %v5190_v42 = vld [vmem:[#allocation2 + $0x91] sm:$0xff] }
  0x50   : > { %673 = vrot.lane.b32.xlu1 %v5146_v27, %s4812_s25  ;;  %679 = vrot.lane.b32.xlu0 %v5154_v30, %s4812_s25  ;;  %337 = vst.msk [vmem:[#allocation2 + $0x129] sm:$0xff] %vm225_vm0, %v304_v33  ;;  %340 = vst.msk [vmem:[#allocation2 + $0x151] sm:$0xff] %vm225_vm0, %v307_v34  ;;  %v5194_v43 = vld [vmem:[#allocation2 + $0x81] sm:$0xff]  ;;  %v5198_v44 = vld [vmem:[#allocation2 + $0xa9] sm:$0xff] }
  0x51   : > { %339 = vst.msk [vmem:[#allocation2 + $0x141] sm:$0xff] %vm225_vm0, %v306_v35  ;;  %342 = vst.msk [vmem:[#allocation2 + $0x169] sm:$0xff] %vm225_vm0, %v309_v36  ;;  %v5202_v45 = vld [vmem:[#allocation2 + $0x99] sm:$0xff]  ;;  %v5206_v46 = vld [vmem:[#allocation2 + $0xc1] sm:$0xff] }
  0x52   : > { %341 = vst.msk [vmem:[#allocation2 + $0x159] sm:$0xff] %vm225_vm0, %v308_v37  ;;  %343 = vst.msk [vmem:[#allocation2 + $0x171] sm:$0xff] %vm225_vm0, %v310_v39  ;;  %v5210_v47 = vld [vmem:[#allocation2 + $0xb1] sm:$0xff]  ;;  %v5214_v48 = vld [vmem:[#allocation2 + $0xd9] sm:$0xff] }
  0x53   : > { %v5218_v49 = vld [vmem:[#allocation2 + $0xc9] sm:$0xff]  ;;  %v5222_v50 = vld [vmem:[#allocation2 + $0xf1] sm:$0xff]  ;;  %344 = vst.msk [vmem:[#allocation2 + $0x181] sm:$0xff] %vm225_vm0, %v311_v58  ;;  %345 = vst.msk [vmem:[#allocation2 + $0x189] sm:$0xff] %vm225_vm0, %v312_v62 }
  0x54   : > { %677 = vrot.lane.b32.xlu1 %v5158_v31, %s4812_s25  ;;  %683 = vrot.lane.b32.xlu0 %v5162_v32, %s4812_s25  ;;  %v5226_v51 = vld [vmem:[#allocation2 + $0xe1] sm:$0xff]  ;;  %v5230_v52 = vld [vmem:[#allocation2 + $0x109] sm:$0xff]  ;;  %v5285_v4 = vld [vmem:[#allocation2 + $0x32] sm:$0xff] }
  0x55   : > { %v5234_v53 = vld [vmem:[#allocation2 + $0xf9] sm:$0xff]  ;;  %v5238_v54 = vld [vmem:[#allocation2 + $0x121] sm:$0xff]  ;;  %v5292_v6 = vld [vmem:[#allocation2 + $0x4a] sm:$0xff] }
  0x56   : > { %v5242_v55 = vld [vmem:[#allocation2 + $0x111] sm:$0xff]  ;;  %v5246_v56 = vld [vmem:[#allocation2 + $0x139] sm:$0xff]  ;;  %v5288_v5 = vld [vmem:[#allocation2 + $0x22] sm:$0xff] }
  0x57   : > { %v5250_v57 = vld [vmem:[#allocation2 + $0x129] sm:$0xff]  ;;  %v5256_v59 = vld [vmem:[#allocation2 + $0x151] sm:$0xff]  ;;  %v5279_v2 = vld [vmem:[#allocation2 + $0x1a] sm:$0xff] }
  0x58   : > { %681 = vrot.lane.b32.xlu1 %v5174_v38, %s4812_s25  ;;  %687 = vrot.lane.b32.xlu0 %v5182_v40, %s4812_s25  ;;  %v5260_v60 = vld [vmem:[#allocation2 + $0x141] sm:$0xff]  ;;  %v5264_v61 = vld [vmem:[#allocation2 + $0x169] sm:$0xff]  ;;  %v5304_v9 = vld [vmem:[#allocation2 + $0x52] sm:$0xff] }
  0x59   : > { %v5270_v63 = vld [vmem:[#allocation2 + $0x159] sm:$0xff]  ;;  %v5276_v1 = vld [vmem:[#allocation2 + $0x171] sm:$0xff]  ;;  %v5300_v8 = vld [vmem:[#allocation2 + $0x62] sm:$0xff] }
  0x5a   : > { %v5296_v7 = vld [vmem:[#allocation2 + $0x3a] sm:$0xff]  ;;  %v5312_v11 = vld [vmem:[#allocation2 + $0x6a] sm:$0xff]  ;;  %v5316_v12 = vld [vmem:[#allocation2 + $0x92] sm:$0xff] }
  0x5b   : > { %v5308_v10 = vld [vmem:[#allocation2 + $0x7a] sm:$0xff]  ;;  %v5320_v13 = vld [vmem:[#allocation2 + $0x82] sm:$0xff]  ;;  %v5324_v14 = vld [vmem:[#allocation2 + $0xaa] sm:$0xff] }
  0x5c   : > { %685 = vrot.lane.b32.xlu1 %v5186_v41, %s4812_s25  ;;  %691 = vrot.lane.b32.xlu0 %v5190_v42, %s4812_s25  ;;  %v5328_v15 = vld [vmem:[#allocation2 + $0x9a] sm:$0xff]  ;;  %v5332_v16 = vld [vmem:[#allocation2 + $0xc2] sm:$0xff]  ;;  %v5336_v17 = vld [vmem:[#allocation2 + $0xb2] sm:$0xff] }
  0x5d   : > { %v5340_v18 = vld [vmem:[#allocation2 + $0xda] sm:$0xff]  ;;  %v5344_v19 = vld [vmem:[#allocation2 + $0xca] sm:$0xff]  ;;  %v5348_v20 = vld [vmem:[#allocation2 + $0xf2] sm:$0xff] }
  0x5e   : > { %v5352_v21 = vld [vmem:[#allocation2 + $0xe2] sm:$0xff]  ;;  %v5356_v22 = vld [vmem:[#allocation2 + $0x10a] sm:$0xff]  ;;  %v5360_v23 = vld [vmem:[#allocation2 + $0xfa] sm:$0xff] }
  0x5f   : > { %v5364_v24 = vld [vmem:[#allocation2 + $0x122] sm:$0xff]  ;;  %v5368_v28 = vld [vmem:[#allocation2 + $0x112] sm:$0xff]  ;;  %v5372_v29 = vld [vmem:[#allocation2 + $0x13a] sm:$0xff] }
  0x60   : > { %689 = vrot.lane.b32.xlu1 %v5194_v43, %s4812_s25  ;;  %695 = vrot.lane.b32.xlu0 %v5198_v44, %s4812_s25  ;;  %v5378_v34 = vld [vmem:[#allocation2 + $0x12a] sm:$0xff]  ;;  %v5382_v35 = vld [vmem:[#allocation2 + $0x152] sm:$0xff]  ;;  %v5388_v37 = vld [vmem:[#allocation2 + $0x142] sm:$0xff] }
  0x61   : > { %8047 = vst [vmem:[#allocation6_spill] sm:$0xff] %v5388_v37  ;;  %v5394_v58 = vld [vmem:[#allocation2 + $0x16a] sm:$0xff] }
  0x62   : > { %8049 = vst [vmem:[#allocation8_spill] sm:$0xff] %v5394_v58 }
  0x64   : > { %693 = vrot.lane.b32.xlu1 %v5202_v45, %s4812_s25  ;;  %699 = vrot.lane.b32.xlu0 %v5206_v46, %s4812_s25 }
  0x68   : > { %697 = vrot.lane.b32.xlu1 %v5210_v47, %s4812_s25  ;;  %703 = vrot.lane.b32.xlu0 %v5214_v48, %s4812_s25 }
  0x6c   : > { %701 = vrot.lane.b32.xlu1 %v5218_v49, %s4812_s25  ;;  %707 = vrot.lane.b32.xlu0 %v5222_v50, %s4812_s25 }
  0x70   : > { %705 = vrot.lane.b32.xlu1 %v5226_v51, %s4812_s25  ;;  %711 = vrot.lane.b32.xlu0 %v5230_v52, %s4812_s25 }
  0x74   : > { %709 = vrot.lane.b32.xlu1 %v5234_v53, %s4812_s25  ;;  %715 = vrot.lane.b32.xlu0 %v5238_v54, %s4812_s25 }
  0x78   : > { %713 = vrot.lane.b32.xlu1 %v5242_v55, %s4812_s25  ;;  %719 = vrot.lane.b32.xlu0 %v5246_v56, %s4812_s25 }
  0x7c   : > { %717 = vrot.lane.b32.xlu1 %v5250_v57, %s4812_s25  ;;  %723 = vrot.lane.b32.xlu0 %v5256_v59, %s4812_s25 }
  0x80   : > { %721 = vrot.lane.b32.xlu1 %v5260_v60, %s4812_s25  ;;  %727 = vrot.lane.b32.xlu0 %v5264_v61, %s4812_s25 }
  0x84   : > { %725 = vrot.lane.b32.xlu1 %v5270_v63, %s4812_s25  ;;  %795 = vrot.lane.b32.xlu0 %v410_v0, %s4813_s26  ;;  %v5400_v0 = vld [vmem:[#allocation2 + $0x15a] sm:$0xff] }
  0x85   : > { %8051 = vst [vmem:[#allocation10_spill] sm:$0xff] %v5400_v0 }
  0x88   : > { %729 = vrot.lane.b32.xlu1 %v5276_v1, %s4812_s25  ;;  %799 = vrot.lane.b32.xlu0 %v5279_v2, %s4813_s26  ;;  %v5374_v33 = vpop.permute.xlu0 %667 }
  0x89   : > { %8045 = vst [vmem:[#allocation4_spill] sm:$0xff] %v5374_v33  ;;  %v5412_v33 = vld [vmem:[#allocation2 + $0x172] sm:$0xff] }
  0x8a   : > { %8055 = vst [vmem:[#allocation14_spill] sm:$0xff] %v5412_v33 }
  0x8c   : > { %797 = vrot.lane.b32.xlu1 %v411_v3, %s4813_s26  ;;  %803 = vrot.lane.b32.xlu0 %v5285_v4, %s4813_s26 }
  0x90   : > { %801 = vrot.lane.b32.xlu1 %v5288_v5, %s4813_s26  ;;  %807 = vrot.lane.b32.xlu0 %v5292_v6, %s4813_s26 }
  0x94   : > { %805 = vrot.lane.b32.xlu1 %v5296_v7, %s4813_s26  ;;  %811 = vrot.lane.b32.xlu0 %v5300_v8, %s4813_s26 }
  0x98   : > { %809 = vrot.lane.b32.xlu1 %v5304_v9, %s4813_s26  ;;  %815 = vrot.lane.b32.xlu0 %v5308_v10, %s4813_s26 }
  0x9c   : > { %813 = vrot.lane.b32.xlu1 %v5312_v11, %s4813_s26  ;;  %819 = vrot.lane.b32.xlu0 %v5316_v12, %s4813_s26 }
  0xa0   : > { %817 = vrot.lane.b32.xlu1 %v5320_v13, %s4813_s26  ;;  %823 = vrot.lane.b32.xlu0 %v5324_v14, %s4813_s26 }
  0xa4   : > { %821 = vrot.lane.b32.xlu1 %v5328_v15, %s4813_s26  ;;  %827 = vrot.lane.b32.xlu0 %v5332_v16, %s4813_s26 }
  0xa8   : > { %825 = vrot.lane.b32.xlu1 %v5336_v17, %s4813_s26  ;;  %831 = vrot.lane.b32.xlu0 %v5340_v18, %s4813_s26 }
  0xac   : > { %829 = vrot.lane.b32.xlu1 %v5344_v19, %s4813_s26  ;;  %835 = vrot.lane.b32.xlu0 %v5348_v20, %s4813_s26  ;;  %v5384_v36 = vpop.permute.xlu0 %669 }
  0xad   : > { %8046 = vst [vmem:[#allocation5_spill] sm:$0xff] %v5384_v36 }
  0xb0   : > { %833 = vrot.lane.b32.xlu1 %v5352_v21, %s4813_s26  ;;  %839 = vrot.lane.b32.xlu0 %v5356_v22, %s4813_s26 }
  0xb4   : > { %837 = vrot.lane.b32.xlu1 %v5360_v23, %s4813_s26  ;;  %843 = vrot.lane.b32.xlu0 %v5364_v24, %s4813_s26 }
  0xb8   : > { %841 = vrot.lane.b32.xlu1 %v5368_v28, %s4813_s26  ;;  %847 = vrot.lane.b32.xlu0 %v5372_v29, %s4813_s26 }
  0xbc   : > { %845 = vrot.lane.b32.xlu1 %v5378_v34, %s4813_s26  ;;  %851 = vrot.lane.b32.xlu0 %v5382_v35, %s4813_s26 }
  0xbe   : > { %v5392_v39 = vpop.permute.xlu1 %671  ;;  %v5396_v62 = vpop.permute.xlu0 %675 }
  0xbf   : > { %8048 = vst [vmem:[#allocation7_spill] sm:$0xff] %v5392_v39  ;;  %8050 = vst [vmem:[#allocation9_spill] sm:$0xff] %v5396_v62  ;;  %v5410_v39 = vld [vmem:[#allocation2 + $0x18] sm:$0xff] }
  0xc0   : > { %849 = vrot.lane.b32.xlu1 %v5388_v37, %s4813_s26  ;;  %855 = vrot.lane.b32.xlu0 %v5394_v58, %s4813_s26  ;;  %8054 = vst [vmem:[#allocation13_spill] sm:$0xff] %v5410_v39 }
  0xc2   : > { %v5404_v3 = vpop.permute.xlu1 %673  ;;  %v5406_v36 = vpop.permute.xlu0 %679 }
  0xc3   : > { %8052 = vst [vmem:[#allocation11_spill] sm:$0xff] %v5404_v3  ;;  %8053 = vst [vmem:[#allocation12_spill] sm:$0xff] %v5406_v36  ;;  %v5422_v3 = vld [vmem:[#allocation2 + $0x30] sm:$0xff] }
  0xc4   : > { %853 = vrot.lane.b32.xlu1 %v5400_v0, %s4813_s26  ;;  %923 = vrot.lane.b32.xlu0 %v5410_v39, %s4814_s27  ;;  %8058 = vst [vmem:[#allocation17_spill] sm:$0xff] %v5422_v3  ;;  %v5428_v0 = vld [vmem:[#allocation2 + $0x20] sm:$0xff]  ;;  %v5440_v39 = vld [vmem:[#allocation2 + $0x38] sm:$0xff] }
  0xc5   : > { %8060 = vst [vmem:[#allocation19_spill] sm:$0xff] %v5428_v0  ;;  %8064 = vst [vmem:[#allocation23_spill] sm:$0xff] %v5440_v39 }
  0xc6   : > { %v5416_v62 = vpop.permute.xlu1 %677  ;;  %v5418_v37 = vpop.permute.xlu0 %683 }
  0xc7   : > { %8056 = vst [vmem:[#allocation15_spill] sm:$0xff] %v5416_v62  ;;  %8057 = vst [vmem:[#allocation16_spill] sm:$0xff] %v5418_v37  ;;  %v5434_v62 = vld [vmem:[#allocation2 + $0x48] sm:$0xff] }
  0xc8   : > { %857 = vrot.lane.b32.xlu1 %v5412_v33, %s4813_s26  ;;  %927 = vrot.lane.b32.xlu0 %v5422_v3, %s4814_s27  ;;  %8062 = vst [vmem:[#allocation21_spill] sm:$0xff] %v5434_v62 }
  0xca   : > { %v5426_v36 = vpop.permute.xlu1 %681  ;;  %v5430_v58 = vpop.permute.xlu0 %687 }
  0xcb   : > { %8059 = vst [vmem:[#allocation18_spill] sm:$0xff] %v5426_v36  ;;  %8061 = vst [vmem:[#allocation20_spill] sm:$0xff] %v5430_v58  ;;  %v5446_v36 = vld [vmem:[#allocation2 + $0x60] sm:$0xff] }
  0xcc   : > { %925 = vrot.lane.b32.xlu1 %v5428_v0, %s4814_s27  ;;  %931 = vrot.lane.b32.xlu0 %v5434_v62, %s4814_s27  ;;  %8066 = vst [vmem:[#allocation25_spill] sm:$0xff] %v5446_v36  ;;  %v5452_v0 = vld [vmem:[#allocation2 + $0x50] sm:$0xff] }
  0xcd   : > { %8068 = vst [vmem:[#allocation27_spill] sm:$0xff] %v5452_v0 }
  0xce   : > { %v5438_v37 = vpop.permute.xlu1 %685  ;;  %v5442_v33 = vpop.permute.xlu0 %691 }
  0xcf   : > { %8063 = vst [vmem:[#allocation22_spill] sm:$0xff] %v5438_v37  ;;  %8065 = vst [vmem:[#allocation24_spill] sm:$0xff] %v5442_v33  ;;  %v5458_v37 = vld [vmem:[#allocation2 + $0x78] sm:$0xff] }
  0xd0   : > { %929 = vrot.lane.b32.xlu1 %v5440_v39, %s4814_s27  ;;  %935 = vrot.lane.b32.xlu0 %v5446_v36, %s4814_s27  ;;  %8070 = vst [vmem:[#allocation29_spill] sm:$0xff] %v5458_v37  ;;  %v5464_v39 = vld [vmem:[#allocation2 + $0x68] sm:$0xff] }
  0xd1   : > { %8072 = vst [vmem:[#allocation31_spill] sm:$0xff] %v5464_v39 }
  0xd2   : > { %v5450_v58 = vpop.permute.xlu1 %689  ;;  %v5454_v3 = vpop.permute.xlu0 %695 }
  0xd3   : > { %8067 = vst [vmem:[#allocation26_spill] sm:$0xff] %v5450_v58  ;;  %8069 = vst [vmem:[#allocation28_spill] sm:$0xff] %v5454_v3  ;;  %v5470_v58 = vld [vmem:[#allocation2 + $0x90] sm:$0xff] }
  0xd4   : > { %933 = vrot.lane.b32.xlu1 %v5452_v0, %s4814_s27  ;;  %939 = vrot.lane.b32.xlu0 %v5458_v37, %s4814_s27  ;;  %8074 = vst [vmem:[#allocation33_spill] sm:$0xff] %v5470_v58  ;;  %v5476_v0 = vld [vmem:[#allocation2 + $0x80] sm:$0xff] }
  0xd5   : > { %8076 = vst [vmem:[#allocation35_spill] sm:$0xff] %v5476_v0 }
  0xd6   : > { %v5462_v33 = vpop.permute.xlu1 %693  ;;  %v5466_v62 = vpop.permute.xlu0 %699 }
  0xd7   : > { %8071 = vst [vmem:[#allocation30_spill] sm:$0xff] %v5462_v33  ;;  %8073 = vst [vmem:[#allocation32_spill] sm:$0xff] %v5466_v62  ;;  %v5482_v33 = vld [vmem:[#allocation2 + $0xa8] sm:$0xff] }
  0xd8   : > { %937 = vrot.lane.b32.xlu1 %v5464_v39, %s4814_s27  ;;  %943 = vrot.lane.b32.xlu0 %v5470_v58, %s4814_s27  ;;  %8078 = vst [vmem:[#allocation37_spill] sm:$0xff] %v5482_v33  ;;  %v5488_v39 = vld [vmem:[#allocation2 + $0x98] sm:$0xff] }
  0xd9   : > { %8080 = vst [vmem:[#allocation39_spill] sm:$0xff] %v5488_v39 }
  0xda   : > { %v5474_v3 = vpop.permute.xlu1 %697  ;;  %v5478_v36 = vpop.permute.xlu0 %703 }
  0xdb   : > { %8075 = vst [vmem:[#allocation34_spill] sm:$0xff] %v5474_v3  ;;  %8077 = vst [vmem:[#allocation36_spill] sm:$0xff] %v5478_v36  ;;  %v5494_v3 = vld [vmem:[#allocation2 + $0xc0] sm:$0xff] }
  0xdc   : > { %941 = vrot.lane.b32.xlu1 %v5476_v0, %s4814_s27  ;;  %947 = vrot.lane.b32.xlu0 %v5482_v33, %s4814_s27  ;;  %8082 = vst [vmem:[#allocation41_spill] sm:$0xff] %v5494_v3  ;;  %v5500_v0 = vld [vmem:[#allocation2 + $0xb0] sm:$0xff] }
  0xdd   : > { %8084 = vst [vmem:[#allocation43_spill] sm:$0xff] %v5500_v0 }
  0xde   : > { %v5486_v62 = vpop.permute.xlu1 %701  ;;  %v5490_v37 = vpop.permute.xlu0 %707 }
  0xdf   : > { %8079 = vst [vmem:[#allocation38_spill] sm:$0xff] %v5486_v62  ;;  %8081 = vst [vmem:[#allocation40_spill] sm:$0xff] %v5490_v37  ;;  %v5506_v62 = vld [vmem:[#allocation2 + $0xd8] sm:$0xff] }
  0xe0   : > { %945 = vrot.lane.b32.xlu1 %v5488_v39, %s4814_s27  ;;  %951 = vrot.lane.b32.xlu0 %v5494_v3, %s4814_s27  ;;  %8086 = vst [vmem:[#allocation45_spill] sm:$0xff] %v5506_v62  ;;  %v5512_v39 = vld [vmem:[#allocation2 + $0xc8] sm:$0xff] }
  0xe1   : > { %8088 = vst [vmem:[#allocation47_spill] sm:$0xff] %v5512_v39 }
  0xe2   : > { %v5498_v36 = vpop.permute.xlu1 %705  ;;  %v5502_v58 = vpop.permute.xlu0 %711 }
  0xe3   : > { %8083 = vst [vmem:[#allocation42_spill] sm:$0xff] %v5498_v36  ;;  %8085 = vst [vmem:[#allocation44_spill] sm:$0xff] %v5502_v58  ;;  %v5518_v36 = vld [vmem:[#allocation2 + $0xf0] sm:$0xff] }
  0xe4   : > { %949 = vrot.lane.b32.xlu1 %v5500_v0, %s4814_s27  ;;  %955 = vrot.lane.b32.xlu0 %v5506_v62, %s4814_s27  ;;  %8090 = vst [vmem:[#allocation49_spill] sm:$0xff] %v5518_v36  ;;  %v5524_v0 = vld [vmem:[#allocation2 + $0xe0] sm:$0xff] }
  0xe5   : > { %8092 = vst [vmem:[#allocation51_spill] sm:$0xff] %v5524_v0 }
  0xe6   : > { %v5510_v37 = vpop.permute.xlu1 %709  ;;  %v5514_v33 = vpop.permute.xlu0 %715 }
  0xe7   : > { %8087 = vst [vmem:[#allocation46_spill] sm:$0xff] %v5510_v37  ;;  %8089 = vst [vmem:[#allocation48_spill] sm:$0xff] %v5514_v33  ;;  %v5530_v37 = vld [vmem:[#allocation2 + $0x108] sm:$0xff] }
  0xe8   : > { %953 = vrot.lane.b32.xlu1 %v5512_v39, %s4814_s27  ;;  %959 = vrot.lane.b32.xlu0 %v5518_v36, %s4814_s27  ;;  %8094 = vst [vmem:[#allocation53_spill] sm:$0xff] %v5530_v37  ;;  %v5536_v39 = vld [vmem:[#allocation2 + $0xf8] sm:$0xff] }
  0xe9   : > { %8096 = vst [vmem:[#allocation55_spill] sm:$0xff] %v5536_v39 }
  0xea   : > { %v5522_v58 = vpop.permute.xlu1 %713  ;;  %v5526_v3 = vpop.permute.xlu0 %719 }
  0xeb   : > { %8091 = vst [vmem:[#allocation50_spill] sm:$0xff] %v5522_v58  ;;  %8093 = vst [vmem:[#allocation52_spill] sm:$0xff] %v5526_v3  ;;  %v5542_v58 = vld [vmem:[#allocation2 + $0x120] sm:$0xff] }
  0xec   : > { %957 = vrot.lane.b32.xlu1 %v5524_v0, %s4814_s27  ;;  %963 = vrot.lane.b32.xlu0 %v5530_v37, %s4814_s27  ;;  %8098 = vst [vmem:[#allocation57_spill] sm:$0xff] %v5542_v58  ;;  %v5548_v0 = vld [vmem:[#allocation2 + $0x110] sm:$0xff] }
  0xed   : > { %8100 = vst [vmem:[#allocation59_spill] sm:$0xff] %v5548_v0 }
  0xee   : > { %v5534_v33 = vpop.permute.xlu1 %717  ;;  %v5538_v62 = vpop.permute.xlu0 %723 }
  0xef   : > { %8095 = vst [vmem:[#allocation54_spill] sm:$0xff] %v5534_v33  ;;  %8097 = vst [vmem:[#allocation56_spill] sm:$0xff] %v5538_v62  ;;  %v5554_v33 = vld [vmem:[#allocation2 + $0x138] sm:$0xff] }
  0xf0   : > { %961 = vrot.lane.b32.xlu1 %v5536_v39, %s4814_s27  ;;  %967 = vrot.lane.b32.xlu0 %v5542_v58, %s4814_s27  ;;  %8102 = vst [vmem:[#allocation61_spill] sm:$0xff] %v5554_v33  ;;  %v5560_v39 = vld [vmem:[#allocation2 + $0x128] sm:$0xff] }
  0xf1   : > { %8104 = vst [vmem:[#allocation63_spill] sm:$0xff] %v5560_v39 }
  0xf2   : > { %v5546_v3 = vpop.permute.xlu1 %721  ;;  %v5550_v36 = vpop.permute.xlu0 %727 }
  0xf3   : > { %8099 = vst [vmem:[#allocation58_spill] sm:$0xff] %v5546_v3  ;;  %8101 = vst [vmem:[#allocation60_spill] sm:$0xff] %v5550_v36  ;;  %v5566_v3 = vld [vmem:[#allocation2 + $0x150] sm:$0xff] }
  0xf4   : > { %965 = vrot.lane.b32.xlu1 %v5548_v0, %s4814_s27  ;;  %971 = vrot.lane.b32.xlu0 %v5554_v33, %s4814_s27  ;;  %8106 = vst [vmem:[#allocation65_spill] sm:$0xff] %v5566_v3  ;;  %v5572_v0 = vld [vmem:[#allocation2 + $0x140] sm:$0xff] }
  0xf5   : > { %8108 = vst [vmem:[#allocation67_spill] sm:$0xff] %v5572_v0  ;;  %v5586_v33 = vld [vmem:[#allocation2 + $0x180] sm:$0xff] }
  0xf6   : > { %v5558_v62 = vpop.permute.xlu1 %725  ;;  %v5562_v37 = vpop.permute.xlu0 %795 }
  0xf7   : > { %8103 = vst [vmem:[#allocation62_spill] sm:$0xff] %v5558_v62  ;;  %8105 = vst [vmem:[#allocation64_spill] sm:$0xff] %v5562_v37  ;;  %v5578_v62 = vld [vmem:[#allocation2 + $0x168] sm:$0xff] }
  0xf8   : > { %969 = vrot.lane.b32.xlu1 %v5560_v39, %s4814_s27  ;;  %975 = vrot.lane.b32.xlu0 %v5566_v3, %s4814_s27  ;;  %v5584_v39 = vld [vmem:[#allocation2 + $0x158] sm:$0xff] }
  0xf9   : > { %8111 = vst [vmem:[#allocation70_spill] sm:$0xff] %v5584_v39 }
  0xfa   : > { %v5570_v36 = vpop.permute.xlu1 %729  ;;  %v5574_v58 = vpop.permute.xlu0 %799 }
  0xfb   : > { %8107 = vst [vmem:[#allocation66_spill] sm:$0xff] %v5570_v36  ;;  %8109 = vst [vmem:[#allocation68_spill] sm:$0xff] %v5574_v58  ;;  %v5596_v58 = vld [vmem:[#allocation2 + $0x170] sm:$0xff] }
  0xfc   : > { %973 = vrot.lane.b32.xlu1 %v5572_v0, %s4814_s27  ;;  %979 = vrot.lane.b32.xlu0 %v5578_v62, %s4814_s27 }
  0xfe   : > { %v5582_v37 = vpop.permute.xlu1 %797  ;;  %v5588_v3 = vpop.permute.xlu0 %803 }
  0xff   : > { %8110 = vst [vmem:[#allocation69_spill] sm:$0xff] %v5582_v37  ;;  %8112 = vst [vmem:[#allocation71_spill] sm:$0xff] %v5588_v3  ;;  %v5602_v37 = vld [vmem:[#allocation2 + $0x188] sm:$0xff] }
 0x100   : > { %977 = vrot.lane.b32.xlu1 %v5584_v39, %s4814_s27  ;;  %983 = vrot.lane.b32.xlu0 %v5586_v33, %s4814_s27 }
 0x102   : > { %v5594_v36 = vpop.permute.xlu1 %801  ;;  %v5598_v0 = vpop.permute.xlu0 %807 }
 0x103   : > { %8113 = vst [vmem:[#allocation72_spill] sm:$0xff] %v5594_v36  ;;  %8114 = vst [vmem:[#allocation73_spill] sm:$0xff] %v5598_v0 }
 0x104   : > { %981 = vrot.lane.b32.xlu1 %v5596_v58, %s4814_s27  ;;  %1051 = vrot.lane.b32.xlu0 %v5137_v25, %s4815_s28 }
 0x106   : > { %v5606_v3 = vpop.permute.xlu1 %805  ;;  %v5608_v39 = vpop.permute.xlu0 %811 }
 0x107   : > { %8115 = vst [vmem:[#allocation74_spill] sm:$0xff] %v5606_v3  ;;  %8116 = vst [vmem:[#allocation75_spill] sm:$0xff] %v5608_v39 }
 0x108   : > { %985 = vrot.lane.b32.xlu1 %v5602_v37, %s4814_s27  ;;  %1055 = vrot.lane.b32.xlu0 %v5139_v26, %s4815_s28 }
 0x10a   : > { %v5614_v0 = vpop.permute.xlu1 %809  ;;  %v5616_v36 = vpop.permute.xlu0 %815 }
 0x10c   : > { %1053 = vrot.lane.b32.xlu1 %v5146_v27, %s4815_s28  ;;  %1059 = vrot.lane.b32.xlu0 %v5154_v30, %s4815_s28 }
 0x10e   : > { %v5622_v25 = vpop.permute.xlu1 %813  ;;  %v5624_v3 = vpop.permute.xlu0 %819 }
 0x10f   : > { %8117 = vst [vmem:[#allocation76_spill] sm:$0xff] %v5624_v3  ;;  %v623_v3 = vld [vmem:[#allocation2 + $0x122] sm:$0xff] }
 0x110   : > { %1057 = vrot.lane.b32.xlu1 %v5158_v31, %s4815_s28  ;;  %1063 = vrot.lane.b32.xlu0 %v5162_v32, %s4815_s28 }
 0x112   : > { %v5630_v26 = vpop.permute.xlu1 %817  ;;  %v5632_v39 = vpop.permute.xlu0 %823 }
 0x113   : > { %8118 = vst [vmem:[#allocation77_spill] sm:$0xff] %v5630_v26  ;;  %8119 = vst [vmem:[#allocation78_spill] sm:$0xff] %v5632_v39  ;;  %v619_v39 = vld [vmem:[#allocation2 + $0xf2] sm:$0xff] }
 0x114   : > { %1061 = vrot.lane.b32.xlu1 %v5174_v38, %s4815_s28  ;;  %1067 = vrot.lane.b32.xlu0 %v5182_v40, %s4815_s28 }
 0x116   : > { %v5638_v27 = vpop.permute.xlu1 %821  ;;  %v5640_v30 = vpop.permute.xlu0 %827 }
 0x117   : > { %8120 = vst [vmem:[#allocation79_spill] sm:$0xff] %v5638_v27  ;;  %8121 = vst [vmem:[#allocation80_spill] sm:$0xff] %v5640_v30  ;;  %v589_v27 = vld [vmem:[#allocation2 + $0x109] sm:$0xff] }
 0x118   : > { %1065 = vrot.lane.b32.xlu1 %v5186_v41, %s4815_s28  ;;  %1071 = vrot.lane.b32.xlu0 %v5190_v42, %s4815_s28 }
 0x11a   : > { %v5646_v31 = vpop.permute.xlu1 %825  ;;  %v5648_v32 = vpop.permute.xlu0 %831 }
 0x11b   : > { %8122 = vst [vmem:[#allocation81_spill] sm:$0xff] %v5646_v31  ;;  %8123 = vst [vmem:[#allocation82_spill] sm:$0xff] %v5648_v32 }
 0x11c   : > { %1069 = vrot.lane.b32.xlu1 %v5194_v43, %s4815_s28  ;;  %1075 = vrot.lane.b32.xlu0 %v5198_v44, %s4815_s28 }
 0x11e   : > { %v5654_v38 = vpop.permute.xlu1 %829  ;;  %v5656_v40 = vpop.permute.xlu0 %835 }
 0x11f   : > { %8124 = vst [vmem:[#allocation83_spill] sm:$0xff] %v5654_v38  ;;  %8125 = vst [vmem:[#allocation84_spill] sm:$0xff] %v5656_v40  ;;  %v8181_v40 = vld [vmem:[#allocation39_spill] sm:$0xff] }
 0x120   : > { %1073 = vrot.lane.b32.xlu1 %v5202_v45, %s4815_s28  ;;  %1079 = vrot.lane.b32.xlu0 %v5206_v46, %s4815_s28  ;;  %v574_v38 = vld [vmem:[#allocation2 + $0x51] sm:$0xff] }
 0x122   : > { %v5662_v41 = vpop.permute.xlu1 %833  ;;  %v5664_v42 = vpop.permute.xlu0 %839 }
 0x123   : > { %8126 = vst [vmem:[#allocation85_spill] sm:$0xff] %v5662_v41  ;;  %8127 = vst [vmem:[#allocation86_spill] sm:$0xff] %v5664_v42  ;;  %v8173_v42 = vld [vmem:[#allocation31_spill] sm:$0xff] }
 0x124   : > { %1077 = vrot.lane.b32.xlu1 %v5210_v47, %s4815_s28  ;;  %1083 = vrot.lane.b32.xlu0 %v5214_v48, %s4815_s28  ;;  %v8185_v41 = vld [vmem:[#allocation43_spill] sm:$0xff] }
 0x126   : > { %v5670_v43 = vpop.permute.xlu1 %837  ;;  %v5672_v44 = vpop.permute.xlu0 %843 }
 0x127   : > { %8128 = vst [vmem:[#allocation87_spill] sm:$0xff] %v5670_v43  ;;  %8129 = vst [vmem:[#allocation88_spill] sm:$0xff] %v5672_v44  ;;  %v8177_v43 = vld [vmem:[#allocation35_spill] sm:$0xff] }
 0x128   : > { %1081 = vrot.lane.b32.xlu1 %v5218_v49, %s4815_s28  ;;  %1087 = vrot.lane.b32.xlu0 %v5222_v50, %s4815_s28 }
 0x12a   : > { %v5678_v45 = vpop.permute.xlu1 %841  ;;  %v5680_v46 = vpop.permute.xlu0 %847 }
 0x12b   : > { %8130 = vst [vmem:[#allocation89_spill] sm:$0xff] %v5678_v45  ;;  %8131 = vst [vmem:[#allocation90_spill] sm:$0xff] %v5680_v46  ;;  %v8170_v45 = vld [vmem:[#allocation29_spill] sm:$0xff] }
 0x12c   : > { %1085 = vrot.lane.b32.xlu1 %v5226_v51, %s4815_s28  ;;  %1091 = vrot.lane.b32.xlu0 %v5230_v52, %s4815_s28 }
 0x12e   : > { %v5686_v47 = vpop.permute.xlu1 %845  ;;  %v5688_v48 = vpop.permute.xlu0 %851 }
 0x12f   : > { %8132 = vst [vmem:[#allocation91_spill] sm:$0xff] %v5686_v47  ;;  %8133 = vst [vmem:[#allocation92_spill] sm:$0xff] %v5688_v48  ;;  %v8167_v47 = vld [vmem:[#allocation25_spill] sm:$0xff] }
 0x130   : > { %1089 = vrot.lane.b32.xlu1 %v5234_v53, %s4815_s28  ;;  %1095 = vrot.lane.b32.xlu0 %v5238_v54, %s4815_s28 }
 0x132   : > { %v5694_v49 = vpop.permute.xlu1 %849  ;;  %v5696_v50 = vpop.permute.xlu0 %855 }
 0x133   : > { %8134 = vst [vmem:[#allocation93_spill] sm:$0xff] %v5694_v49  ;;  %8135 = vst [vmem:[#allocation94_spill] sm:$0xff] %v5696_v50 }
 0x134   : > { %1093 = vrot.lane.b32.xlu1 %v5242_v55, %s4815_s28  ;;  %1099 = vrot.lane.b32.xlu0 %v5246_v56, %s4815_s28  ;;  %v5720_v56 = vld [vmem:[#allocation2 + $0x181] sm:$0xff] }
 0x136   : > { %v5702_v51 = vpop.permute.xlu1 %853  ;;  %v5704_v52 = vpop.permute.xlu0 %923 }
 0x137   : > { %8136 = vst [vmem:[#allocation95_spill] sm:$0xff] %v5702_v51 }
 0x138   : > { %1097 = vrot.lane.b32.xlu1 %v5250_v57, %s4815_s28  ;;  %1103 = vrot.lane.b32.xlu0 %v5256_v59, %s4815_s28 }
 0x13a   : > { %v5710_v53 = vpop.permute.xlu1 %857  ;;  %v5712_v54 = vpop.permute.xlu0 %927 }
 0x13b   : > { %8137 = vst [vmem:[#allocation96_spill] sm:$0xff] %v5710_v53 }
 0x13c   : > { %1101 = vrot.lane.b32.xlu1 %v5260_v60, %s4815_s28  ;;  %1107 = vrot.lane.b32.xlu0 %v5264_v61, %s4815_s28  ;;  %v5734_v60 = vld [vmem:[#allocation2 + $0x189] sm:$0xff] }
 0x13e   : > { %v5718_v55 = vpop.permute.xlu1 %925  ;;  %v5722_v50 = vpop.permute.xlu0 %931 }
 0x140   : > { %1105 = vrot.lane.b32.xlu1 %v5270_v63, %s4815_s28  ;;  %1111 = vrot.lane.b32.xlu0 %v5720_v56, %s4815_s28 }
 0x142   : > { %v5728_v57 = vpop.permute.xlu1 %929  ;;  %v5730_v59 = vpop.permute.xlu0 %935 }
 0x144   : > { %1109 = vrot.lane.b32.xlu1 %v5276_v1, %s4815_s28  ;;  %1179 = vrot.lane.b32.xlu0 %v5279_v2, %s4816_s29 }
 0x146   : > { %v5738_v61 = vpop.permute.xlu1 %933  ;;  %v5740_v53 = vpop.permute.xlu0 %939 }
 0x148   : > { %1113 = vrot.lane.b32.xlu1 %v5734_v60, %s4815_s28  ;;  %1183 = vrot.lane.b32.xlu0 %v5285_v4, %s4816_s29 }
 0x14a   : > { %v5746_v63 = vpop.permute.xlu1 %937  ;;  %v5748_v51 = vpop.permute.xlu0 %943 }
 0x14c   : > { %1181 = vrot.lane.b32.xlu1 %v5288_v5, %s4816_s29  ;;  %1187 = vrot.lane.b32.xlu0 %v5292_v6, %s4816_s29 }
 0x14e   : > { %v5754_v1 = vpop.permute.xlu1 %941  ;;  %v5756_v2 = vpop.permute.xlu0 %947 }
 0x14f   : > { %8138 = vst [vmem:[#allocation97_spill] sm:$0xff] %v5756_v2  ;;  %v591_v2 = vld [vmem:[#allocation2 + $0x121] sm:$0xff] }
 0x150   : > { %1185 = vrot.lane.b32.xlu1 %v5296_v7, %s4816_s29  ;;  %1191 = vrot.lane.b32.xlu0 %v5300_v8, %s4816_s29 }
 0x152   : > { %v5762_v4 = vpop.permute.xlu1 %945  ;;  %v5764_v48 = vpop.permute.xlu0 %951 }
 0x153   : > { %8139 = vst [vmem:[#allocation98_spill] sm:$0xff] %v5762_v4  ;;  %8140 = vst [vmem:[#allocation99_spill] sm:$0xff] %v5764_v48 }
 0x154   : > { %1189 = vrot.lane.b32.xlu1 %v5304_v9, %s4816_s29  ;;  %1195 = vrot.lane.b32.xlu0 %v5308_v10, %s4816_s29 }
 0x156   : > { %v5770_v5 = vpop.permute.xlu1 %949  ;;  %v5772_v6 = vpop.permute.xlu0 %955 }
 0x157   : > { %8141 = vst [vmem:[#allocation100_spill] sm:$0xff] %v5770_v5  ;;  %8142 = vst [vmem:[#allocation101_spill] sm:$0xff] %v5772_v6  ;;  %v604_v6 = vld [vmem:[#allocation2 + $0x3a] sm:$0xff] }
 0x158   : > { %1193 = vrot.lane.b32.xlu1 %v5312_v11, %s4816_s29  ;;  %1199 = vrot.lane.b32.xlu0 %v5316_v12, %s4816_s29 }
 0x15a   : > { %v5778_v7 = vpop.permute.xlu1 %953  ;;  %v5780_v8 = vpop.permute.xlu0 %959 }
 0x15b   : > { %8143 = vst [vmem:[#allocation102_spill] sm:$0xff] %v5778_v7  ;;  %8144 = vst [vmem:[#allocation103_spill] sm:$0xff] %v5780_v8  ;;  %v607_v7 = vld [vmem:[#allocation2 + $0x62] sm:$0xff] }
 0x15c   : > { %1197 = vrot.lane.b32.xlu1 %v5320_v13, %s4816_s29  ;;  %1203 = vrot.lane.b32.xlu0 %v5324_v14, %s4816_s29 }
 0x15e   : > { %v5786_v9 = vpop.permute.xlu1 %957  ;;  %v5788_v10 = vpop.permute.xlu0 %963 }
 0x15f   : > { %8145 = vst [vmem:[#allocation104_spill] sm:$0xff] %v5786_v9  ;;  %8146 = vst [vmem:[#allocation105_spill] sm:$0xff] %v5788_v10 }
 0x160   : > { %1201 = vrot.lane.b32.xlu1 %v5328_v15, %s4816_s29  ;;  %1207 = vrot.lane.b32.xlu0 %v5332_v16, %s4816_s29 }
 0x162   : > { %v5794_v11 = vpop.permute.xlu1 %961  ;;  %v5796_v12 = vpop.permute.xlu0 %967 }
 0x163   : > { %8147 = vst [vmem:[#allocation106_spill] sm:$0xff] %v5794_v11  ;;  %8148 = vst [vmem:[#allocation107_spill] sm:$0xff] %v5796_v12 }
 0x164   : > { %1205 = vrot.lane.b32.xlu1 %v5336_v17, %s4816_s29  ;;  %1211 = vrot.lane.b32.xlu0 %v5340_v18, %s4816_s29 }
 0x166   : > { %v5802_v13 = vpop.permute.xlu1 %965  ;;  %v5804_v14 = vpop.permute.xlu0 %971 }
 0x167   : > { %8149 = vst [vmem:[#allocation108_spill] sm:$0xff] %v5802_v13  ;;  %8150 = vst [vmem:[#allocation109_spill] sm:$0xff] %v5804_v14 }
 0x168   : > { %1209 = vrot.lane.b32.xlu1 %v5344_v19, %s4816_s29  ;;  %1215 = vrot.lane.b32.xlu0 %v5348_v20, %s4816_s29 }
 0x16a   : > { %v5810_v15 = vpop.permute.xlu1 %969  ;;  %v5812_v16 = vpop.permute.xlu0 %975 }
 0x16b   : > { %8151 = vst [vmem:[#allocation110_spill] sm:$0xff] %v5810_v15  ;;  %8152 = vst [vmem:[#allocation111_spill] sm:$0xff] %v5812_v16  ;;  %v8169_v15 = vld [vmem:[#allocation27_spill] sm:$0xff] }
 0x16c   : > { %1213 = vrot.lane.b32.xlu1 %v5352_v21, %s4816_s29  ;;  %1219 = vrot.lane.b32.xlu0 %v5356_v22, %s4816_s29 }
 0x16e   : > { %v5818_v17 = vpop.permute.xlu1 %973  ;;  %v5820_v18 = vpop.permute.xlu0 %979 }
 0x16f   : > { %8153 = vst [vmem:[#allocation112_spill] sm:$0xff] %v5818_v17  ;;  %8154 = vst [vmem:[#allocation113_spill] sm:$0xff] %v5820_v18 }
 0x170   : > { %1217 = vrot.lane.b32.xlu1 %v5360_v23, %s4816_s29  ;;  %1223 = vrot.lane.b32.xlu0 %v5364_v24, %s4816_s29 }
 0x172   : > { %v5826_v19 = vpop.permute.xlu1 %977  ;;  %v5828_v20 = vpop.permute.xlu0 %983 }
 0x173   : > { %8155 = vst [vmem:[#allocation114_spill] sm:$0xff] %v5826_v19  ;;  %8156 = vst [vmem:[#allocation115_spill] sm:$0xff] %v5828_v20  ;;  %v8159_v20 = vld [vmem:[#allocation6_spill] sm:$0xff]  ;;  %v8163_v19 = vld [vmem:[#allocation17_spill] sm:$0xff] }
 0x174   : > { %1221 = vrot.lane.b32.xlu1 %v5368_v28, %s4816_s29  ;;  %1227 = vrot.lane.b32.xlu0 %v5372_v29, %s4816_s29  ;;  %v8160_v28 = vld [vmem:[#allocation8_spill] sm:$0xff] }
 0x176   : > { %v5834_v21 = vpop.permute.xlu1 %981  ;;  %v5836_v22 = vpop.permute.xlu0 %1051 }
 0x177   : > { %8157 = vst [vmem:[#allocation116_spill] sm:$0xff] %v5834_v21  ;;  %v5852_v21 = vld [vmem:[#allocation2 + $0x182] sm:$0xff] }
 0x178   : > { %1225 = vrot.lane.b32.xlu1 %v5378_v34, %s4816_s29  ;;  %1231 = vrot.lane.b32.xlu0 %v5382_v35, %s4816_s29  ;;  %v8161_v34 = vld [vmem:[#allocation10_spill] sm:$0xff] }
 0x17a   : > { %v5842_v23 = vpop.permute.xlu1 %985  ;;  %v5844_v24 = vpop.permute.xlu0 %1055 }
 0x17b   : > { %8158 = vst [vmem:[#allocation117_spill] sm:$0xff] %v5842_v23 }
 0x17c   : > { %1229 = vrot.lane.b32.xlu1 %v8159_v20, %s4816_s29  ;;  %1235 = vrot.lane.b32.xlu0 %v8160_v28, %s4816_s29  ;;  %v8162_v20 = vld [vmem:[#allocation14_spill] sm:$0xff] }
 0x17d   : > { %v5866_v28 = vld [vmem:[#allocation2 + $0x18a] sm:$0xff] }
 0x17e   : > { %v5850_v29 = vpop.permute.xlu1 %1053  ;;  %v5854_v18 = vpop.permute.xlu0 %1059 }
 0x180   : > { %1233 = vrot.lane.b32.xlu1 %v8161_v34, %s4816_s29  ;;  %1239 = vrot.lane.b32.xlu0 %v5852_v21, %s4816_s29  ;;  %v8164_v34 = vld [vmem:[#allocation21_spill] sm:$0xff] }
 0x182   : > { %v5860_v35 = vpop.permute.xlu1 %1057  ;;  %v5862_v23 = vpop.permute.xlu0 %1063 }
 0x184   : > { %1237 = vrot.lane.b32.xlu1 %v8162_v20, %s4816_s29  ;;  %1307 = vrot.lane.b32.xlu0 %v8163_v19, %s4817_s30  ;;  %v8166_v20 = vld [vmem:[#allocation23_spill] sm:$0xff] }
 0x186   : > { %v5870_v49 = vpop.permute.xlu1 %1061  ;;  %v5872_v16 = vpop.permute.xlu0 %1067 }
 0x188   : > { %1241 = vrot.lane.b32.xlu1 %v5866_v28, %s4816_s29  ;;  %1311 = vrot.lane.b32.xlu0 %v8164_v34, %s4817_s30 }
 0x18a   : > { %v5878_v46 = vpop.permute.xlu1 %1065  ;;  %v5880_v17 = vpop.permute.xlu0 %1071 }
 0x18b   : > { %8165 = vst [vmem:[#allocation6_spill] sm:$0xff] %v5880_v17  ;;  %v8265_v17 = vld [vmem:[#allocation69_spill] sm:$0xff] }
 0x18c   : > { %1309 = vrot.lane.b32.xlu1 %v8166_v20, %s4817_s30  ;;  %1315 = vrot.lane.b32.xlu0 %v8167_v47, %s4817_s30  ;;  %v8174_v20 = vld [vmem:[#allocation33_spill] sm:$0xff] }
 0x18e   : > { %v5886_v14 = vpop.permute.xlu1 %1069  ;;  %v5888_v44 = vpop.permute.xlu0 %1075 }
 0x18f   : > { %8168 = vst [vmem:[#allocation8_spill] sm:$0xff] %v5888_v44  ;;  %v621_v44 = vld [vmem:[#allocation2 + $0x10a] sm:$0xff] }
 0x190   : > { %1313 = vrot.lane.b32.xlu1 %v8169_v15, %s4817_s30  ;;  %1319 = vrot.lane.b32.xlu0 %v8170_v45, %s4817_s30  ;;  %v8178_v15 = vld [vmem:[#allocation37_spill] sm:$0xff] }
 0x192   : > { %v5894_v34 = vpop.permute.xlu1 %1073  ;;  %v5896_v12 = vpop.permute.xlu0 %1079 }
 0x193   : > { %8171 = vst [vmem:[#allocation10_spill] sm:$0xff] %v5894_v34  ;;  %8172 = vst [vmem:[#allocation14_spill] sm:$0xff] %v5896_v12  ;;  %v577_v12 = vld [vmem:[#allocation2 + $0x79] sm:$0xff] }
 0x194   : > { %1317 = vrot.lane.b32.xlu1 %v8173_v42, %s4817_s30  ;;  %1323 = vrot.lane.b32.xlu0 %v8174_v20, %s4817_s30  ;;  %v8182_v42 = vld [vmem:[#allocation41_spill] sm:$0xff] }
 0x196   : > { %v5902_v47 = vpop.permute.xlu1 %1077  ;;  %v5904_v13 = vpop.permute.xlu0 %1083 }
 0x197   : > { %8175 = vst [vmem:[#allocation17_spill] sm:$0xff] %v5902_v47  ;;  %8176 = vst [vmem:[#allocation21_spill] sm:$0xff] %v5904_v13 }
 0x198   : > { %1321 = vrot.lane.b32.xlu1 %v8177_v43, %s4817_s30  ;;  %1327 = vrot.lane.b32.xlu0 %v8178_v15, %s4817_s30  ;;  %v8186_v43 = vld [vmem:[#allocation45_spill] sm:$0xff] }
 0x19a   : > { %v5910_v45 = vpop.permute.xlu1 %1081  ;;  %v5912_v10 = vpop.permute.xlu0 %1087 }
 0x19b   : > { %8179 = vst [vmem:[#allocation23_spill] sm:$0xff] %v5910_v45  ;;  %8180 = vst [vmem:[#allocation25_spill] sm:$0xff] %v5912_v10  ;;  %v8189_v10 = vld [vmem:[#allocation47_spill] sm:$0xff] }
 0x19c   : > { %1325 = vrot.lane.b32.xlu1 %v8181_v40, %s4817_s30  ;;  %1331 = vrot.lane.b32.xlu0 %v8182_v42, %s4817_s30  ;;  %v8190_v40 = vld [vmem:[#allocation49_spill] sm:$0xff] }
 0x19e   : > { %v5918_v20 = vpop.permute.xlu1 %1085  ;;  %v5920_v11 = vpop.permute.xlu0 %1091 }
 0x19f   : > { %8183 = vst [vmem:[#allocation27_spill] sm:$0xff] %v5918_v20  ;;  %8184 = vst [vmem:[#allocation29_spill] sm:$0xff] %v5920_v11  ;;  %v8193_v11 = vld [vmem:[#allocation51_spill] sm:$0xff] }
 0x1a0   : > { %1329 = vrot.lane.b32.xlu1 %v8185_v41, %s4817_s30  ;;  %1335 = vrot.lane.b32.xlu0 %v8186_v43, %s4817_s30  ;;  %v8194_v41 = vld [vmem:[#allocation53_spill] sm:$0xff] }
 0x1a2   : > { %v5926_v15 = vpop.permute.xlu1 %1089  ;;  %v5928_v8 = vpop.permute.xlu0 %1095 }
 0x1a3   : > { %8187 = vst [vmem:[#allocation31_spill] sm:$0xff] %v5926_v15  ;;  %8188 = vst [vmem:[#allocation33_spill] sm:$0xff] %v5928_v8  ;;  %v8197_v8 = vld [vmem:[#allocation55_spill] sm:$0xff] }
 0x1a4   : > { %1333 = vrot.lane.b32.xlu1 %v8189_v10, %s4817_s30  ;;  %1339 = vrot.lane.b32.xlu0 %v8190_v40, %s4817_s30  ;;  %v8198_v10 = vld [vmem:[#allocation57_spill] sm:$0xff] }
 0x1a6   : > { %v5934_v42 = vpop.permute.xlu1 %1093  ;;  %v5936_v20 = vpop.permute.xlu0 %1099 }
 0x1a7   : > { %8191 = vst [vmem:[#allocation35_spill] sm:$0xff] %v5934_v42  ;;  %8192 = vst [vmem:[#allocation37_spill] sm:$0xff] %v5936_v20  ;;  %v8201_v20 = vld [vmem:[#allocation59_spill] sm:$0xff] }
 0x1a8   : > { %1337 = vrot.lane.b32.xlu1 %v8193_v11, %s4817_s30  ;;  %1343 = vrot.lane.b32.xlu0 %v8194_v41, %s4817_s30  ;;  %v8202_v11 = vld [vmem:[#allocation61_spill] sm:$0xff] }
 0x1aa   : > { %v5942_v43 = vpop.permute.xlu1 %1097  ;;  %v5944_v15 = vpop.permute.xlu0 %1103 }
 0x1ab   : > { %8195 = vst [vmem:[#allocation39_spill] sm:$0xff] %v5942_v43  ;;  %8196 = vst [vmem:[#allocation41_spill] sm:$0xff] %v5944_v15  ;;  %v8205_v15 = vld [vmem:[#allocation63_spill] sm:$0xff] }
 0x1ac   : > { %1341 = vrot.lane.b32.xlu1 %v8197_v8, %s4817_s30  ;;  %1347 = vrot.lane.b32.xlu0 %v8198_v10, %s4817_s30  ;;  %v8206_v8 = vld [vmem:[#allocation65_spill] sm:$0xff] }
 0x1ae   : > { %v5950_v40 = vpop.permute.xlu1 %1101  ;;  %v5952_v42 = vpop.permute.xlu0 %1107 }
 0x1af   : > { %8199 = vst [vmem:[#allocation43_spill] sm:$0xff] %v5950_v40  ;;  %8200 = vst [vmem:[#allocation45_spill] sm:$0xff] %v5952_v42  ;;  %v8208_v42 = vld [vmem:[#allocation67_spill] sm:$0xff] }
 0x1b0   : > { %1345 = vrot.lane.b32.xlu1 %v8201_v20, %s4817_s30  ;;  %1351 = vrot.lane.b32.xlu0 %v8202_v11, %s4817_s30 }
 0x1b2   : > { %v5958_v41 = vpop.permute.xlu1 %1105  ;;  %v5960_v43 = vpop.permute.xlu0 %1111 }
 0x1b3   : > { %8203 = vst [vmem:[#allocation47_spill] sm:$0xff] %v5958_v41  ;;  %8204 = vst [vmem:[#allocation49_spill] sm:$0xff] %v5960_v43  ;;  %v8210_v43 = vld [vmem:[#allocation70_spill] sm:$0xff] }
 0x1b4   : > { %1349 = vrot.lane.b32.xlu1 %v8205_v15, %s4817_s30  ;;  %1355 = vrot.lane.b32.xlu0 %v8206_v8, %s4817_s30  ;;  %v1922_v15 = vld [vmem:[%s7998_s1] sm:$0xff]  ;;  %v1923_v8 = vld [vmem:[%s7998_s1 + $0x8] sm:$0xff]  ;;  %v571_v41 = vld [vmem:[#allocation2 + $0x31] sm:$0xff] }
 0x1b6   : > { %v5966_v10 = vpop.permute.xlu1 %1109  ;;  %v5968_v40 = vpop.permute.xlu0 %1179 }
 0x1b7   : > { %8207 = vst [vmem:[#allocation51_spill] sm:$0xff] %v5966_v10  ;;  %v4738_v10 = vpack.c.bf16 %v1923_v8, %v1922_v15  ;;  %v1925_v15 = vld [vmem:[%s7998_s1 + $0x18] sm:$0xff] }
 0x1b8   : > { %1353 = vrot.lane.b32.xlu1 %v8208_v42, %s4817_s30  ;;  %1359 = vrot.lane.b32.xlu0 %v5578_v62, %s4817_s30  ;;  %v569_v42 = vld [vmem:[#allocation2 + $0x198] sm:$0xff] }
 0x1b9   : > { %4739 = vmatprep.subr.bf16.mxu0 %v4738_v10 }
 0x1ba   : > { %v5974_v20 = vpop.permute.xlu1 %1113  ;;  %v5976_v11 = vpop.permute.xlu0 %1183  ;;  %4741 = vmatpush3.bf16.msra.mxu0 %v4738_v10 }
 0x1bb   : > { %8209 = vst [vmem:[#allocation53_spill] sm:$0xff] %v5974_v20 }
 0x1bc   : > { %1357 = vrot.lane.b32.xlu1 %v8210_v43, %s4817_s30  ;;  %1363 = vrot.lane.b32.xlu0 %v5586_v33, %s4817_s30  ;;  %v1924_v43 = vld [vmem:[%s7998_s1 + $0x10] sm:$0xff] }
 0x1bd   : > { %v4742_v8 = vpack.c.bf16 %v1925_v15, %v1924_v43  ;;  %v573_v43 = vld [vmem:[#allocation2 + $0x49] sm:$0xff] }
 0x1be   : > { %v5988_v62 = vpop.permute.xlu1 %1181  ;;  %v5990_v20 = vpop.permute.xlu0 %1187 }
 0x1bf   : > { %4743 = vmatprep.subr.bf16.mxu0 %v4742_v8 }
 0x1c0   : > { %1361 = vrot.lane.b32.xlu1 %v5596_v58, %s4817_s30  ;;  %1367 = vrot.lane.b32.xlu0 %v569_v42, %s4817_s30  ;;  %v570_v58 = vld [vmem:[#allocation2 + $0x1a0] sm:$0xff] }
 0x1c1   : > { %4745 = vmatpush3.bf16.msra.mxu0 %v4742_v8  ;;  %v1926_v42 = vld [vmem:[%s7998_s1 + $0x20] sm:$0xf] }
 0x1c2   : > { %v6001_v33 = vpop.permute.xlu1 %1185  ;;  %v6003_v32 = vpop.permute.xlu0 %1191  ;;  %4630 = vmatprep.subr.msk.mxu0 %vm2031_vm2, %v1926_v42  ;;  %v575_v8 = vld [vmem:[#allocation2 + $0x61] sm:$0xff] }
 0x1c4   : > { %1365 = vrot.lane.b32.xlu1 %v5602_v37, %s4817_s30  ;;  %1435 = vrot.lane.b32.xlu0 %v571_v41, %s4818_s14  ;;  %v572_v37 = vld [vmem:[#allocation2 + $0x39] sm:$0xff] }
 0x1c5   : > { %4631 = vmatpush3.msk.msra.mxu0 %vm2031_vm2, %v1926_v42 }
 0x1c6   : > { %v6008_v10 = vpop.permute.xlu1 %1189  ;;  %v6014_v15 = vpop.permute.xlu0 %1195 }
 0x1c8   : > { %1369 = vrot.lane.b32.xlu1 %v570_v58, %s4817_s30  ;;  %1439 = vrot.lane.b32.xlu0 %v573_v43, %s4818_s14  ;;  %v603_v58 = vld [vmem:[#allocation2 + $0x32] sm:$0xff] }
 0x1c9   : > { %v606_v43 = vld [vmem:[#allocation2 + $0x52] sm:$0xff] }
 0x1ca   : > { %v6019_v41 = vpop.permute.xlu1 %1193  ;;  %v6021_v9 = vpop.permute.xlu0 %1199 }
 0x1cb   : > { %8211 = vst [vmem:[#allocation55_spill] sm:$0xff] %v6021_v9  ;;  %v8262_v9 = vld [vmem:[#allocation64_spill] sm:$0xff] }
 0x1cc   : > { %1437 = vrot.lane.b32.xlu1 %v572_v37, %s4818_s14  ;;  %1443 = vrot.lane.b32.xlu0 %v575_v8, %s4818_s14  ;;  %v605_v37 = vld [vmem:[#allocation2 + $0x4a] sm:$0xff] }
 0x1ce   : > { %v6025_v13 = vpop.permute.xlu1 %1197  ;;  %v6027_v45 = vpop.permute.xlu0 %1203 }
 0x1cf   : > { %8212 = vst [vmem:[#allocation57_spill] sm:$0xff] %v6025_v13  ;;  %8213 = vst [vmem:[#allocation59_spill] sm:$0xff] %v6027_v45 }
 0x1d0   : > { %1441 = vrot.lane.b32.xlu1 %v574_v38, %s4818_s14  ;;  %1565 = vrot.lane.b32.xlu0 %v604_v6, %s4819_s17  ;;  %v576_v38 = vld [vmem:[#allocation2 + $0x69] sm:$0xff] }
 0x1d2   : > { %v6031_v42 = vpop.permute.xlu1 %1201  ;;  %v6033_v30 = vpop.permute.xlu0 %1207 }
 0x1d3   : > { %8214 = vst [vmem:[#allocation61_spill] sm:$0xff] %v6031_v42  ;;  %8215 = vst [vmem:[#allocation63_spill] sm:$0xff] %v6033_v30  ;;  %v609_v30 = vld [vmem:[#allocation2 + $0x7a] sm:$0xff] }
 0x1d4   : > { %1563 = vrot.lane.b32.xlu1 %v603_v58, %s4819_s17  ;;  %1569 = vrot.lane.b32.xlu0 %v606_v43, %s4819_s17  ;;  %v608_v58 = vld [vmem:[#allocation2 + $0x6a] sm:$0xff] }
 0x1d6   : > { %v6037_v8 = vpop.permute.xlu1 %1205  ;;  %v6039_v31 = vpop.permute.xlu0 %1211 }
 0x1d7   : > { %8216 = vst [vmem:[#allocation65_spill] sm:$0xff] %v6037_v8  ;;  %8217 = vst [vmem:[#allocation67_spill] sm:$0xff] %v6039_v31  ;;  %v579_v31 = vld [vmem:[#allocation2 + $0x91] sm:$0xff] }
 0x1d8   : > { %1567 = vrot.lane.b32.xlu1 %v605_v37, %s4819_s17  ;;  %1571 = vrot.lane.b32.xlu0 %v607_v7, %s4819_s17  ;;  %v578_v37 = vld [vmem:[#allocation2 + $0x81] sm:$0xff] }
 0x1da   : > { %v6043_v6 = vpop.permute.xlu1 %1209  ;;  %v6045_v48 = vpop.permute.xlu0 %1215 }
 0x1db   : > { %8218 = vst [vmem:[#allocation70_spill] sm:$0xff] %v6043_v6  ;;  %8219 = vst [vmem:[#allocation118_spill] sm:$0xff] %v6045_v48  ;;  %v611_v48 = vld [vmem:[#allocation2 + $0x92] sm:$0xff] }
 0x1dc   : > { %1445 = vrot.lane.b32.xlu1 %v576_v38, %s4818_s14  ;;  %1447 = vrot.lane.b32.xlu0 %v577_v12, %s4818_s14  ;;  %v610_v38 = vld [vmem:[#allocation2 + $0x82] sm:$0xff] }
 0x1de   : > { %v6049_v43 = vpop.permute.xlu1 %1213  ;;  %v6051_v8 = vpop.permute.xlu0 %1219 }
 0x1df   : > { %8220 = vst [vmem:[#allocation119_spill] sm:$0xff] %v6049_v43  ;;  %8221 = vst [vmem:[#allocation120_spill] sm:$0xff] %v6051_v8  ;;  %v581_v8 = vld [vmem:[#allocation2 + $0xa9] sm:$0xff] }
 0x1e0   : > { %1573 = vrot.lane.b32.xlu1 %v608_v58, %s4819_s17  ;;  %1575 = vrot.lane.b32.xlu0 %v609_v30, %s4819_s17  ;;  %v580_v58 = vld [vmem:[#allocation2 + $0x99] sm:$0xff] }
 0x1e2   : > { %v6055_v7 = vpop.permute.xlu1 %1217  ;;  %v6057_v6 = vpop.permute.xlu0 %1223 }
 0x1e3   : > { %8222 = vst [vmem:[#allocation121_spill] sm:$0xff] %v6055_v7  ;;  %8223 = vst [vmem:[#allocation122_spill] sm:$0xff] %v6057_v6  ;;  %v613_v6 = vld [vmem:[#allocation2 + $0xaa] sm:$0xff] }
 0x1e4   : > { %1449 = vrot.lane.b32.xlu1 %v578_v37, %s4818_s14  ;;  %1451 = vrot.lane.b32.xlu0 %v579_v31, %s4818_s14  ;;  %v612_v37 = vld [vmem:[#allocation2 + $0x9a] sm:$0xff] }
 0x1e6   : > { %v6061_v12 = vpop.permute.xlu1 %1221  ;;  %v6063_v43 = vpop.permute.xlu0 %1227 }
 0x1e7   : > { %8224 = vst [vmem:[#allocation123_spill] sm:$0xff] %v6061_v12  ;;  %8225 = vst [vmem:[#allocation124_spill] sm:$0xff] %v6063_v43  ;;  %v583_v43 = vld [vmem:[#allocation2 + $0xc1] sm:$0xff] }
 0x1e8   : > { %1577 = vrot.lane.b32.xlu1 %v610_v38, %s4819_s17  ;;  %1579 = vrot.lane.b32.xlu0 %v611_v48, %s4819_s17  ;;  %v582_v38 = vld [vmem:[#allocation2 + $0xb1] sm:$0xff] }
 0x1ea   : > { %v6067_v30 = vpop.permute.xlu1 %1225  ;;  %v6069_v7 = vpop.permute.xlu0 %1231 }
 0x1eb   : > { %8226 = vst [vmem:[#allocation125_spill] sm:$0xff] %v6067_v30  ;;  %8227 = vst [vmem:[#allocation126_spill] sm:$0xff] %v6069_v7  ;;  %v615_v7 = vld [vmem:[#allocation2 + $0xc2] sm:$0xff] }
 0x1ec   : > { %1453 = vrot.lane.b32.xlu1 %v580_v58, %s4818_s14  ;;  %1455 = vrot.lane.b32.xlu0 %v581_v8, %s4818_s14  ;;  %v614_v58 = vld [vmem:[#allocation2 + $0xb2] sm:$0xff] }
 0x1ee   : > { %v6073_v31 = vpop.permute.xlu1 %1229  ;;  %v6075_v12 = vpop.permute.xlu0 %1235 }
 0x1ef   : > { %8228 = vst [vmem:[#allocation127_spill] sm:$0xff] %v6073_v31  ;;  %8229 = vst [vmem:[#allocation128_spill] sm:$0xff] %v6075_v12  ;;  %v585_v12 = vld [vmem:[#allocation2 + $0xd9] sm:$0xff] }
 0x1f0   : > { %1581 = vrot.lane.b32.xlu1 %v612_v37, %s4819_s17  ;;  %1583 = vrot.lane.b32.xlu0 %v613_v6, %s4819_s17  ;;  %v584_v37 = vld [vmem:[#allocation2 + $0xc9] sm:$0xff] }
 0x1f2   : > { %v6079_v48 = vpop.permute.xlu1 %1233  ;;  %v6081_v30 = vpop.permute.xlu0 %1239 }
 0x1f3   : > { %8230 = vst [vmem:[#allocation129_spill] sm:$0xff] %v6079_v48  ;;  %8231 = vst [vmem:[#allocation130_spill] sm:$0xff] %v6081_v30  ;;  %v617_v30 = vld [vmem:[#allocation2 + $0xda] sm:$0xff] }
 0x1f4   : > { %1457 = vrot.lane.b32.xlu1 %v582_v38, %s4818_s14  ;;  %1459 = vrot.lane.b32.xlu0 %v583_v43, %s4818_s14  ;;  %v616_v38 = vld [vmem:[#allocation2 + $0xca] sm:$0xff] }
 0x1f6   : > { %v6085_v8 = vpop.permute.xlu1 %1237  ;;  %v6087_v31 = vpop.permute.xlu0 %1307 }
 0x1f7   : > { %8232 = vst [vmem:[#allocation131_spill] sm:$0xff] %v6085_v8 }
 0x1f8   : > { %1585 = vrot.lane.b32.xlu1 %v614_v58, %s4819_s17  ;;  %1587 = vrot.lane.b32.xlu0 %v615_v7, %s4819_s17  ;;  %v586_v58 = vld [vmem:[#allocation2 + $0xe1] sm:$0xff] }
 0x1fa   : > { %v6091_v6 = vpop.permute.xlu1 %1241  ;;  %v6093_v48 = vpop.permute.xlu0 %1311 }
 0x1fb   : > { %8233 = vst [vmem:[#allocation132_spill] sm:$0xff] %v6091_v6  ;;  %v587_v6 = vld [vmem:[#allocation2 + $0xf1] sm:$0xff] }
 0x1fc   : > { %1461 = vrot.lane.b32.xlu1 %v584_v37, %s4818_s14  ;;  %1463 = vrot.lane.b32.xlu0 %v585_v12, %s4818_s14  ;;  %v618_v37 = vld [vmem:[#allocation2 + $0xe2] sm:$0xff] }
 0x1fe   : > { %v6097_v43 = vpop.permute.xlu1 %1309  ;;  %v6099_v8 = vpop.permute.xlu0 %1315 }
 0x200   : > { %1589 = vrot.lane.b32.xlu1 %v616_v38, %s4819_s17  ;;  %1591 = vrot.lane.b32.xlu0 %v617_v30, %s4819_s17  ;;  %v588_v38 = vld [vmem:[#allocation2 + $0xf9] sm:$0xff] }
 0x202   : > { %v6103_v7 = vpop.permute.xlu1 %1313  ;;  %v6105_v47 = vpop.permute.xlu0 %1319 }
 0x204   : > { %1465 = vrot.lane.b32.xlu1 %v586_v58, %s4818_s14  ;;  %1467 = vrot.lane.b32.xlu0 %v587_v6, %s4818_s14  ;;  %v620_v58 = vld [vmem:[#allocation2 + $0xfa] sm:$0xff] }
 0x206   : > { %v6109_v12 = vpop.permute.xlu1 %1317  ;;  %v6111_v5 = vpop.permute.xlu0 %1323 }
 0x208   : > { %1593 = vrot.lane.b32.xlu1 %v618_v37, %s4819_s17  ;;  %1595 = vrot.lane.b32.xlu0 %v619_v39, %s4819_s17  ;;  %v590_v37 = vld [vmem:[#allocation2 + $0x111] sm:$0xff] }
 0x20a   : > { %v6115_v30 = vpop.permute.xlu1 %1321  ;;  %v6117_v45 = vpop.permute.xlu0 %1327 }
 0x20b   : > { %8234 = vst [vmem:[#allocation133_spill] sm:$0xff] %v6117_v45  ;;  %v8261_v45 = vld [vmem:[#allocation9_spill] sm:$0xff] }
 0x20c   : > { %1469 = vrot.lane.b32.xlu1 %v588_v38, %s4818_s14  ;;  %1471 = vrot.lane.b32.xlu0 %v589_v27, %s4818_s14  ;;  %v622_v38 = vld [vmem:[#allocation2 + $0x112] sm:$0xff] }
 0x20e   : > { %v6121_v6 = vpop.permute.xlu1 %1325  ;;  %v6123_v42 = vpop.permute.xlu0 %1331 }
 0x20f   : > { %8235 = vst [vmem:[#allocation134_spill] sm:$0xff] %v6121_v6  ;;  %8236 = vst [vmem:[#allocation135_spill] sm:$0xff] %v6123_v42  ;;  %v593_v42 = vld [vmem:[#allocation2 + $0x139] sm:$0xff] }
 0x210   : > { %1597 = vrot.lane.b32.xlu1 %v620_v58, %s4819_s17  ;;  %1599 = vrot.lane.b32.xlu0 %v621_v44, %s4819_s17  ;;  %v592_v58 = vld [vmem:[#allocation2 + $0x129] sm:$0xff] }
 0x212   : > { %v6127_v39 = vpop.permute.xlu1 %1329  ;;  %v6129_v34 = vpop.permute.xlu0 %1335 }
 0x213   : > { %8237 = vst [vmem:[#allocation136_spill] sm:$0xff] %v6127_v39  ;;  %8238 = vst [vmem:[#allocation137_spill] sm:$0xff] %v6129_v34  ;;  %v625_v34 = vld [vmem:[#allocation2 + $0x13a] sm:$0xff] }
 0x214   : > { %1473 = vrot.lane.b32.xlu1 %v590_v37, %s4818_s14  ;;  %1475 = vrot.lane.b32.xlu0 %v591_v2, %s4818_s14  ;;  %v624_v37 = vld [vmem:[#allocation2 + $0x12a] sm:$0xff] }
 0x216   : > { %v6133_v27 = vpop.permute.xlu1 %1333  ;;  %v6135_v4 = vpop.permute.xlu0 %1339 }
 0x217   : > { %8239 = vst [vmem:[#allocation138_spill] sm:$0xff] %v6133_v27  ;;  %8240 = vst [vmem:[#allocation139_spill] sm:$0xff] %v6135_v4  ;;  %v595_v4 = vld [vmem:[#allocation2 + $0x151] sm:$0xff] }
 0x218   : > { %1601 = vrot.lane.b32.xlu1 %v622_v38, %s4819_s17  ;;  %1603 = vrot.lane.b32.xlu0 %v623_v3, %s4819_s17  ;;  %v594_v38 = vld [vmem:[#allocation2 + $0x141] sm:$0xff] }
 0x21a   : > { %v6139_v44 = vpop.permute.xlu1 %1337  ;;  %v6141_v39 = vpop.permute.xlu0 %1343 }
 0x21b   : > { %8241 = vst [vmem:[#allocation140_spill] sm:$0xff] %v6139_v44  ;;  %8242 = vst [vmem:[#allocation141_spill] sm:$0xff] %v6141_v39  ;;  %v627_v39 = vld [vmem:[#allocation2 + $0x152] sm:$0xff] }
 0x21c   : > { %1477 = vrot.lane.b32.xlu1 %v592_v58, %s4818_s14  ;;  %1479 = vrot.lane.b32.xlu0 %v593_v42, %s4818_s14  ;;  %v626_v58 = vld [vmem:[#allocation2 + $0x142] sm:$0xff] }
 0x21e   : > { %v6145_v2 = vpop.permute.xlu1 %1341  ;;  %v6147_v27 = vpop.permute.xlu0 %1347 }
 0x21f   : > { %8243 = vst [vmem:[#allocation142_spill] sm:$0xff] %v6145_v2  ;;  %8244 = vst [vmem:[#allocation143_spill] sm:$0xff] %v6147_v27  ;;  %v597_v27 = vld [vmem:[#allocation2 + $0x169] sm:$0xff] }
 0x220   : > { %1605 = vrot.lane.b32.xlu1 %v624_v37, %s4819_s17  ;;  %1607 = vrot.lane.b32.xlu0 %v625_v34, %s4819_s17  ;;  %v596_v37 = vld [vmem:[#allocation2 + $0x159] sm:$0xff] }
 0x222   : > { %v6151_v3 = vpop.permute.xlu1 %1345  ;;  %v6153_v44 = vpop.permute.xlu0 %1351 }
 0x223   : > { %8245 = vst [vmem:[#allocation144_spill] sm:$0xff] %v6151_v3  ;;  %8246 = vst [vmem:[#allocation145_spill] sm:$0xff] %v6153_v44  ;;  %v629_v44 = vld [vmem:[#allocation2 + $0x16a] sm:$0xff] }
 0x224   : > { %1481 = vrot.lane.b32.xlu1 %v594_v38, %s4818_s14  ;;  %1483 = vrot.lane.b32.xlu0 %v595_v4, %s4818_s14  ;;  %v628_v38 = vld [vmem:[#allocation2 + $0x15a] sm:$0xff] }
 0x226   : > { %v6157_v42 = vpop.permute.xlu1 %1349  ;;  %v6159_v2 = vpop.permute.xlu0 %1355 }
 0x227   : > { %8247 = vst [vmem:[#allocation146_spill] sm:$0xff] %v6157_v42  ;;  %8248 = vst [vmem:[#allocation147_spill] sm:$0xff] %v6159_v2 }
 0x228   : > { %1609 = vrot.lane.b32.xlu1 %v626_v58, %s4819_s17  ;;  %1611 = vrot.lane.b32.xlu0 %v627_v39, %s4819_s17  ;;  %v598_v58 = vld [vmem:[#allocation2 + $0x171] sm:$0xff] }
 0x22a   : > { %v6163_v34 = vpop.permute.xlu1 %1353  ;;  %v6165_v3 = vpop.permute.xlu0 %1359 }
 0x22b   : > { %8249 = vst [vmem:[#allocation148_spill] sm:$0xff] %v6163_v34  ;;  %8250 = vst [vmem:[#allocation149_spill] sm:$0xff] %v6165_v3  ;;  %v8260_v34 = vld [vmem:[#allocation13_spill] sm:$0xff] }
 0x22c   : > { %1485 = vrot.lane.b32.xlu1 %v596_v37, %s4818_s14  ;;  %1487 = vrot.lane.b32.xlu0 %v597_v27, %s4818_s14  ;;  %v630_v37 = vld [vmem:[#allocation2 + $0x172] sm:$0xff] }
 0x22e   : > { %v6169_v4 = vpop.permute.xlu1 %1357  ;;  %v6171_v42 = vpop.permute.xlu0 %1363 }
 0x22f   : > { %8251 = vst [vmem:[#allocation150_spill] sm:$0xff] %v6169_v4  ;;  %8252 = vst [vmem:[#allocation151_spill] sm:$0xff] %v6171_v42  ;;  %v8258_v4 = vld [vmem:[#allocation5_spill] sm:$0xff] }
 0x230   : > { %1613 = vrot.lane.b32.xlu1 %v628_v38, %s4819_s17  ;;  %1615 = vrot.lane.b32.xlu0 %v629_v44, %s4819_s17  ;;  %v601_v44 = vld [vmem:[#allocation2 + $0x199] sm:$0xff] }
 0x232   : > { %v6175_v39 = vpop.permute.xlu1 %1361  ;;  %v6177_v2 = vpop.permute.xlu0 %1367 }
 0x233   : > { %8253 = vst [vmem:[#allocation152_spill] sm:$0xff] %v6175_v39  ;;  %8254 = vst [vmem:[#allocation153_spill] sm:$0xff] %v6177_v2  ;;  %v347_v2 = vld [vmem:[#allocation2 + $0x8] sm:$0xff]  ;;  %v8257_v39 = vld [vmem:[#allocation4_spill] sm:$0xff] }
 0x234   : > { %1489 = vrot.lane.b32.xlu1 %v598_v58, %s4818_s14  ;;  %1491 = vrot.lane.b32.xlu0 %v5720_v56, %s4818_s14  ;;  %v346_v58 = vld [vmem:[#allocation2] sm:$0xff] }
 0x236   : > { %v6182_v27 = vpop.permute.xlu1 %1365  ;;  %v1436_v3 = vpop.permute.xlu0 %1435 }
 0x237   : > { %8255 = vst [vmem:[#allocation154_spill] sm:$0xff] %v6182_v27  ;;  %v633_v27 = vld [vmem:[#allocation2 + $0x19a] sm:$0xff] }
 0x238   : > { %1617 = vrot.lane.b32.xlu1 %v630_v37, %s4819_s17  ;;  %1619 = vrot.lane.b32.xlu0 %v5852_v21, %s4819_s17  ;;  %v1659_v37 = vsel %vm225_vm0, %v346_v58, %v8257_v39  ;;  %v1660_v21 = vsel %vm225_vm0, %v347_v2, %v8258_v4  ;;  %v602_v39 = vld [vmem:[#allocation2 + $0x1a1] sm:$0xff]  ;;  %v8263_v58 = vld [vmem:[#allocation11_spill] sm:$0xff] }
 0x239   : > { %v1692_v6 = vsel %vm1691_vm3, %v1659_v37, %v8262_v9  ;;  %v8264_v2 = vld [vmem:[#allocation19_spill] sm:$0xff] }
 0x23a   : > { %v6187_v38 = vpop.permute.xlu1 %1369  ;;  %v1440_v42 = vpop.permute.xlu0 %1439  ;;  %v1662_v4 = vsel %vm225_vm0, %v8264_v2, %v8263_v58  ;;  %v1725_v13 = vsel %vm1724_vm4, %v1692_v6, %v5704_v52 }
 0x23b   : > { %8256 = vst [vmem:[#allocation155_spill] sm:$0xff] %v6187_v38  ;;  %v1758_v37 = vsel %vm1757_vm5, %v1725_v13, %v5836_v22  ;;  %v634_v22 = vld [vmem:[#allocation2 + $0x1a2] sm:$0xff] }
 0x23c   : > { %1493 = vrot.lane.b32.xlu1 %v5734_v60, %s4818_s14  ;;  %1495 = vrot.lane.b32.xlu0 %v601_v44, %s4818_s14  ;;  %v8259_v60 = vld [vmem:[#allocation7_spill] sm:$0xff]  ;;  %v1663_v44 = vsel %vm225_vm0, %v8163_v19, %v8261_v45  ;;  %v8266_v19 = vld [vmem:[#allocation68_spill] sm:$0xff] }
 0x23d   : > { %v1661_v26 = vsel %vm225_vm0, %v8260_v34, %v8259_v60  ;;  %v8267_v60 = vld [vmem:[#allocation71_spill] sm:$0xff] }
 0x23e   : > { %v1438_v56 = vpop.permute.xlu1 %1437  ;;  %v1444_v38 = vpop.permute.xlu0 %1443  ;;  %v1694_v45 = vsel %vm1691_vm3, %v1661_v26, %v8266_v19 }
 0x240   : > { %1621 = vrot.lane.b32.xlu1 %v5866_v28, %s4819_s17  ;;  %v1693_v28 = vsel %vm1691_vm3, %v1660_v21, %v8265_v17  ;;  %1623 = vrot.lane.b32.xlu0 %v633_v27, %s4819_s17  ;;  %v1696_v17 = vsel %vm1691_vm3, %v1663_v44, %v8267_v60  ;;  %v8268_v21 = vld [vmem:[#allocation72_spill] sm:$0xff]  ;;  %v1791_v27 = vsel %vm1790_vm6, %v1758_v37, %v5968_v40 }
 0x241   : > { %v1726_v9 = vsel %vm1724_vm4, %v1693_v28, %v5718_v55  ;;  %v1695_v52 = vsel %vm1691_vm3, %v1662_v4, %v8268_v21  ;;  %v1824_v13 = vsel %vm1823_vm7, %v1791_v27, %v6087_v31  ;;  %v1727_v44 = vsel %vm1724_vm4, %v1694_v45, %v5712_v54  ;;  %v8271_v21 = vld [vmem:[#allocation12_spill] sm:$0xff]  ;;  %v8272_v27 = vld [vmem:[#allocation73_spill] sm:$0xff] }
 0x242   : > { %v1442_v34 = vpop.permute.xlu1 %1441  ;;  %v1759_v6 = vsel %vm1757_vm5, %v1726_v9, %v5850_v29  ;;  %v1566_v26 = vpop.permute.xlu0 %1565  ;;  %v1729_v29 = vsel %vm1724_vm4, %v1696_v17, %v5722_v50  ;;  %v1760_v31 = vsel %vm1757_vm5, %v1727_v44, %v5844_v24  ;;  %v4771_v9 = vld [vmem:[#allocation2 + $0x38] sm:$0xff] }
 0x243   : > { %v1792_v55 = vsel %vm1790_vm6, %v1759_v6, %v5988_v62  ;;  %v1728_v62 = vsel %vm1724_vm4, %v1695_v52, %v5728_v57  ;;  %v1793_v50 = vsel %vm1790_vm6, %v1760_v31, %v5976_v11  ;;  %v1762_v57 = vsel %vm1757_vm5, %v1729_v29, %v5854_v18 }
 0x244   : > { %1497 = vrot.lane.b32.xlu1 %v602_v39, %s4818_s14  ;;  %v1825_v40 = vsel %vm1823_vm7, %v1792_v55, %v6097_v43  ;;  %v1857_v39 = vsel %vm1856_vm8, %v1824_v13, %v1436_v3  ;;  %v1761_v54 = vsel %vm1757_vm5, %v1728_v62, %v5860_v35  ;;  %v1795_v35 = vsel %vm1790_vm6, %v1762_v57, %v5990_v20  ;;  %v4773_v62 = vld [vmem:[#allocation2 + $0x50] sm:$0xff] }
 0x245   : > { %v1858_v2 = vsel %vm1856_vm8, %v1825_v40, %v1438_v56  ;;  %v1794_v24 = vsel %vm1790_vm6, %v1761_v54, %v6001_v33  ;;  %v1826_v56 = vsel %vm1823_vm7, %v1793_v50, %v6093_v48  ;;  %v1828_v18 = vsel %vm1823_vm7, %v1795_v35, %v6099_v8  ;;  %v8269_v48 = vld [vmem:[#allocation15_spill] sm:$0xff]  ;;  %v8274_v54 = vld [vmem:[#allocation16_spill] sm:$0xff] }
 0x246   : > { %v1564_v58 = vpop.permute.xlu1 %1563  ;;  %v1891_v43 = vsel %vm1889_vm9, %v1858_v2, %v1566_v26  ;;  %v1570_v3 = vpop.permute.xlu0 %1569  ;;  %v1827_v11 = vsel %vm1823_vm7, %v1794_v24, %v6103_v7  ;;  %v1859_v28 = vsel %vm1856_vm8, %v1826_v56, %v1440_v42  ;;  %v1664_v37 = vsel %vm225_vm0, %v4771_v9, %v8269_v48  ;;  %v8270_v7 = vld [vmem:[#allocation74_spill] sm:$0xff]  ;;  %v4776_v48 = vld [vmem:[#allocation2 + $0x78] sm:$0xff] }
 0x247   : > { %v1890_v4 = vsel %vm1889_vm9, %v1857_v39, %v1564_v58  ;;  %v1860_v45 = vsel %vm1856_vm8, %v1827_v11, %v1442_v34  ;;  %v1861_v60 = vsel %vm1856_vm8, %v1828_v18, %v1444_v38  ;;  %v1697_v42 = vsel %vm1691_vm3, %v1664_v37, %v8270_v7  ;;  %v4772_v34 = vld [vmem:[#allocation2 + $0x48] sm:$0xff]  ;;  %v8277_v37 = vld [vmem:[#allocation20_spill] sm:$0xff] }
 0x248   : > { %1625 = vrot.lane.b32.xlu1 %v634_v22, %s4819_s17  ;;  %4632 = vmatprep.mubr.msk.f32.mxu0 %vm1934_vm10, %v1890_v4  ;;  %v1893_v20 = vsel %vm1889_vm9, %v1860_v45, %v1570_v3  ;;  %v1665_v52 = vsel %vm225_vm0, %v4772_v34, %v8271_v21  ;;  %v1730_v6 = vsel %vm1724_vm4, %v1697_v42, %v5738_v61  ;;  %v4774_v4 = vld [vmem:[#allocation2 + $0x60] sm:$0xff]  ;;  %v8275_v3 = vld [vmem:[#allocation75_spill] sm:$0xff]  ;;  %v4775_v45 = vld [vmem:[#allocation2 + $0x68] sm:$0xff] }
 0x249   : > { %4633 = vmatmul.mubr.msk.f32.vlgmr.msra.gmra.mrb[0].mxu0 %vm1934_vm10, %v1891_v43  ;;  %v1698_v26 = vsel %vm1691_vm3, %v1665_v52, %v8272_v27  ;;  %v1763_v55 = vsel %vm1757_vm5, %v1730_v6, %v5870_v49  ;;  %v8278_v42 = vld [vmem:[#allocation57_spill] sm:$0xff]  ;;  %v8279_v21 = vld [vmem:[#allocation6_spill] sm:$0xff] }
 0x24a   : > { %v1568_v19 = vpop.permute.xlu1 %1567  ;;  %v1572_v17 = vpop.permute.xlu0 %1571  ;;  %v1731_v13 = vsel %vm1724_vm4, %v1698_v26, %v5730_v59  ;;  %v1796_v22 = vsel %vm1790_vm6, %v1763_v55, %v6008_v10  ;;  %v8273_v10 = vld [vmem:[#allocation18_spill] sm:$0xff] }
 0x24b   : > { %v1892_v33 = vsel %vm1889_vm9, %v1859_v28, %v1568_v19  ;;  %v1894_v8 = vsel %vm1889_vm9, %v1861_v60, %v1572_v17  ;;  %v1764_v29 = vsel %vm1757_vm5, %v1731_v13, %v5862_v23  ;;  %v1829_v61 = vsel %vm1823_vm7, %v1796_v22, %v6109_v12  ;;  %v4777_v13 = vld [vmem:[#allocation2 + $0x80] sm:$0xff]  ;;  %v8283_v22 = vld [vmem:[#allocation26_spill] sm:$0xff] }
 0x24c   : > { %4635 = vmatprep.mubr.msk.f32.mxu0 %vm1934_vm10, %v1892_v33  ;;  %v1797_v40 = vsel %vm1790_vm6, %v1764_v29, %v6003_v32  ;;  %v1666_v31 = vsel %vm225_vm0, %v4773_v62, %v8273_v10  ;;  %v8286_v10 = vld [vmem:[#allocation98_spill] sm:$0xff] }
 0x24d   : > { %4636 = vmatmul.mubr.msk.f32.gmra.mrb[2].mxu0 %vm1934_vm10, %v1893_v20  ;;  %v1830_v49 = vsel %vm1823_vm7, %v1797_v40, %v6105_v47  ;;  %v1699_v32 = vsel %vm1691_vm3, %v1666_v31, %v5614_v0  ;;  %v1667_v47 = vsel %vm225_vm0, %v4774_v4, %v8274_v54  ;;  %v8284_v40 = vld [vmem:[#allocation77_spill] sm:$0xff] }
 0x24e   : > { %v1446_v38 = vpop.permute.xlu1 %1445  ;;  %4638 = vmatprep.mubr.msk.f32.mxu0 %vm1934_vm10, %v1894_v8  ;;  %v1448_v44 = vpop.permute.xlu0 %1447  ;;  %v1732_v50 = vsel %vm1724_vm4, %v1699_v32, %v5746_v63  ;;  %v1700_v57 = vsel %vm1691_vm3, %v1667_v47, %v8275_v3  ;;  %v8289_v54 = vld [vmem:[#allocation97_spill] sm:$0xff] }
 0x24f   : > { %v1862_v39 = vsel %vm1856_vm8, %v1829_v61, %v1446_v38  ;;  %v1863_v23 = vsel %vm1856_vm8, %v1830_v49, %v1448_v44  ;;  %v1765_v24 = vsel %vm1757_vm5, %v1732_v50, %v5878_v46  ;;  %v1733_v0 = vsel %vm1724_vm4, %v1700_v57, %v5740_v53  ;;  %v8281_v38 = vld [vmem:[#allocation55_spill] sm:$0xff]  ;;  %v4778_v49 = vld [vmem:[#allocation2 + $0x90] sm:$0xff]  ;;  %v8290_v50 = vld [vmem:[#allocation61_spill] sm:$0xff] }
 0x250   : > { %v1798_v56 = vsel %vm1790_vm6, %v1765_v24, %v6019_v41  ;;  %v1766_v11 = vsel %vm1757_vm5, %v1733_v0, %v5872_v16  ;;  %v8276_v41 = vld [vmem:[#allocation22_spill] sm:$0xff]  ;;  %v1670_v44 = vsel %vm225_vm0, %v4777_v13, %v8283_v22  ;;  %v8291_v57 = vld [vmem:[#allocation8_spill] sm:$0xff]  ;;  %v8306_v22 = vld [vmem:[#allocation137_spill] sm:$0xff] }
 0x251   : > { %v1831_v63 = vsel %vm1823_vm7, %v1798_v56, %v6115_v30  ;;  %v1799_v28 = vsel %vm1790_vm6, %v1766_v11, %v6014_v15  ;;  %v1668_v33 = vsel %vm225_vm0, %v4775_v45, %v8276_v41  ;;  %v8292_v0 = vld [vmem:[#allocation136_spill] sm:$0xff]  ;;  %v8295_v45 = vld [vmem:[#allocation30_spill] sm:$0xff] }
 0x252   : > { %v1574_v58 = vpop.permute.xlu1 %1573  ;;  %v1576_v2 = vpop.permute.xlu0 %1575  ;;  %v1832_v46 = vsel %vm1823_vm7, %v1799_v28, %v6111_v5  ;;  %v1701_v15 = vsel %vm1691_vm3, %v1668_v33, %v5622_v25  ;;  %v1669_v5 = vsel %vm225_vm0, %v4776_v48, %v8277_v37  ;;  %v4780_v48 = vld [vmem:[#allocation2 + $0xa8] sm:$0xff]  ;;  %v8297_v37 = vld [vmem:[#allocation28_spill] sm:$0xff] }
 0x253   : > { %v1895_v59 = vsel %vm1889_vm9, %v1862_v39, %v1574_v58  ;;  %v1896_v12 = vsel %vm1889_vm9, %v1863_v23, %v1576_v2  ;;  %v1734_v60 = vsel %vm1724_vm4, %v1701_v15, %v5754_v1  ;;  %v1702_v17 = vsel %vm1691_vm3, %v1669_v5, %v5616_v36  ;;  %v8280_v1 = vld [vmem:[#allocation134_spill] sm:$0xff]  ;;  %v8287_v2 = vld [vmem:[#allocation76_spill] sm:$0xff] }
 0x254   : > { %4639 = vmatmul.mubr.msk.f32.gmra.mrb[4].mxu0 %vm1934_vm10, %v1895_v59  ;;  %v1767_v7 = vsel %vm1757_vm5, %v1734_v60, %v5886_v14  ;;  %v1735_v25 = vsel %vm1724_vm4, %v1702_v17, %v5748_v51  ;;  %v8282_v14 = vld [vmem:[#allocation133_spill] sm:$0xff]  ;;  %v1703_v39 = vsel %vm1691_vm3, %v1670_v44, %v8284_v40  ;;  %v8285_v59 = vld [vmem:[#allocation24_spill] sm:$0xff]  ;;  %v1673_v5 = vsel %vm225_vm0, %v4780_v48, %v8297_v37  ;;  %v8307_v40 = vld [vmem:[#allocation34_spill] sm:$0xff] }
 0x255   : > { %4641 = vmatprep.mubr.msk.f32.mxu0 %vm1934_vm10, %v1896_v12  ;;  %v1800_v8 = vsel %vm1790_vm6, %v1767_v7, %v8278_v42  ;;  %v1768_v52 = vsel %vm1757_vm5, %v1735_v25, %v8279_v21  ;;  %v1671_v62 = vsel %vm225_vm0, %v4778_v49, %v8285_v59  ;;  %v1736_v31 = vsel %vm1724_vm4, %v1703_v39, %v8286_v10  ;;  %v8288_v12 = vld [vmem:[#allocation10_spill] sm:$0xff]  ;;  %v8298_v60 = vld [vmem:[#allocation100_spill] sm:$0xff]  ;;  %v8300_v42 = vld [vmem:[#allocation17_spill] sm:$0xff] }
 0x256   : > { %v1450_v43 = vpop.permute.xlu1 %1449  ;;  %v1452_v35 = vpop.permute.xlu0 %1451  ;;  %v1833_v6 = vsel %vm1823_vm7, %v1800_v8, %v8280_v1  ;;  %v1801_v27 = vsel %vm1790_vm6, %v1768_v52, %v8281_v38  ;;  %v1704_v32 = vsel %vm1691_vm3, %v1671_v62, %v8287_v2  ;;  %v1769_v4 = vsel %vm1757_vm5, %v1736_v31, %v8288_v12  ;;  %v8299_v7 = vld [vmem:[#allocation78_spill] sm:$0xff]  ;;  %v8302_v52 = vld [vmem:[#allocation65_spill] sm:$0xff]  ;;  %v4782_v31 = vld [vmem:[#allocation2 + $0xc0] sm:$0xff] }
 0x257   : > { %v1864_v19 = vsel %vm1856_vm8, %v1831_v63, %v1450_v43  ;;  %v1865_v16 = vsel %vm1856_vm8, %v1832_v46, %v1452_v35  ;;  %v1834_v55 = vsel %vm1823_vm7, %v1801_v27, %v8282_v14  ;;  %v1737_v47 = vsel %vm1724_vm4, %v1704_v32, %v8289_v54  ;;  %v8293_v35 = vld [vmem:[#allocation59_spill] sm:$0xff]  ;;  %v8303_v38 = vld [vmem:[#allocation14_spill] sm:$0xff]  ;;  %v8308_v59 = vld [vmem:[#allocation81_spill] sm:$0xff] }
 0x258   : > { %v1802_v43 = vsel %vm1790_vm6, %v1769_v4, %v8290_v50  ;;  %v1770_v24 = vsel %vm1757_vm5, %v1737_v47, %v8291_v57  ;;  %v1706_v25 = vsel %vm1691_vm3, %v1673_v5, %v8299_v7  ;;  %v8305_v14 = vld [vmem:[#allocation63_spill] sm:$0xff]  ;;  %v8310_v32 = vld [vmem:[#allocation102_spill] sm:$0xff]  ;;  %v8311_v54 = vld [vmem:[#allocation80_spill] sm:$0xff] }
 0x259   : > { %v1835_v56 = vsel %vm1823_vm7, %v1802_v43, %v8292_v0  ;;  %v1803_v11 = vsel %vm1790_vm6, %v1770_v24, %v8293_v35  ;;  %v8312_v50 = vld [vmem:[#allocation23_spill] sm:$0xff]  ;;  %v8314_v24 = vld [vmem:[#allocation70_spill] sm:$0xff]  ;;  %v8315_v35 = vld [vmem:[#allocation21_spill] sm:$0xff] }
 0x25a   : > { %v1578_v18 = vpop.permute.xlu1 %1577  ;;  %v1580_v9 = vpop.permute.xlu0 %1579  ;;  %v8320_v37 = vld [vmem:[#allocation83_spill] sm:$0xff] }
 0x25b   : > { %v1897_v53 = vsel %vm1889_vm9, %v1864_v19, %v1578_v18  ;;  %v1898_v30 = vsel %vm1889_vm9, %v1865_v16, %v1580_v9  ;;  %v8294_v19 = vld [vmem:[#allocation135_spill] sm:$0xff] }
 0x25c   : > { %4642 = vmatmul.mubr.msk.f32.gmra.mrb[6].mxu0 %vm1934_vm10, %v1897_v53  ;;  %v1836_v18 = vsel %vm1823_vm7, %v1803_v11, %v8294_v19  ;;  %v4779_v53 = vld [vmem:[#allocation2 + $0x98] sm:$0xff] }
 0x25d   : > { %4644 = vmatprep.mubr.msk.f32.mxu0 %vm1934_vm10, %v1898_v30  ;;  %v1672_v41 = vsel %vm225_vm0, %v4779_v53, %v8295_v45  ;;  %v8296_v9 = vld [vmem:[#allocation79_spill] sm:$0xff] }
 0x25e   : > { %v1454_v20 = vpop.permute.xlu1 %1453  ;;  %v1456_v34 = vpop.permute.xlu0 %1455  ;;  %v1705_v15 = vsel %vm1691_vm3, %v1672_v41, %v8296_v9  ;;  %v8317_v19 = vld [vmem:[#allocation67_spill] sm:$0xff]  ;;  %v8319_v9 = vld [vmem:[#allocation38_spill] sm:$0xff] }
 0x25f   : > { %v1866_v36 = vsel %vm1856_vm8, %v1833_v6, %v1454_v20  ;;  %v1867_v29 = vsel %vm1856_vm8, %v1834_v55, %v1456_v34  ;;  %v1738_v20 = vsel %vm1724_vm4, %v1705_v15, %v8298_v60  ;;  %v8301_v34 = vld [vmem:[#allocation99_spill] sm:$0xff] }
 0x260   : > { %v1771_v8 = vsel %vm1757_vm5, %v1738_v20, %v8300_v42  ;;  %v1739_v21 = vsel %vm1724_vm4, %v1706_v25, %v8301_v34  ;;  %v8318_v45 = vld [vmem:[#allocation139_spill] sm:$0xff]  ;;  %v8322_v25 = vld [vmem:[#allocation104_spill] sm:$0xff]  ;;  %v8323_v34 = vld [vmem:[#allocation82_spill] sm:$0xff] }
 0x261   : > { %v1804_v1 = vsel %vm1790_vm6, %v1771_v8, %v8302_v52  ;;  %v1772_v27 = vsel %vm1757_vm5, %v1739_v21, %v8303_v38  ;;  %v4784_v20 = vld [vmem:[#allocation2 + $0xd8] sm:$0xff] }
 0x262   : > { %v1582_v26 = vpop.permute.xlu1 %1581  ;;  %v1584_v61 = vpop.permute.xlu0 %1583  ;;  %v1805_v55 = vsel %vm1790_vm6, %v1772_v27, %v8305_v14  ;;  %v8324_v52 = vld [vmem:[#allocation27_spill] sm:$0xff]  ;;  %v8327_v14 = vld [vmem:[#allocation25_spill] sm:$0xff] }
 0x263   : > { %v1899_v51 = vsel %vm1889_vm9, %v1866_v36, %v1582_v26  ;;  %v1900_v58 = vsel %vm1889_vm9, %v1867_v29, %v1584_v61  ;;  %v8304_v36 = vld [vmem:[#allocation138_spill] sm:$0xff]  ;;  %v1838_v44 = vsel %vm1823_vm7, %v1805_v55, %v8306_v22  ;;  %v8326_v27 = vld [vmem:[#allocation119_spill] sm:$0xff] }
 0x264   : > { %4645 = vmatmul.mubr.msk.f32.gmra.mrb[8].mxu0 %vm1934_vm10, %v1899_v51  ;;  %v1837_v26 = vsel %vm1823_vm7, %v1804_v1, %v8304_v36  ;;  %v4781_v61 = vld [vmem:[#allocation2 + $0xb0] sm:$0xff] }
 0x265   : > { %4647 = vmatprep.mubr.msk.f32.mxu0 %vm1934_vm10, %v1900_v58  ;;  %v1674_v39 = vsel %vm225_vm0, %v4781_v61, %v8307_v40  ;;  %v8329_v22 = vld [vmem:[#allocation118_spill] sm:$0xff]  ;;  %v8330_v40 = vld [vmem:[#allocation141_spill] sm:$0xff] }
 0x266   : > { %v1458_v23 = vpop.permute.xlu1 %1457  ;;  %v1460_v3 = vpop.permute.xlu0 %1459  ;;  %v1707_v62 = vsel %vm1691_vm3, %v1674_v39, %v8308_v59  ;;  %v8331_v59 = vld [vmem:[#allocation42_spill] sm:$0xff] }
 0x267   : > { %v1868_v63 = vsel %vm1856_vm8, %v1835_v56, %v1458_v23  ;;  %v1869_v33 = vsel %vm1856_vm8, %v1836_v18, %v1460_v3  ;;  %v8309_v23 = vld [vmem:[#allocation32_spill] sm:$0xff]  ;;  %v1740_v12 = vsel %vm1724_vm4, %v1707_v62, %v8310_v32  ;;  %v8313_v3 = vld [vmem:[#allocation101_spill] sm:$0xff] }
 0x268   : > { %v1675_v2 = vsel %vm225_vm0, %v4782_v31, %v8309_v23  ;;  %v1773_v43 = vsel %vm1757_vm5, %v1740_v12, %v8312_v50  ;;  %v8332_v23 = vld [vmem:[#allocation85_spill] sm:$0xff]  ;;  %v4786_v12 = vld [vmem:[#allocation2 + $0xf0] sm:$0xff] }
 0x269   : > { %v1708_v47 = vsel %vm1691_vm3, %v1675_v2, %v8311_v54  ;;  %v1806_v0 = vsel %vm1790_vm6, %v1773_v43, %v8314_v24  ;;  %v8336_v24 = vld [vmem:[#allocation31_spill] sm:$0xff] }
 0x26a   : > { %v1586_v28 = vpop.permute.xlu1 %1585  ;;  %v1588_v16 = vpop.permute.xlu0 %1587  ;;  %v1741_v57 = vsel %vm1724_vm4, %v1708_v47, %v8313_v3  ;;  %v8334_v47 = vld [vmem:[#allocation106_spill] sm:$0xff]  ;;  %v8335_v3 = vld [vmem:[#allocation84_spill] sm:$0xff] }
 0x26b   : > { %v1901_v46 = vsel %vm1889_vm9, %v1868_v63, %v1586_v28  ;;  %v1902_v30 = vsel %vm1889_vm9, %v1869_v33, %v1588_v16  ;;  %v1774_v11 = vsel %vm1757_vm5, %v1741_v57, %v8315_v35  ;;  %v8316_v63 = vld [vmem:[#allocation140_spill] sm:$0xff]  ;;  %v4783_v16 = vld [vmem:[#allocation2 + $0xc8] sm:$0xff] }
 0x26c   : > { %4648 = vmatmul.mubr.msk.f32.gmra.mrb[10].mxu0 %vm1934_vm10, %v1901_v46  ;;  %v1839_v28 = vsel %vm1823_vm7, %v1806_v0, %v8316_v63  ;;  %v1807_v18 = vsel %vm1790_vm6, %v1774_v11, %v8317_v19  ;;  %v1676_v15 = vsel %vm225_vm0, %v4783_v16, %v8319_v9  ;;  %v8338_v11 = vld [vmem:[#allocation121_spill] sm:$0xff]  ;;  %v8342_v9 = vld [vmem:[#allocation143_spill] sm:$0xff] }
 0x26d   : > { %4650 = vmatprep.mubr.msk.f32.mxu0 %vm1934_vm10, %v1902_v30  ;;  %v1840_v41 = vsel %vm1823_vm7, %v1807_v18, %v8318_v45  ;;  %v1709_v5 = vsel %vm1691_vm3, %v1676_v15, %v8320_v37  ;;  %v8339_v19 = vld [vmem:[#allocation29_spill] sm:$0xff]  ;;  %v8341_v45 = vld [vmem:[#allocation120_spill] sm:$0xff]  ;;  %v8343_v37 = vld [vmem:[#allocation46_spill] sm:$0xff] }
 0x26e   : > { %v1462_v17 = vpop.permute.xlu1 %1461  ;;  %v1464_v6 = vpop.permute.xlu0 %1463  ;;  %v1742_v42 = vsel %vm1724_vm4, %v1709_v5, %v8322_v25 }
 0x26f   : > { %v1870_v51 = vsel %vm1856_vm8, %v1837_v26, %v1462_v17  ;;  %v1871_v58 = vsel %vm1856_vm8, %v1838_v44, %v1464_v6  ;;  %v8321_v17 = vld [vmem:[#allocation36_spill] sm:$0xff]  ;;  %v1775_v1 = vsel %vm1757_vm5, %v1742_v42, %v8324_v52  ;;  %v8325_v6 = vld [vmem:[#allocation103_spill] sm:$0xff]  ;;  %v4788_v42 = vld [vmem:[#allocation2 + $0x108] sm:$0xff] }
 0x270   : > { %v1677_v7 = vsel %vm225_vm0, %v4784_v20, %v8321_v17  ;;  %v1808_v36 = vsel %vm1790_vm6, %v1775_v1, %v8326_v27  ;;  %v8344_v17 = vld [vmem:[#allocation87_spill] sm:$0xff] }
 0x271   : > { %v1710_v21 = vsel %vm1691_vm3, %v1677_v7, %v8323_v34  ;;  %v8348_v27 = vld [vmem:[#allocation35_spill] sm:$0xff] }
 0x272   : > { %v1590_v13 = vpop.permute.xlu1 %1589  ;;  %v1592_v49 = vpop.permute.xlu0 %1591  ;;  %v1743_v38 = vsel %vm1724_vm4, %v1710_v21, %v8325_v6  ;;  %v8346_v21 = vld [vmem:[#allocation108_spill] sm:$0xff]  ;;  %v8347_v6 = vld [vmem:[#allocation86_spill] sm:$0xff] }
 0x273   : > { %v1903_v29 = vsel %vm1889_vm9, %v1870_v51, %v1590_v13  ;;  %v1904_v10 = vsel %vm1889_vm9, %v1871_v58, %v1592_v49  ;;  %v1776_v55 = vsel %vm1757_vm5, %v1743_v38, %v8327_v14  ;;  %v8328_v51 = vld [vmem:[#allocation142_spill] sm:$0xff]  ;;  %v4785_v49 = vld [vmem:[#allocation2 + $0xe0] sm:$0xff] }
 0x274   : > { %4651 = vmatmul.mubr.msk.f32.gmra.mrb[12].mxu0 %vm1934_vm10, %v1903_v29  ;;  %v1841_v13 = vsel %vm1823_vm7, %v1808_v36, %v8328_v51  ;;  %v1809_v44 = vsel %vm1790_vm6, %v1776_v55, %v8329_v22  ;;  %v1678_v62 = vsel %vm225_vm0, %v4785_v49, %v8331_v59  ;;  %v8350_v55 = vld [vmem:[#allocation123_spill] sm:$0xff]  ;;  %v8351_v22 = vld [vmem:[#allocation33_spill] sm:$0xff] }
 0x275   : > { %4653 = vmatprep.mubr.msk.f32.mxu0 %vm1934_vm10, %v1904_v10  ;;  %v1842_v39 = vsel %vm1823_vm7, %v1809_v44, %v8330_v40  ;;  %v1711_v2 = vsel %vm1691_vm3, %v1678_v62, %v8332_v23  ;;  %v8353_v40 = vld [vmem:[#allocation122_spill] sm:$0xff]  ;;  %v8354_v59 = vld [vmem:[#allocation145_spill] sm:$0xff] }
 0x276   : > { %v1466_v4 = vpop.permute.xlu1 %1465  ;;  %v1468_v56 = vpop.permute.xlu0 %1467  ;;  %v1744_v50 = vsel %vm1724_vm4, %v1711_v2, %v8334_v47  ;;  %v8355_v23 = vld [vmem:[#allocation50_spill] sm:$0xff] }
 0x277   : > { %v1872_v46 = vsel %vm1856_vm8, %v1839_v28, %v1466_v4  ;;  %v1873_v30 = vsel %vm1856_vm8, %v1840_v41, %v1468_v56  ;;  %v8333_v4 = vld [vmem:[#allocation40_spill] sm:$0xff]  ;;  %v1777_v0 = vsel %vm1757_vm5, %v1744_v50, %v8336_v24  ;;  %v8337_v56 = vld [vmem:[#allocation105_spill] sm:$0xff] }
 0x278   : > { %v1679_v54 = vsel %vm225_vm0, %v4786_v12, %v8333_v4  ;;  %v1810_v63 = vsel %vm1790_vm6, %v1777_v0, %v8338_v11  ;;  %v8356_v4 = vld [vmem:[#allocation89_spill] sm:$0xff]  ;;  %v4790_v50 = vld [vmem:[#allocation2 + $0x120] sm:$0xff]  ;;  %v8360_v11 = vld [vmem:[#allocation39_spill] sm:$0xff] }
 0x279   : > { %v1712_v57 = vsel %vm1691_vm3, %v1679_v54, %v8335_v3 }
 0x27a   : > { %v1594_v53 = vpop.permute.xlu1 %1593  ;;  %v1596_v48 = vpop.permute.xlu0 %1595  ;;  %v1745_v35 = vsel %vm1724_vm4, %v1712_v57, %v8337_v56  ;;  %v8358_v57 = vld [vmem:[#allocation110_spill] sm:$0xff]  ;;  %v8359_v56 = vld [vmem:[#allocation88_spill] sm:$0xff] }
 0x27b   : > { %v1905_v33 = vsel %vm1889_vm9, %v1872_v46, %v1594_v53  ;;  %v1906_v60 = vsel %vm1889_vm9, %v1873_v30, %v1596_v48  ;;  %v1778_v18 = vsel %vm1757_vm5, %v1745_v35, %v8339_v19  ;;  %v8340_v46 = vld [vmem:[#allocation144_spill] sm:$0xff]  ;;  %v4787_v48 = vld [vmem:[#allocation2 + $0xf8] sm:$0xff] }
 0x27c   : > { %4654 = vmatmul.mubr.msk.f32.gmra.mrb[14].mxu0 %vm1934_vm10, %v1905_v33  ;;  %v1843_v53 = vsel %vm1823_vm7, %v1810_v63, %v8340_v46  ;;  %v1811_v41 = vsel %vm1790_vm6, %v1778_v18, %v8341_v45  ;;  %v1680_v5 = vsel %vm225_vm0, %v4787_v48, %v8343_v37  ;;  %v8362_v18 = vld [vmem:[#allocation125_spill] sm:$0xff]  ;;  %v8366_v37 = vld [vmem:[#allocation147_spill] sm:$0xff] }
 0x27d   : > { %4656 = vmatprep.mubr.msk.f32.mxu0 %vm1934_vm10, %v1906_v60  ;;  %v1844_v15 = vsel %vm1823_vm7, %v1811_v41, %v8342_v9  ;;  %v1713_v7 = vsel %vm1691_vm3, %v1680_v5, %v8344_v17  ;;  %v8363_v45 = vld [vmem:[#allocation37_spill] sm:$0xff]  ;;  %v8365_v9 = vld [vmem:[#allocation124_spill] sm:$0xff]  ;;  %v8367_v17 = vld [vmem:[#allocation54_spill] sm:$0xff] }
 0x27e   : > { %v1470_v8 = vpop.permute.xlu1 %1469  ;;  %v1472_v26 = vpop.permute.xlu0 %1471  ;;  %v1746_v52 = vsel %vm1724_vm4, %v1713_v7, %v8346_v21 }
 0x27f   : > { %v1874_v29 = vsel %vm1856_vm8, %v1841_v13, %v1470_v8  ;;  %v1875_v10 = vsel %vm1856_vm8, %v1842_v39, %v1472_v26  ;;  %v8345_v8 = vld [vmem:[#allocation44_spill] sm:$0xff]  ;;  %v1779_v36 = vsel %vm1757_vm5, %v1746_v52, %v8348_v27  ;;  %v8349_v26 = vld [vmem:[#allocation107_spill] sm:$0xff] }
 0x280   : > { %v1681_v34 = vsel %vm225_vm0, %v4788_v42, %v8345_v8  ;;  %v1812_v51 = vsel %vm1790_vm6, %v1779_v36, %v8350_v55  ;;  %v8368_v8 = vld [vmem:[#allocation91_spill] sm:$0xff] }
 0x281   : > { %v1714_v38 = vsel %vm1691_vm3, %v1681_v34, %v8347_v6  ;;  %v4792_v52 = vld [vmem:[#allocation2 + $0x138] sm:$0xff] }
 0x282   : > { %v1598_v61 = vpop.permute.xlu1 %1597  ;;  %v1600_v31 = vpop.permute.xlu0 %1599  ;;  %v1747_v14 = vsel %vm1724_vm4, %v1714_v38, %v8349_v26  ;;  %v8370_v38 = vld [vmem:[#allocation112_spill] sm:$0xff]  ;;  %v8371_v26 = vld [vmem:[#allocation90_spill] sm:$0xff]  ;;  %v8372_v55 = vld [vmem:[#allocation43_spill] sm:$0xff] }
 0x283   : > { %v1907_v58 = vsel %vm1889_vm9, %v1874_v29, %v1598_v61  ;;  %v1908_v32 = vsel %vm1889_vm9, %v1875_v10, %v1600_v31  ;;  %v1780_v44 = vsel %vm1757_vm5, %v1747_v14, %v8351_v22  ;;  %v8352_v29 = vld [vmem:[#allocation146_spill] sm:$0xff] }
 0x284   : > { %4657 = vmatmul.mubr.msk.f32.gmra.mrb[16].mxu0 %vm1934_vm10, %v1907_v58  ;;  %v1845_v61 = vsel %vm1823_vm7, %v1812_v51, %v8352_v29  ;;  %v1813_v39 = vsel %vm1790_vm6, %v1780_v44, %v8353_v40  ;;  %v4789_v31 = vld [vmem:[#allocation2 + $0x110] sm:$0xff]  ;;  %v8374_v44 = vld [vmem:[#allocation127_spill] sm:$0xff]  ;;  %v8375_v40 = vld [vmem:[#allocation41_spill] sm:$0xff] }
 0x285   : > { %4659 = vmatprep.mubr.msk.f32.mxu0 %vm1934_vm10, %v1908_v32  ;;  %v1846_v62 = vsel %vm1823_vm7, %v1813_v39, %v8354_v59  ;;  %v1682_v2 = vsel %vm225_vm0, %v4789_v31, %v8355_v23  ;;  %v8377_v59 = vld [vmem:[#allocation126_spill] sm:$0xff]  ;;  %v8378_v23 = vld [vmem:[#allocation149_spill] sm:$0xff] }
 0x286   : > { %v1474_v43 = vpop.permute.xlu1 %1473  ;;  %v1476_v28 = vpop.permute.xlu0 %1475  ;;  %v1715_v54 = vsel %vm1691_vm3, %v1682_v2, %v8356_v4  ;;  %v8379_v4 = vld [vmem:[#allocation58_spill] sm:$0xff] }
 0x287   : > { %v1876_v33 = vsel %vm1856_vm8, %v1843_v53, %v1474_v43  ;;  %v1877_v60 = vsel %vm1856_vm8, %v1844_v15, %v1476_v28  ;;  %v8357_v43 = vld [vmem:[#allocation48_spill] sm:$0xff]  ;;  %v1748_v24 = vsel %vm1724_vm4, %v1715_v54, %v8358_v57  ;;  %v8361_v28 = vld [vmem:[#allocation109_spill] sm:$0xff] }
 0x288   : > { %v1683_v3 = vsel %vm225_vm0, %v4790_v50, %v8357_v43  ;;  %v1781_v63 = vsel %vm1757_vm5, %v1748_v24, %v8360_v11  ;;  %v2412_v43 = vld [vmem:[#allocation3 + $0x9] sm:$0xff] }
 0x289   : > { %v1716_v35 = vsel %vm1691_vm3, %v1683_v3, %v8359_v56  ;;  %v1814_v46 = vsel %vm1790_vm6, %v1781_v63, %v8362_v18  ;;  %v8380_v3 = vld [vmem:[#allocation93_spill] sm:$0xff]  ;;  %2702 = vrot.lane.b32.xlu1 %v2412_v43, %s4812_s25  ;;  %v4794_v56 = vld [vmem:[#allocation2 + $0x150] sm:$0xff]  ;;  %v8383_v18 = vld [vmem:[#allocation92_spill] sm:$0xff] }
 0x28a   : > { %v1602_v16 = vpop.permute.xlu1 %1601  ;;  %v1604_v20 = vpop.permute.xlu0 %1603  ;;  %v1749_v19 = vsel %vm1724_vm4, %v1716_v35, %v8361_v28  ;;  %v8381_v35 = vld [vmem:[#allocation56_spill] sm:$0xff]  ;;  %v8382_v63 = vld [vmem:[#allocation114_spill] sm:$0xff] }
 0x28b   : > { %v1909_v30 = vsel %vm1889_vm9, %v1876_v33, %v1602_v16  ;;  %v1910_v25 = vsel %vm1889_vm9, %v1877_v60, %v1604_v20  ;;  %v1782_v41 = vsel %vm1757_vm5, %v1749_v19, %v8363_v45  ;;  %v8364_v33 = vld [vmem:[#allocation148_spill] sm:$0xff]  ;;  %v4791_v20 = vld [vmem:[#allocation2 + $0x128] sm:$0xff]  ;;  %v1687_v11 = vsel %vm225_vm0, %v4794_v56, %v8381_v35 }
 0x28c   : > { %4660 = vmatmul.mubr.msk.f32.gmra.mrb[18].mxu0 %vm1934_vm10, %v1909_v30  ;;  %v1847_v16 = vsel %vm1823_vm7, %v1814_v46, %v8364_v33  ;;  %v1815_v15 = vsel %vm1790_vm6, %v1782_v41, %v8365_v9  ;;  %v1684_v7 = vsel %vm225_vm0, %v4791_v20, %v8367_v17  ;;  %v1720_v46 = vsel %vm1691_vm3, %v1687_v11, %v8383_v18  ;;  %v8385_v41 = vld [vmem:[#allocation113_spill] sm:$0xff]  ;;  %v8404_v35 = vld [vmem:[#allocation96_spill] sm:$0xff] }
 0x28d   : > { %4662 = vmatprep.mubr.msk.f32.mxu0 %vm1934_vm10, %v1910_v25  ;;  %v1848_v5 = vsel %vm1823_vm7, %v1815_v15, %v8366_v37  ;;  %v1717_v34 = vsel %vm1691_vm3, %v1684_v7, %v8368_v8  ;;  %v1753_v33 = vsel %vm1724_vm4, %v1720_v46, %v8385_v41  ;;  %v8388_v37 = vld [vmem:[#allocation152_spill] sm:$0xff]  ;;  %v8406_v46 = vld [vmem:[#allocation53_spill] sm:$0xff] }
 0x28e   : > { %v1478_v1 = vpop.permute.xlu1 %1477  ;;  %v1480_v13 = vpop.permute.xlu0 %1479  ;;  %v1750_v27 = vsel %vm1724_vm4, %v1717_v34, %v8370_v38  ;;  %v4795_v34 = vld [vmem:[#allocation2 + $0x158] sm:$0xff] }
 0x28f   : > { %v1878_v58 = vsel %vm1856_vm8, %v1845_v61, %v1478_v1  ;;  %v1879_v32 = vsel %vm1856_vm8, %v1846_v62, %v1480_v13  ;;  %v8369_v1 = vld [vmem:[#allocation52_spill] sm:$0xff]  ;;  %v1783_v51 = vsel %vm1757_vm5, %v1750_v27, %v8372_v55  ;;  %v8373_v13 = vld [vmem:[#allocation111_spill] sm:$0xff] }
 0x290   : > { %v1685_v6 = vsel %vm225_vm0, %v4792_v52, %v8369_v1  ;;  %v1816_v29 = vsel %vm1790_vm6, %v1783_v51, %v8374_v44  ;;  %v8392_v38 = vld [vmem:[#allocation95_spill] sm:$0xff]  ;;  %v8394_v51 = vld [vmem:[#allocation116_spill] sm:$0xff]  ;;  %v8395_v44 = vld [vmem:[#allocation94_spill] sm:$0xff] }
 0x291   : > { %v1718_v14 = vsel %vm1691_vm3, %v1685_v6, %v8371_v26  ;;  %v4796_v26 = vld [vmem:[#allocation2 + $0x168] sm:$0xff] }
 0x292   : > { %v1606_v49 = vpop.permute.xlu1 %1605  ;;  %v1608_v12 = vpop.permute.xlu0 %1607  ;;  %v1751_v22 = vsel %vm1724_vm4, %v1718_v14, %v8373_v13  ;;  %v8393_v14 = vld [vmem:[#allocation60_spill] sm:$0xff] }
 0x293   : > { %v1911_v10 = vsel %vm1889_vm9, %v1878_v58, %v1606_v49  ;;  %v1912_v47 = vsel %vm1889_vm9, %v1879_v32, %v1608_v12  ;;  %v1784_v39 = vsel %vm1757_vm5, %v1751_v22, %v8375_v40  ;;  %v8376_v58 = vld [vmem:[#allocation150_spill] sm:$0xff]  ;;  %v4793_v12 = vld [vmem:[#allocation2 + $0x140] sm:$0xff]  ;;  %v1689_v55 = vsel %vm225_vm0, %v4796_v26, %v8393_v14 }
 0x294   : > { %4663 = vmatmul.mubr.msk.f32.gmra.mrb[20].mxu0 %vm1934_vm10, %v1911_v10  ;;  %v1849_v49 = vsel %vm1823_vm7, %v1816_v29, %v8376_v58  ;;  %v1817_v62 = vsel %vm1790_vm6, %v1784_v39, %v8377_v59  ;;  %v1686_v54 = vsel %vm225_vm0, %v4793_v12, %v8379_v4  ;;  %v1722_v29 = vsel %vm1691_vm3, %v1689_v55, %v8395_v44  ;;  %v8397_v39 = vld [vmem:[#allocation115_spill] sm:$0xff] }
 0x295   : > { %4665 = vmatprep.mubr.msk.f32.mxu0 %vm1934_vm10, %v1912_v47  ;;  %v1850_v2 = vsel %vm1823_vm7, %v1817_v62, %v8378_v23  ;;  %v1719_v57 = vsel %vm1691_vm3, %v1686_v54, %v8380_v3  ;;  %v1755_v58 = vsel %vm1724_vm4, %v1722_v29, %v8397_v39  ;;  %v8400_v23 = vld [vmem:[#allocation154_spill] sm:$0xff] }
 0x296   : > { %v1482_v0 = vpop.permute.xlu1 %1481  ;;  %v1484_v53 = vpop.permute.xlu0 %1483  ;;  %v1752_v28 = vsel %vm1724_vm4, %v1719_v57, %v8382_v63  ;;  %v4797_v3 = vld [vmem:[#allocation2 + $0x170] sm:$0xff] }
 0x297   : > { %v1880_v30 = vsel %vm1856_vm8, %v1847_v16, %v1482_v0  ;;  %v1881_v25 = vsel %vm1856_vm8, %v1848_v5, %v1484_v53  ;;  %v2411_v0 = vld [vmem:[#allocation3 + $0x1] sm:$0xff]  ;;  %v8386_v16 = vld [vmem:[#allocation129_spill] sm:$0xff] }
 0x298   : > { %2700 = vrot.lane.b32.xlu0 %v2411_v0, %s4812_s25  ;;  %v8384_v53 = vld [vmem:[#allocation47_spill] sm:$0xff]  ;;  %v8403_v57 = vld [vmem:[#allocation66_spill] sm:$0xff] }
 0x299   : > { %v1785_v45 = vsel %vm1757_vm5, %v1752_v28, %v8384_v53  ;;  %v8405_v28 = vld [vmem:[#allocation117_spill] sm:$0xff] }
 0x29a   : > { %v1610_v48 = vpop.permute.xlu1 %1609  ;;  %v1612_v42 = vpop.permute.xlu0 %1611  ;;  %v1818_v9 = vsel %vm1790_vm6, %v1785_v45, %v8386_v16  ;;  %v8407_v45 = vld [vmem:[#allocation132_spill] sm:$0xff] }
 0x29b   : > { %v1913_v60 = vsel %vm1889_vm9, %v1880_v30, %v1610_v48  ;;  %v1914_v21 = vsel %vm1889_vm9, %v1881_v25, %v1612_v42  ;;  %v8387_v30 = vld [vmem:[#allocation45_spill] sm:$0xff]  ;;  %v1851_v5 = vsel %vm1823_vm7, %v1818_v9, %v8388_v37  ;;  %v8390_v25 = vld [vmem:[#allocation151_spill] sm:$0xff] }
 0x29c   : > { %4666 = vmatmul.mubr.msk.f32.gmra.mrb[22].mxu0 %vm1934_vm10, %v1913_v60  ;;  %v1786_v48 = vsel %vm1757_vm5, %v1753_v33, %v8387_v30  ;;  %v8389_v60 = vld [vmem:[#allocation128_spill] sm:$0xff]  ;;  %v8408_v33 = vld [vmem:[#allocation155_spill] sm:$0xff] }
 0x29d   : > { %4668 = vmatprep.mubr.msk.f32.mxu0 %vm1934_vm10, %v1914_v21  ;;  %v1819_v20 = vsel %vm1790_vm6, %v1786_v48, %v8389_v60  ;;  %v8391_v21 = vld [vmem:[#allocation62_spill] sm:$0xff]  ;;  %v6685_v48 = vld [vmem:[%s7999_s2] ss:$0 sm:$0xff] }
 0x29e   : > { %v1486_v36 = vpop.permute.xlu1 %1485  ;;  %v1488_v61 = vpop.permute.xlu0 %1487  ;;  %v1852_v42 = vsel %vm1823_vm7, %v1819_v20, %v8390_v25  ;;  %v1688_v52 = vsel %vm225_vm0, %v4795_v34, %v8391_v21 }
 0x29f   : > { %v1882_v10 = vsel %vm1856_vm8, %v1849_v49, %v1486_v36  ;;  %v1883_v47 = vsel %vm1856_vm8, %v1850_v2, %v1488_v61  ;;  %v1721_v27 = vsel %vm1691_vm3, %v1688_v52, %v8392_v38  ;;  %v8396_v61 = vld [vmem:[#allocation51_spill] sm:$0xff] }
 0x2a0   : > { %v1754_v13 = vsel %vm1724_vm4, %v1721_v27, %v8394_v51  ;;  %v8398_v49 = vld [vmem:[#allocation131_spill] sm:$0xff] }
 0x2a1   : > { %v1787_v40 = vsel %vm1757_vm5, %v1754_v13, %v8396_v61 }
 0x2a2   : > { %v1614_v31 = vpop.permute.xlu1 %1613  ;;  %v1616_v50 = vpop.permute.xlu0 %1615  ;;  %v1820_v59 = vsel %vm1790_vm6, %v1787_v40, %v8398_v49 }
 0x2a3   : > { %v1915_v32 = vsel %vm1889_vm9, %v1882_v10, %v1614_v31  ;;  %v1916_v24 = vsel %vm1889_vm9, %v1883_v47, %v1616_v50  ;;  %v8399_v10 = vld [vmem:[#allocation49_spill] sm:$0xff]  ;;  %v1853_v2 = vsel %vm1823_vm7, %v1820_v59, %v8400_v23 }
 0x2a4   : > { %4669 = vmatmul.mubr.msk.f32.gmra.mrb[24].mxu0 %vm1934_vm10, %v1915_v32  ;;  %v1788_v31 = vsel %vm1757_vm5, %v1755_v58, %v8399_v10  ;;  %v8401_v32 = vld [vmem:[#allocation130_spill] sm:$0xff]  ;;  %v8402_v47 = vld [vmem:[#allocation153_spill] sm:$0xff] }
 0x2a5   : > { %4671 = vmatprep.mubr.msk.f32.mxu0 %vm1934_vm10, %v1916_v24  ;;  %v1821_v12 = vsel %vm1790_vm6, %v1788_v31, %v8401_v32  ;;  %v1690_v24 = vsel %vm225_vm0, %v4797_v3, %v8403_v57 }
 0x2a6   : > { %v1490_v19 = vpop.permute.xlu1 %1489  ;;  %v1492_v15 = vpop.permute.xlu0 %1491  ;;  %v1854_v50 = vsel %vm1823_vm7, %v1821_v12, %v8402_v47  ;;  %v1723_v11 = vsel %vm1691_vm3, %v1690_v24, %v8404_v35 }
 0x2a7   : > { %v1884_v17 = vsel %vm1856_vm8, %v1851_v5, %v1490_v19  ;;  %v1885_v1 = vsel %vm1856_vm8, %v1852_v42, %v1492_v15  ;;  %v1756_v19 = vsel %vm1724_vm4, %v1723_v11, %v8405_v28 }
 0x2a8   : > { %v1789_v53 = vsel %vm1757_vm5, %v1756_v19, %v8406_v46 }
 0x2a9   : > { %v1822_v41 = vsel %vm1790_vm6, %v1789_v53, %v8407_v45 }
 0x2aa   : > { %v1618_v7 = vpop.permute.xlu1 %1617  ;;  %v1620_v6 = vpop.permute.xlu0 %1619  ;;  %v1855_v16 = vsel %vm1823_vm7, %v1822_v41, %v8408_v33 }
 0x2ab   : > { %v1917_v8 = vsel %vm1889_vm9, %v1884_v17, %v1618_v7  ;;  %v1918_v36 = vsel %vm1889_vm9, %v1885_v1, %v1620_v6 }
 0x2ac   : > { %4672 = vmatmul.mubr.msk.f32.gmra.mrb[26].mxu0 %vm1934_vm10, %v1917_v8 }
 0x2ad   : > { %4674 = vmatprep.mubr.msk.f32.mxu0 %vm1934_vm10, %v1918_v36 }
 0x2ae   : > { %v1494_v22 = vpop.permute.xlu1 %1493  ;;  %v1496_v62 = vpop.permute.xlu0 %1495 }
 0x2af   : > { %v1886_v4 = vsel %vm1856_vm8, %v1853_v2, %v1494_v22  ;;  %v1887_v0 = vsel %vm1856_vm8, %v1854_v50, %v1496_v62 }
 0x2b2   : > { %v1622_v54 = vpop.permute.xlu1 %1621  ;;  %v1624_v56 = vpop.permute.xlu0 %1623 }
 0x2b3   : > { %v1919_v43 = vsel %vm1889_vm9, %v1886_v4, %v1622_v54  ;;  %v1920_v63 = vsel %vm1889_vm9, %v1887_v0, %v1624_v56 }
 0x2b4   : > { %4675 = vmatmul.mubr.msk.f32.gmra.mrb[28].mxu0 %vm1934_vm10, %v1919_v43 }
 0x2b5   : > { %4677 = vmatprep.mubr.msk.f32.mxu0 %vm1934_vm10, %v1920_v63 }
 0x2b6   : > { %v1498_v18 = vpop.permute.xlu1 %1497 }
 0x2b7   : > { %v1888_v9 = vsel %vm1856_vm8, %v1855_v16, %v1498_v18 }
 0x2ba   : > { %v1626_v15 = vpop.permute.xlu1 %1625 }
 0x2bb   : > { %v1921_v30 = vsel %vm1889_vm9, %v1888_v9, %v1626_v15 }
 0x2bc   : > { %4678 = vmatmul.mubr.msk.f32.gmra.mrb[30].mxu0 %vm1934_vm10, %v1921_v30 }
 0x31c   : > { %v4634_v37 = vpop.f32.mrb[0].mxu0 }
 0x31d   : > { %v2107_v5 = vadd.f32 %v4634_v37, %v6685_v48  ;;  %v2101_v60 = vpop.f32.mrb[1].mxu0 }
 0x31e   : > { %v2102_v20 = vadd.f32 %v6685_v48, %v2101_v60 }
 0x31f   : > { %v2261_v17 = vmax.f32 %v2107_v5, 0.0 }
 0x320   : > { %v2260_v7 = vmax.f32 %v2102_v20, 0.0  ;;  %v4637_v25 = vpop.f32.mrb[2].mxu0 }
 0x321   : > { %2348 = vst.msk [vmem:[#allocation3 + $0x21] sm:$0xff] %vm225_vm0, %v2261_v17  ;;  %v2117_v42 = vadd.f32 %v4637_v25, %v6685_v48  ;;  %v2111_v8 = vpop.f32.mrb[3].mxu0 }
 0x322   : > { %2347 = vst.msk [vmem:[#allocation3 + $0x19] sm:$0xff] %vm225_vm0, %v2260_v7  ;;  %v2112_v34 = vadd.f32 %v6685_v48, %v2111_v8 }
 0x323   : > { %v2263_v21 = vmax.f32 %v2117_v42, 0.0 }
 0x324   : > { %v2262_v52 = vmax.f32 %v2112_v34, 0.0 }
 0x325   : > { %2350 = vst.msk [vmem:[#allocation3 + $0x39] sm:$0xff] %vm225_vm0, %v2263_v21 }
 0x326   : > { %2349 = vst.msk [vmem:[#allocation3 + $0x31] sm:$0xff] %vm225_vm0, %v2262_v52 }
 0x327   : > { %v4640_v1 = vpop.f32.mrb[4].mxu0 }
 0x328   : > { %v2127_v6 = vadd.f32 %v4640_v1, %v6685_v48  ;;  %v2121_v38 = vpop.f32.mrb[5].mxu0  ;;  %v6696_v27 = vld [vmem:[#allocation3 + $0x21] sm:$0xff] }
 0x329   : > { %v2122_v36 = vadd.f32 %v6685_v48, %v2121_v38  ;;  %2706 = vrot.lane.b32.xlu1 %v6696_v27, %s4812_s25  ;;  %v6701_v26 = vld [vmem:[#allocation3 + $0x19] sm:$0xff] }
 0x32a   : > { %v2265_v14 = vmax.f32 %v2127_v6, 0.0  ;;  %2704 = vrot.lane.b32.xlu0 %v6701_v26, %s4812_s25 }
 0x32b   : > { %v2264_v55 = vmax.f32 %v2122_v36, 0.0 }
 0x32c   : > { %2352 = vst.msk [vmem:[#allocation3 + $0x51] sm:$0xff] %vm225_vm0, %v2265_v14  ;;  %v6706_v51 = vld [vmem:[#allocation3 + $0x39] sm:$0xff] }
 0x32d   : > { %2351 = vst.msk [vmem:[#allocation3 + $0x49] sm:$0xff] %vm225_vm0, %v2264_v55  ;;  %2710 = vrot.lane.b32.xlu1 %v6706_v51, %s4812_s25  ;;  %v6711_v13 = vld [vmem:[#allocation3 + $0x31] sm:$0xff] }
 0x32e   : > { %2708 = vrot.lane.b32.xlu0 %v6711_v13, %s4812_s25 }
 0x32f   : > { %v4643_v22 = vpop.f32.mrb[6].mxu0 }
 0x330   : > { %v2137_v44 = vadd.f32 %v4643_v22, %v6685_v48  ;;  %v2131_v29 = vpop.f32.mrb[7].mxu0 }
 0x331   : > { %v2132_v61 = vadd.f32 %v6685_v48, %v2131_v29 }
 0x332   : > { %v2267_v40 = vmax.f32 %v2137_v44, 0.0 }
 0x333   : > { %v2266_v39 = vmax.f32 %v2132_v61, 0.0  ;;  %v6717_v58 = vld [vmem:[#allocation3 + $0x51] sm:$0xff] }
 0x334   : > { %2354 = vst.msk [vmem:[#allocation3 + $0x69] sm:$0xff] %vm225_vm0, %v2267_v40  ;;  %2714 = vrot.lane.b32.xlu1 %v6717_v58, %s4812_s25  ;;  %v6722_v49 = vld [vmem:[#allocation3 + $0x49] sm:$0xff] }
 0x335   : > { %2353 = vst.msk [vmem:[#allocation3 + $0x61] sm:$0xff] %vm225_vm0, %v2266_v39  ;;  %2712 = vrot.lane.b32.xlu0 %v6722_v49, %s4812_s25 }
 0x337   : > { %v4646_v59 = vpop.f32.mrb[8].mxu0 }
 0x338   : > { %v2147_v62 = vadd.f32 %v4646_v59, %v6685_v48  ;;  %v2141_v10 = vpop.f32.mrb[9].mxu0 }
 0x339   : > { %v2142_v31 = vadd.f32 %v6685_v48, %v2141_v10 }
 0x33a   : > { %v2269_v23 = vmax.f32 %v2147_v62, 0.0 }
 0x33b   : > { %v2268_v2 = vmax.f32 %v2142_v31, 0.0  ;;  %v6729_v32 = vld [vmem:[#allocation3 + $0x69] sm:$0xff] }
 0x33c   : > { %2356 = vst.msk [vmem:[#allocation3 + $0x81] sm:$0xff] %vm225_vm0, %v2269_v23  ;;  %2718 = vrot.lane.b32.xlu1 %v6729_v32, %s4812_s25  ;;  %v6734_v12 = vld [vmem:[#allocation3 + $0x61] sm:$0xff] }
 0x33d   : > { %2355 = vst.msk [vmem:[#allocation3 + $0x79] sm:$0xff] %vm225_vm0, %v2268_v2  ;;  %2716 = vrot.lane.b32.xlu0 %v6734_v12, %s4812_s25 }
 0x33f   : > { %v4649_v4 = vpop.f32.mrb[10].mxu0 }
 0x340   : > { %v2157_v54 = vadd.f32 %v4649_v4, %v6685_v48  ;;  %v2151_v47 = vpop.f32.mrb[11].mxu0 }
 0x341   : > { %v2152_v50 = vadd.f32 %v6685_v48, %v2151_v47 }
 0x342   : > { %v2271_v43 = vmax.f32 %v2157_v54, 0.0 }
 0x343   : > { %v2270_v3 = vmax.f32 %v2152_v50, 0.0  ;;  %v6741_v57 = vld [vmem:[#allocation3 + $0x81] sm:$0xff] }
 0x344   : > { %2358 = vst.msk [vmem:[#allocation3 + $0x99] sm:$0xff] %vm225_vm0, %v2271_v43  ;;  %2722 = vrot.lane.b32.xlu1 %v6741_v57, %s4812_s25  ;;  %v6746_v24 = vld [vmem:[#allocation3 + $0x79] sm:$0xff] }
 0x345   : > { %2357 = vst.msk [vmem:[#allocation3 + $0x91] sm:$0xff] %vm225_vm0, %v2270_v3  ;;  %2720 = vrot.lane.b32.xlu0 %v6746_v24, %s4812_s25 }
 0x347   : > { %v4652_v0 = vpop.f32.mrb[12].mxu0 }
 0x348   : > { %v2167_v56 = vadd.f32 %v4652_v0, %v6685_v48  ;;  %v2161_v35 = vpop.f32.mrb[13].mxu0 }
 0x349   : > { %v2162_v11 = vadd.f32 %v6685_v48, %v2161_v35 }
 0x34a   : > { %v2273_v63 = vmax.f32 %v2167_v56, 0.0 }
 0x34b   : > { %v2272_v28 = vmax.f32 %v2162_v11, 0.0  ;;  %v6753_v19 = vld [vmem:[#allocation3 + $0x99] sm:$0xff] }
 0x34c   : > { %2360 = vst.msk [vmem:[#allocation3 + $0xb1] sm:$0xff] %vm225_vm0, %v2273_v63  ;;  %2726 = vrot.lane.b32.xlu1 %v6753_v19, %s4812_s25  ;;  %v6758_v18 = vld [vmem:[#allocation3 + $0x91] sm:$0xff] }
 0x34d   : > { %2359 = vst.msk [vmem:[#allocation3 + $0xa9] sm:$0xff] %vm225_vm0, %v2272_v28  ;;  %2724 = vrot.lane.b32.xlu0 %v6758_v18, %s4812_s25 }
 0x34f   : > { %v4655_v46 = vpop.f32.mrb[14].mxu0 }
 0x350   : > { %v2177_v53 = vadd.f32 %v4655_v46, %v6685_v48  ;;  %v2171_v45 = vpop.f32.mrb[15].mxu0 }
 0x351   : > { %v2172_v41 = vadd.f32 %v6685_v48, %v2171_v45 }
 0x352   : > { %v2275_v33 = vmax.f32 %v2177_v53, 0.0 }
 0x353   : > { %v2274_v16 = vmax.f32 %v2172_v41, 0.0  ;;  %v2426_v9 = vld [vmem:[#allocation3 + $0xb1] sm:$0xff] }
 0x354   : > { %2362 = vst.msk [vmem:[#allocation3 + $0xc9] sm:$0xff] %vm225_vm0, %v2275_v33  ;;  %2730 = vrot.lane.b32.xlu1 %v2426_v9, %s4812_s25  ;;  %v2425_v15 = vld [vmem:[#allocation3 + $0xa9] sm:$0xff] }
 0x355   : > { %2361 = vst.msk [vmem:[#allocation3 + $0xc1] sm:$0xff] %vm225_vm0, %v2274_v16  ;;  %2728 = vrot.lane.b32.xlu0 %v2425_v15, %s4812_s25 }
 0x357   : > { %v4658_v30 = vpop.f32.mrb[16].mxu0 }
 0x358   : > { %v2187_v37 = vadd.f32 %v4658_v30, %v6685_v48  ;;  %v2181_v5 = vpop.f32.mrb[17].mxu0 }
 0x359   : > { %v2182_v60 = vadd.f32 %v6685_v48, %v2181_v5 }
 0x35a   : > { %v2277_v20 = vmax.f32 %v2187_v37, 0.0 }
 0x35b   : > { %v2276_v17 = vmax.f32 %v2182_v60, 0.0  ;;  %v2428_v7 = vld [vmem:[#allocation3 + $0xc9] sm:$0xff] }
 0x35c   : > { %2364 = vst.msk [vmem:[#allocation3 + $0xe1] sm:$0xff] %vm225_vm0, %v2277_v20  ;;  %2734 = vrot.lane.b32.xlu1 %v2428_v7, %s4812_s25  ;;  %v2427_v25 = vld [vmem:[#allocation3 + $0xc1] sm:$0xff] }
 0x35d   : > { %2363 = vst.msk [vmem:[#allocation3 + $0xd9] sm:$0xff] %vm225_vm0, %v2276_v17  ;;  %2732 = vrot.lane.b32.xlu0 %v2427_v25, %s4812_s25 }
 0x35f   : > { %v4661_v42 = vpop.f32.mrb[18].mxu0 }
 0x360   : > { %v2197_v8 = vadd.f32 %v4661_v42, %v6685_v48  ;;  %v2191_v34 = vpop.f32.mrb[19].mxu0 }
 0x361   : > { %v2192_v21 = vadd.f32 %v6685_v48, %v2191_v34 }
 0x362   : > { %v2279_v52 = vmax.f32 %v2197_v8, 0.0 }
 0x363   : > { %v2278_v1 = vmax.f32 %v2192_v21, 0.0  ;;  %v2430_v6 = vld [vmem:[#allocation3 + $0xe1] sm:$0xff] }
 0x364   : > { %2366 = vst.msk [vmem:[#allocation3 + $0xf9] sm:$0xff] %vm225_vm0, %v2279_v52  ;;  %2738 = vrot.lane.b32.xlu1 %v2430_v6, %s4812_s25  ;;  %v2429_v38 = vld [vmem:[#allocation3 + $0xd9] sm:$0xff]  ;;  %v2443_v6 = vld [vmem:[#allocation3 + $0x2] sm:$0xff] }
 0x365   : > { %2365 = vst.msk [vmem:[#allocation3 + $0xf1] sm:$0xff] %vm225_vm0, %v2278_v1  ;;  %2736 = vrot.lane.b32.xlu0 %v2429_v38, %s4812_s25  ;;  %v2444_v1 = vld [vmem:[#allocation3 + $0xa] sm:$0xff]  ;;  %v6819_v38 = vld [vmem:[#allocation3 + $0x22] sm:$0xff] }
 0x367   : > { %v4664_v36 = vpop.f32.mrb[20].mxu0 }
 0x368   : > { %v2207_v14 = vadd.f32 %v4664_v36, %v6685_v48  ;;  %v2201_v55 = vpop.f32.mrb[21].mxu0  ;;  %v6827_v36 = vld [vmem:[#allocation3 + $0x3a] sm:$0xff] }
 0x369   : > { %v2202_v22 = vadd.f32 %v6685_v48, %v2201_v55  ;;  %v6835_v55 = vld [vmem:[#allocation3 + $0x52] sm:$0xff] }
 0x36a   : > { %v2281_v44 = vmax.f32 %v2207_v14, 0.0  ;;  %v6831_v14 = vld [vmem:[#allocation3 + $0x32] sm:$0xff] }
 0x36b   : > { %v2280_v29 = vmax.f32 %v2202_v22, 0.0  ;;  %v2432_v61 = vld [vmem:[#allocation3 + $0xf9] sm:$0xff]  ;;  %v6839_v22 = vld [vmem:[#allocation3 + $0x4a] sm:$0xff] }
 0x36c   : > { %2368 = vst.msk [vmem:[#allocation3 + $0x111] sm:$0xff] %vm225_vm0, %v2281_v44  ;;  %2742 = vrot.lane.b32.xlu1 %v2432_v61, %s4812_s25  ;;  %v2431_v40 = vld [vmem:[#allocation3 + $0xf1] sm:$0xff]  ;;  %v6851_v61 = vld [vmem:[#allocation3 + $0x82] sm:$0xff] }
 0x36d   : > { %2367 = vst.msk [vmem:[#allocation3 + $0x109] sm:$0xff] %vm225_vm0, %v2280_v29  ;;  %2740 = vrot.lane.b32.xlu0 %v2431_v40, %s4812_s25  ;;  %v6843_v44 = vld [vmem:[#allocation3 + $0x6a] sm:$0xff]  ;;  %v6847_v29 = vld [vmem:[#allocation3 + $0x62] sm:$0xff]  ;;  %v6855_v40 = vld [vmem:[#allocation3 + $0x7a] sm:$0xff] }
 0x36f   : > { %v4667_v39 = vpop.f32.mrb[22].mxu0 }
 0x370   : > { %v2217_v59 = vadd.f32 %v4667_v39, %v6685_v48  ;;  %v2211_v62 = vpop.f32.mrb[23].mxu0  ;;  %v6859_v39 = vld [vmem:[#allocation3 + $0x9a] sm:$0xff] }
 0x371   : > { %v2212_v10 = vadd.f32 %v6685_v48, %v2211_v62  ;;  %v6867_v62 = vld [vmem:[#allocation3 + $0xb2] sm:$0xff] }
 0x372   : > { %v2283_v31 = vmax.f32 %v2217_v59, 0.0  ;;  %v6863_v59 = vld [vmem:[#allocation3 + $0x92] sm:$0xff] }
 0x373   : > { %v2282_v23 = vmax.f32 %v2212_v10, 0.0  ;;  %v2434_v2 = vld [vmem:[#allocation3 + $0x111] sm:$0xff] }
 0x374   : > { %2370 = vst.msk [vmem:[#allocation3 + $0x129] sm:$0xff] %vm225_vm0, %v2283_v31  ;;  %2746 = vrot.lane.b32.xlu1 %v2434_v2, %s4812_s25  ;;  %v2433_v4 = vld [vmem:[#allocation3 + $0x109] sm:$0xff] }
 0x375   : > { %2369 = vst.msk [vmem:[#allocation3 + $0x121] sm:$0xff] %vm225_vm0, %v2282_v23  ;;  %2744 = vrot.lane.b32.xlu0 %v2433_v4, %s4812_s25  ;;  %v6871_v10 = vld [vmem:[#allocation3 + $0xaa] sm:$0xff]  ;;  %v6879_v23 = vld [vmem:[#allocation3 + $0xc2] sm:$0xff]  ;;  %v6887_v4 = vld [vmem:[#allocation3 + $0xda] sm:$0xff] }
 0x376   : > { %v6875_v31 = vld [vmem:[#allocation3 + $0xca] sm:$0xff]  ;;  %v6883_v2 = vld [vmem:[#allocation3 + $0xe2] sm:$0xff] }
 0x377   : > { %v4670_v54 = vpop.f32.mrb[24].mxu0 }
 0x378   : > { %v2227_v47 = vadd.f32 %v4670_v54, %v6685_v48  ;;  %v2221_v50 = vpop.f32.mrb[25].mxu0  ;;  %v6891_v54 = vld [vmem:[#allocation3 + $0xfa] sm:$0xff] }
 0x379   : > { %v2222_v43 = vadd.f32 %v6685_v48, %v2221_v50  ;;  %8409 = vst [vmem:[#allocation4_spill] sm:$0xff] %v6891_v54  ;;  %v2466_v50 = vld [vmem:[#allocation3 + $0x112] sm:$0xff] }
 0x37a   : > { %v2285_v3 = vmax.f32 %v2227_v47, 0.0  ;;  %v6895_v47 = vld [vmem:[#allocation3 + $0xf2] sm:$0xff] }
 0x37b   : > { %v2284_v0 = vmax.f32 %v2222_v43, 0.0  ;;  %v2436_v56 = vld [vmem:[#allocation3 + $0x129] sm:$0xff] }
 0x37c   : > { %2372 = vst.msk [vmem:[#allocation3 + $0x141] sm:$0xff] %vm225_vm0, %v2285_v3  ;;  %2750 = vrot.lane.b32.xlu1 %v2436_v56, %s4812_s25  ;;  %v2435_v35 = vld [vmem:[#allocation3 + $0x121] sm:$0xff]  ;;  %v2465_v43 = vld [vmem:[#allocation3 + $0x10a] sm:$0xff]  ;;  %v6901_v3 = vpop.permute.xlu1 %2702 }
 0x37d   : > { %2371 = vst.msk [vmem:[#allocation3 + $0x139] sm:$0xff] %vm225_vm0, %v2284_v0  ;;  %2748 = vrot.lane.b32.xlu0 %v2435_v35, %s4812_s25  ;;  %v6903_v0 = vpop.permute.xlu0 %2700  ;;  %v2468_v56 = vld [vmem:[#allocation3 + $0x12a] sm:$0xff]  ;;  %v2467_v35 = vld [vmem:[#allocation3 + $0x122] sm:$0xff] }
 0x37f   : > { %v4673_v11 = vpop.f32.mrb[26].mxu0 }
 0x380   : > { %v2237_v63 = vadd.f32 %v4673_v11, %v6685_v48  ;;  %v2231_v28 = vpop.f32.mrb[27].mxu0 }
 0x381   : > { %v2232_v46 = vadd.f32 %v6685_v48, %v2231_v28 }
 0x382   : > { %v2287_v53 = vmax.f32 %v2237_v63, 0.0 }
 0x383   : > { %v2286_v45 = vmax.f32 %v2232_v46, 0.0  ;;  %v2438_v41 = vld [vmem:[#allocation3 + $0x141] sm:$0xff] }
 0x384   : > { %2374 = vst.msk [vmem:[#allocation3 + $0x159] sm:$0xff] %vm225_vm0, %v2287_v53  ;;  %2754 = vrot.lane.b32.xlu1 %v2438_v41, %s4812_s25  ;;  %v2437_v33 = vld [vmem:[#allocation3 + $0x139] sm:$0xff]  ;;  %v2470_v11 = vld [vmem:[#allocation3 + $0x142] sm:$0xff] }
 0x385   : > { %2373 = vst.msk [vmem:[#allocation3 + $0x151] sm:$0xff] %vm225_vm0, %v2286_v45  ;;  %2752 = vrot.lane.b32.xlu0 %v2437_v33, %s4812_s25  ;;  %v2469_v28 = vld [vmem:[#allocation3 + $0x13a] sm:$0xff] }
 0x387   : > { %v4676_v16 = vpop.f32.mrb[28].mxu0 }
 0x388   : > { %v2247_v9 = vadd.f32 %v4676_v16, %v6685_v48  ;;  %v2241_v15 = vpop.f32.mrb[29].mxu0 }
 0x389   : > { %v2242_v30 = vadd.f32 %v6685_v48, %v2241_v15 }
 0x38a   : > { %v2289_v37 = vmax.f32 %v2247_v9, 0.0 }
 0x38b   : > { %v2288_v5 = vmax.f32 %v2242_v30, 0.0  ;;  %v2440_v60 = vld [vmem:[#allocation3 + $0x159] sm:$0xff] }
 0x38c   : > { %2376 = vst.msk [vmem:[#allocation3 + $0x171] sm:$0xff] %vm225_vm0, %v2289_v37  ;;  %2758 = vrot.lane.b32.xlu1 %v2440_v60, %s4812_s25  ;;  %v2439_v20 = vld [vmem:[#allocation3 + $0x151] sm:$0xff]  ;;  %v2472_v53 = vld [vmem:[#allocation3 + $0x15a] sm:$0xff] }
 0x38d   : > { %2375 = vst.msk [vmem:[#allocation3 + $0x169] sm:$0xff] %vm225_vm0, %v2288_v5  ;;  %2756 = vrot.lane.b32.xlu0 %v2439_v20, %s4812_s25  ;;  %v2471_v45 = vld [vmem:[#allocation3 + $0x152] sm:$0xff]  ;;  %v6923_v30 = vld [vmem:[#allocation3 + $0x20] sm:$0xff] }
 0x38e   : > { %v6927_v5 = vld [vmem:[#allocation3 + $0x18] sm:$0xff] }
 0x38f   : > { %v4679_v17 = vpop.f32.mrb[30].mxu0  ;;  %v6935_v20 = vld [vmem:[#allocation3 + $0x38] sm:$0xff] }
 0x390   : > { %v2257_v7 = vadd.f32 %v4679_v17, %v6685_v48  ;;  %v2251_v25 = vpop.f32.mrb[31].mxu0 }
 0x391   : > { %v2252_v42 = vadd.f32 %v6685_v48, %v2251_v25  ;;  %v6823_v48 = vld [vmem:[#allocation3 + $0x1a] sm:$0xff] }
 0x392   : > { %v2291_v8 = vmax.f32 %v2257_v7, 0.0  ;;  %v6939_v7 = vld [vmem:[#allocation3 + $0x30] sm:$0xff] }
 0x393   : > { %v2290_v34 = vmax.f32 %v2252_v42, 0.0  ;;  %v2442_v21 = vld [vmem:[#allocation3 + $0x171] sm:$0xff] }
 0x394   : > { %2378 = vst.msk [vmem:[#allocation3 + $0x189] sm:$0xff] %vm225_vm0, %v2291_v8  ;;  %2762 = vrot.lane.b32.xlu1 %v2442_v21, %s4812_s25  ;;  %v2441_v52 = vld [vmem:[#allocation3 + $0x169] sm:$0xff]  ;;  %v2474_v16 = vld [vmem:[#allocation3 + $0x172] sm:$0xff] }
 0x395   : > { %2377 = vst.msk [vmem:[#allocation3 + $0x181] sm:$0xff] %vm225_vm0, %v2290_v34  ;;  %2760 = vrot.lane.b32.xlu0 %v2441_v52, %s4812_s25  ;;  %v2473_v9 = vld [vmem:[#allocation3 + $0x16a] sm:$0xff] }
 0x396   : > { %v6947_v42 = vld [vmem:[#allocation3 + $0x50] sm:$0xff]  ;;  %v6951_v34 = vld [vmem:[#allocation3 + $0x48] sm:$0xff] }
 0x397   : > { %v6959_v52 = vld [vmem:[#allocation3 + $0x68] sm:$0xff] }
 0x398   : > { %2830 = vrot.lane.b32.xlu1 %v2444_v1, %s4813_s26 }
 0x399   : > { %2828 = vrot.lane.b32.xlu0 %v2443_v6, %s4813_s26  ;;  %v6963_v6 = vld [vmem:[#allocation3 + $0x60] sm:$0xff] }
 0x39b   : > { %v6907_v63 = vpop.permute.xlu1 %2706 }
 0x39c   : > { %2834 = vrot.lane.b32.xlu1 %v6819_v38, %s4813_s26  ;;  %v6910_v46 = vpop.permute.xlu0 %2704 }
 0x39d   : > { %2832 = vrot.lane.b32.xlu0 %v6823_v48, %s4813_s26 }
 0x39f   : > { %v6915_v41 = vpop.permute.xlu1 %2710 }
 0x3a0   : > { %2838 = vrot.lane.b32.xlu1 %v6827_v36, %s4813_s26  ;;  %v6917_v33 = vpop.permute.xlu0 %2708 }
 0x3a1   : > { %2836 = vrot.lane.b32.xlu0 %v6831_v14, %s4813_s26 }
 0x3a4   : > { %2842 = vrot.lane.b32.xlu1 %v6835_v55, %s4813_s26 }
 0x3a5   : > { %2840 = vrot.lane.b32.xlu0 %v6839_v22, %s4813_s26 }
 0x3a6   : > { %v6921_v15 = vpop.permute.xlu1 %2714 }
 0x3a7   : > { %8410 = vst [vmem:[#allocation5_spill] sm:$0xff] %v6921_v15  ;;  %v6925_v37 = vpop.permute.xlu0 %2712  ;;  %v7045_v15 = vld [vmem:[#allocation3 + $0x108] sm:$0xff] }
 0x3a8   : > { %2846 = vrot.lane.b32.xlu1 %v6843_v44, %s4813_s26  ;;  %8411 = vst [vmem:[#allocation7_spill] sm:$0xff] %v6925_v37 }
 0x3a9   : > { %2844 = vrot.lane.b32.xlu0 %v6847_v29, %s4813_s26 }
 0x3ac   : > { %2850 = vrot.lane.b32.xlu1 %v6851_v61, %s4813_s26 }
 0x3ad   : > { %2848 = vrot.lane.b32.xlu0 %v6855_v40, %s4813_s26 }
 0x3ae   : > { %v6933_v60 = vpop.permute.xlu1 %2718 }
 0x3af   : > { %8412 = vst [vmem:[#allocation13_spill] sm:$0xff] %v6933_v60  ;;  %v6937_v17 = vpop.permute.xlu0 %2716 }
 0x3b0   : > { %2854 = vrot.lane.b32.xlu1 %v6859_v39, %s4813_s26  ;;  %8413 = vst [vmem:[#allocation9_spill] sm:$0xff] %v6937_v17  ;;  %v7035_v17 = vld [vmem:[#allocation3 + $0xf0] sm:$0xff] }
 0x3b1   : > { %2852 = vrot.lane.b32.xlu0 %v6863_v59, %s4813_s26 }
 0x3b4   : > { %2858 = vrot.lane.b32.xlu1 %v6867_v62, %s4813_s26 }
 0x3b5   : > { %2856 = vrot.lane.b32.xlu0 %v6871_v10, %s4813_s26 }
 0x3b6   : > { %v6945_v25 = vpop.permute.xlu1 %2722 }
 0x3b7   : > { %8414 = vst [vmem:[#allocation64_spill] sm:$0xff] %v6945_v25  ;;  %v6949_v8 = vpop.permute.xlu0 %2720 }
 0x3b8   : > { %2862 = vrot.lane.b32.xlu1 %v6875_v31, %s4813_s26  ;;  %8415 = vst [vmem:[#allocation11_spill] sm:$0xff] %v6949_v8  ;;  %v7023_v8 = vld [vmem:[#allocation3 + $0xd8] sm:$0xff] }
 0x3b9   : > { %2860 = vrot.lane.b32.xlu0 %v6879_v23, %s4813_s26 }
 0x3bc   : > { %2866 = vrot.lane.b32.xlu1 %v6883_v2, %s4813_s26 }
 0x3bd   : > { %2864 = vrot.lane.b32.xlu0 %v6887_v4, %s4813_s26 }
 0x3be   : > { %v6957_v21 = vpop.permute.xlu1 %2726 }
 0x3bf   : > { %8416 = vst [vmem:[#allocation19_spill] sm:$0xff] %v6957_v21  ;;  %v6961_v1 = vpop.permute.xlu0 %2724 }
 0x3c0   : > { %2870 = vrot.lane.b32.xlu1 %v6891_v54, %s4813_s26  ;;  %8417 = vst [vmem:[#allocation69_spill] sm:$0xff] %v6961_v1  ;;  %v7011_v1 = vld [vmem:[#allocation3 + $0xc0] sm:$0xff]  ;;  %v3951_v54 = vld [vmem:[%s8000_s3 + $0x18] sm:$0xff] }
 0x3c1   : > { %2868 = vrot.lane.b32.xlu0 %v6895_v47, %s4813_s26  ;;  %8431 = vst [vmem:[#allocation6_spill] sm:$0xff] %v7011_v1 }
 0x3c4   : > { %2874 = vrot.lane.b32.xlu1 %v2466_v50, %s4813_s26 }
 0x3c5   : > { %2872 = vrot.lane.b32.xlu0 %v2465_v43, %s4813_s26  ;;  %v6971_v43 = vld [vmem:[#allocation3 + $0x80] sm:$0xff] }
 0x3c6   : > { %v6969_v50 = vpop.permute.xlu1 %2730  ;;  %8419 = vst [vmem:[#allocation71_spill] sm:$0xff] %v6971_v43 }
 0x3c7   : > { %8418 = vst [vmem:[#allocation68_spill] sm:$0xff] %v6969_v50 }
 0x3c8   : > { %2878 = vrot.lane.b32.xlu1 %v2468_v56, %s4813_s26  ;;  %v6973_v56 = vpop.permute.xlu0 %2728 }
 0x3c9   : > { %2876 = vrot.lane.b32.xlu0 %v2467_v35, %s4813_s26  ;;  %8420 = vst [vmem:[#allocation72_spill] sm:$0xff] %v6973_v56  ;;  %v6975_v35 = vld [vmem:[#allocation3 + $0x78] sm:$0xff]  ;;  %v6999_v56 = vld [vmem:[#allocation3 + $0xa8] sm:$0xff] }
 0x3ca   : > { %8428 = vst [vmem:[#allocation22_spill] sm:$0xff] %v6999_v56 }
 0x3cc   : > { %2882 = vrot.lane.b32.xlu1 %v2470_v11, %s4813_s26 }
 0x3cd   : > { %2880 = vrot.lane.b32.xlu0 %v2469_v28, %s4813_s26  ;;  %v6983_v28 = vld [vmem:[#allocation3 + $0x98] sm:$0xff] }
 0x3ce   : > { %v6981_v11 = vpop.permute.xlu1 %2734  ;;  %8422 = vst [vmem:[#allocation74_spill] sm:$0xff] %v6983_v28 }
 0x3cf   : > { %8421 = vst [vmem:[#allocation15_spill] sm:$0xff] %v6981_v11 }
 0x3d0   : > { %2886 = vrot.lane.b32.xlu1 %v2472_v53, %s4813_s26  ;;  %v6985_v53 = vpop.permute.xlu0 %2732 }
 0x3d1   : > { %2884 = vrot.lane.b32.xlu0 %v2471_v45, %s4813_s26  ;;  %8423 = vst [vmem:[#allocation12_spill] sm:$0xff] %v6985_v53  ;;  %v6987_v45 = vld [vmem:[#allocation3 + $0x90] sm:$0xff]  ;;  %v7007_v53 = vld [vmem:[#allocation3 + $0xc8] sm:$0xff] }
 0x3d2   : > { %8424 = vst [vmem:[#allocation73_spill] sm:$0xff] %v6987_v45 }
 0x3d4   : > { %2890 = vrot.lane.b32.xlu1 %v2474_v16, %s4813_s26 }
 0x3d5   : > { %2888 = vrot.lane.b32.xlu0 %v2473_v9, %s4813_s26  ;;  %v6995_v9 = vld [vmem:[#allocation3 + $0xb0] sm:$0xff] }
 0x3d6   : > { %v6993_v16 = vpop.permute.xlu1 %2738  ;;  %8426 = vst [vmem:[#allocation16_spill] sm:$0xff] %v6995_v9 }
 0x3d7   : > { %8425 = vst [vmem:[#allocation18_spill] sm:$0xff] %v6993_v16  ;;  %v6997_v50 = vpop.permute.xlu0 %2736 }
 0x3d8   : > { %2958 = vrot.lane.b32.xlu1 %v6923_v30, %s4814_s27  ;;  %8427 = vst [vmem:[#allocation75_spill] sm:$0xff] %v6997_v50  ;;  %v7019_v50 = vld [vmem:[#allocation3 + $0xe0] sm:$0xff] }
 0x3d9   : > { %2956 = vrot.lane.b32.xlu0 %v6927_v5, %s4814_s27 }
 0x3dc   : > { %2962 = vrot.lane.b32.xlu1 %v6935_v20, %s4814_s27 }
 0x3dd   : > { %2960 = vrot.lane.b32.xlu0 %v6939_v7, %s4814_s27 }
 0x3de   : > { %v7005_v11 = vpop.permute.xlu1 %2742 }
 0x3df   : > { %8429 = vst [vmem:[#allocation20_spill] sm:$0xff] %v7005_v11  ;;  %v7009_v21 = vpop.permute.xlu0 %2740 }
 0x3e0   : > { %2966 = vrot.lane.b32.xlu1 %v6947_v42, %s4814_s27  ;;  %8430 = vst [vmem:[#allocation57_spill] sm:$0xff] %v7009_v21  ;;  %v7031_v21 = vld [vmem:[#allocation3 + $0xf8] sm:$0xff] }
 0x3e1   : > { %2964 = vrot.lane.b32.xlu0 %v6951_v34, %s4814_s27 }
 0x3e4   : > { %2970 = vrot.lane.b32.xlu1 %v6959_v52, %s4814_s27 }
 0x3e5   : > { %2968 = vrot.lane.b32.xlu0 %v6963_v6, %s4814_s27 }
 0x3e6   : > { %v7017_v16 = vpop.permute.xlu1 %2746 }
 0x3e7   : > { %8432 = vst [vmem:[#allocation134_spill] sm:$0xff] %v7017_v16  ;;  %v7021_v25 = vpop.permute.xlu0 %2744 }
 0x3e8   : > { %2974 = vrot.lane.b32.xlu1 %v6971_v43, %s4814_s27  ;;  %8433 = vst [vmem:[#allocation55_spill] sm:$0xff] %v7021_v25 }
 0x3e9   : > { %2972 = vrot.lane.b32.xlu0 %v6975_v35, %s4814_s27 }
 0x3ec   : > { %2978 = vrot.lane.b32.xlu1 %v6983_v28, %s4814_s27 }
 0x3ed   : > { %2976 = vrot.lane.b32.xlu0 %v6987_v45, %s4814_s27 }
 0x3ee   : > { %v7029_v11 = vpop.permute.xlu1 %2750 }
 0x3ef   : > { %8434 = vst [vmem:[#allocation133_spill] sm:$0xff] %v7029_v11  ;;  %v7033_v60 = vpop.permute.xlu0 %2748  ;;  %v3948_v11 = vld [vmem:[%s8000_s3] sm:$0xff] }
 0x3f0   : > { %2982 = vrot.lane.b32.xlu1 %v6995_v9, %s4814_s27  ;;  %8435 = vst [vmem:[#allocation26_spill] sm:$0xff] %v7033_v60  ;;  %v3949_v60 = vld [vmem:[%s8000_s3 + $0x8] sm:$0xff] }
 0x3f1   : > { %2980 = vrot.lane.b32.xlu0 %v6999_v56, %s4814_s27  ;;  %v4746_v37 = vpack.c.bf16 %v3949_v60, %v3948_v11 }
 0x3f3   : > { %4747 = vmatprep.subr.bf16.mxu1 %v4746_v37 }
 0x3f4   : > { %2986 = vrot.lane.b32.xlu1 %v7007_v53, %s4814_s27  ;;  %4749 = vmatpush3.bf16.msra.mxu1 %v4746_v37 }
 0x3f5   : > { %2984 = vrot.lane.b32.xlu0 %v7011_v1, %s4814_s27 }
 0x3f6   : > { %v7041_v16 = vpop.permute.xlu1 %2754 }
 0x3f7   : > { %8436 = vst [vmem:[#allocation77_spill] sm:$0xff] %v7041_v16  ;;  %v7043_v25 = vpop.permute.xlu0 %2752 }
 0x3f8   : > { %2990 = vrot.lane.b32.xlu1 %v7019_v50, %s4814_s27  ;;  %8437 = vst [vmem:[#allocation24_spill] sm:$0xff] %v7043_v25 }
 0x3f9   : > { %2988 = vrot.lane.b32.xlu0 %v7023_v8, %s4814_s27 }
 0x3fc   : > { %2994 = vrot.lane.b32.xlu1 %v7031_v21, %s4814_s27 }
 0x3fd   : > { %2992 = vrot.lane.b32.xlu0 %v7035_v17, %s4814_s27 }
 0x3fe   : > { %v7057_v16 = vpop.permute.xlu1 %2758 }
 0x3ff   : > { %8438 = vst [vmem:[#allocation98_spill] sm:$0xff] %v7057_v16  ;;  %v7059_v25 = vpop.permute.xlu0 %2756 }
 0x400   : > { %3084 = vrot.lane.b32.xlu1 %v6701_v26, %s4815_s28  ;;  %8439 = vst [vmem:[#allocation76_spill] sm:$0xff] %v7059_v25  ;;  %v3950_v26 = vld [vmem:[%s8000_s3 + $0x10] sm:$0xff] }
 0x401   : > { %2996 = vrot.lane.b32.xlu0 %v7045_v15, %s4814_s27  ;;  %v4750_v60 = vpack.c.bf16 %v3951_v54, %v3950_v26 }
 0x403   : > { %4751 = vmatprep.subr.bf16.mxu1 %v4750_v60 }
 0x404   : > { %3212 = vrot.lane.b32.xlu1 %v6823_v48, %s4816_s29  ;;  %4753 = vmatpush3.bf16.msra.mxu1 %v4750_v60  ;;  %v3952_v48 = vld [vmem:[%s8000_s3 + $0x20] sm:$0xf] }
 0x405   : > { %3086 = vrot.lane.b32.xlu0 %v6696_v27, %s4815_s28  ;;  %4688 = vmatprep.subr.msk.mxu1 %vm2031_vm2, %v3952_v48 }
 0x406   : > { %v7071_v11 = vpop.permute.xlu1 %2762 }
 0x407   : > { %8440 = vst [vmem:[#allocation10_spill] sm:$0xff] %v7071_v11  ;;  %v7073_v16 = vpop.permute.xlu0 %2760 }
 0x408   : > { %8441 = vst [vmem:[#allocation97_spill] sm:$0xff] %v7073_v16  ;;  %3340 = vrot.lane.b32.xlu1 %v6939_v7, %s4817_s30  ;;  %4689 = vmatpush3.msk.msra.mxu1 %vm2031_vm2, %v3952_v48 }
 0x409   : > { %3214 = vrot.lane.b32.xlu0 %v6819_v38, %s4816_s29 }
 0x40a   : > { %v7082_v37 = vpop.permute.xlu1 %2830 }
 0x40b   : > { %v7085_v27 = vpop.permute.xlu0 %2828 }
 0x40c   : > { %3468 = vrot.lane.b32.xlu1 %v6711_v13, %s4818_s14 }
 0x40d   : > { %3342 = vrot.lane.b32.xlu0 %v6935_v20, %s4817_s30 }
 0x40e   : > { %v7092_v54 = vpop.permute.xlu1 %2834 }
 0x40f   : > { %v7094_v38 = vpop.permute.xlu0 %2832 }
 0x410   : > { %3470 = vrot.lane.b32.xlu1 %v6706_v51, %s4818_s14 }
 0x411   : > { %3088 = vrot.lane.b32.xlu0 %v6711_v13, %s4815_s28 }
 0x412   : > { %v7100_v26 = vpop.permute.xlu1 %2838 }
 0x413   : > { %v7102_v60 = vpop.permute.xlu0 %2836 }
 0x414   : > { %3090 = vrot.lane.b32.xlu1 %v6706_v51, %s4815_s28 }
 0x415   : > { %3596 = vrot.lane.b32.xlu0 %v6831_v14, %s4819_s17 }
 0x416   : > { %v7108_v48 = vpop.permute.xlu1 %2842 }
 0x417   : > { %v7110_v11 = vpop.permute.xlu0 %2840 }
 0x418   : > { %3598 = vrot.lane.b32.xlu1 %v6827_v36, %s4819_s17 }
 0x419   : > { %3216 = vrot.lane.b32.xlu0 %v6831_v14, %s4816_s29 }
 0x41a   : > { %v7116_v13 = vpop.permute.xlu1 %2846 }
 0x41b   : > { %8442 = vst [vmem:[#allocation61_spill] sm:$0xff] %v7116_v13  ;;  %v7118_v16 = vpop.permute.xlu0 %2844 }
 0x41c   : > { %3344 = vrot.lane.b32.xlu1 %v6951_v34, %s4817_s30 }
 0x41d   : > { %3218 = vrot.lane.b32.xlu0 %v6827_v36, %s4816_s29 }
 0x41e   : > { %v7124_v51 = vpop.permute.xlu1 %2850 }
 0x41f   : > { %8443 = vst [vmem:[#allocation8_spill] sm:$0xff] %v7124_v51  ;;  %v7126_v25 = vpop.permute.xlu0 %2848 }
 0x420   : > { %8444 = vst [vmem:[#allocation136_spill] sm:$0xff] %v7126_v25  ;;  %3472 = vrot.lane.b32.xlu1 %v6722_v49, %s4818_s14 }
 0x421   : > { %3346 = vrot.lane.b32.xlu0 %v6947_v42, %s4817_s30 }
 0x422   : > { %v7132_v14 = vpop.permute.xlu1 %2854 }
 0x423   : > { %8445 = vst [vmem:[#allocation59_spill] sm:$0xff] %v7132_v14  ;;  %v7134_v13 = vpop.permute.xlu0 %2852 }
 0x424   : > { %8446 = vst [vmem:[#allocation135_spill] sm:$0xff] %v7134_v13  ;;  %3474 = vrot.lane.b32.xlu1 %v6717_v58, %s4818_s14 }
 0x425   : > { %3092 = vrot.lane.b32.xlu0 %v6722_v49, %s4815_s28 }
 0x426   : > { %v7140_v36 = vpop.permute.xlu1 %2858 }
 0x427   : > { %8447 = vst [vmem:[#allocation30_spill] sm:$0xff] %v7140_v36  ;;  %v7142_v51 = vpop.permute.xlu0 %2856 }
 0x428   : > { %8448 = vst [vmem:[#allocation79_spill] sm:$0xff] %v7142_v51  ;;  %3094 = vrot.lane.b32.xlu1 %v6717_v58, %s4815_s28 }
 0x429   : > { %3600 = vrot.lane.b32.xlu0 %v6839_v22, %s4819_s17 }
 0x42a   : > { %v7148_v25 = vpop.permute.xlu1 %2862 }
 0x42b   : > { %8449 = vst [vmem:[#allocation28_spill] sm:$0xff] %v7148_v25  ;;  %v7150_v14 = vpop.permute.xlu0 %2860 }
 0x42c   : > { %8450 = vst [vmem:[#allocation100_spill] sm:$0xff] %v7150_v14  ;;  %3602 = vrot.lane.b32.xlu1 %v6835_v55, %s4819_s17 }
 0x42d   : > { %3220 = vrot.lane.b32.xlu0 %v6839_v22, %s4816_s29 }
 0x42e   : > { %v7156_v49 = vpop.permute.xlu1 %2866 }
 0x42f   : > { %8451 = vst [vmem:[#allocation78_spill] sm:$0xff] %v7156_v49  ;;  %v7158_v36 = vpop.permute.xlu0 %2864 }
 0x430   : > { %8452 = vst [vmem:[#allocation17_spill] sm:$0xff] %v7158_v36  ;;  %3348 = vrot.lane.b32.xlu1 %v6963_v6, %s4817_s30 }
 0x431   : > { %3222 = vrot.lane.b32.xlu0 %v6835_v55, %s4816_s29 }
 0x432   : > { %v7164_v58 = vpop.permute.xlu1 %2870 }
 0x433   : > { %8453 = vst [vmem:[#allocation99_spill] sm:$0xff] %v7164_v58  ;;  %v7166_v25 = vpop.permute.xlu0 %2868 }
 0x434   : > { %8454 = vst [vmem:[#allocation65_spill] sm:$0xff] %v7166_v25  ;;  %3476 = vrot.lane.b32.xlu1 %v6734_v12, %s4818_s14 }
 0x435   : > { %3350 = vrot.lane.b32.xlu0 %v6959_v52, %s4817_s30 }
 0x436   : > { %v7172_v22 = vpop.permute.xlu1 %2874 }
 0x437   : > { %8455 = vst [vmem:[#allocation14_spill] sm:$0xff] %v7172_v22  ;;  %v7174_v49 = vpop.permute.xlu0 %2872 }
 0x438   : > { %8456 = vst [vmem:[#allocation138_spill] sm:$0xff] %v7174_v49  ;;  %3478 = vrot.lane.b32.xlu1 %v6729_v32, %s4818_s14 }
 0x439   : > { %3096 = vrot.lane.b32.xlu0 %v6734_v12, %s4815_s28 }
 0x43a   : > { %v7180_v55 = vpop.permute.xlu1 %2878 }
 0x43b   : > { %8457 = vst [vmem:[#allocation63_spill] sm:$0xff] %v7180_v55  ;;  %v7182_v58 = vpop.permute.xlu0 %2876 }
 0x43c   : > { %8458 = vst [vmem:[#allocation137_spill] sm:$0xff] %v7182_v58  ;;  %3098 = vrot.lane.b32.xlu1 %v6729_v32, %s4815_s28 }
 0x43d   : > { %3604 = vrot.lane.b32.xlu0 %v6847_v29, %s4819_s17 }
 0x43e   : > { %v7188_v25 = vpop.permute.xlu1 %2882 }
 0x43f   : > { %8459 = vst [vmem:[#allocation34_spill] sm:$0xff] %v7188_v25  ;;  %v7190_v22 = vpop.permute.xlu0 %2880 }
 0x440   : > { %8460 = vst [vmem:[#allocation81_spill] sm:$0xff] %v7190_v22  ;;  %3606 = vrot.lane.b32.xlu1 %v6843_v44, %s4819_s17 }
 0x441   : > { %3224 = vrot.lane.b32.xlu0 %v6847_v29, %s4816_s29 }
 0x442   : > { %v7196_v12 = vpop.permute.xlu1 %2886 }
 0x443   : > { %8461 = vst [vmem:[#allocation32_spill] sm:$0xff] %v7196_v12  ;;  %v7198_v55 = vpop.permute.xlu0 %2884 }
 0x444   : > { %8462 = vst [vmem:[#allocation102_spill] sm:$0xff] %v7198_v55  ;;  %3352 = vrot.lane.b32.xlu1 %v6975_v35, %s4817_s30 }
 0x445   : > { %3226 = vrot.lane.b32.xlu0 %v6843_v44, %s4816_s29 }
 0x446   : > { %v7204_v32 = vpop.permute.xlu1 %2890 }
 0x447   : > { %8463 = vst [vmem:[#allocation80_spill] sm:$0xff] %v7204_v32  ;;  %v7206_v25 = vpop.permute.xlu0 %2888 }
 0x448   : > { %8464 = vst [vmem:[#allocation23_spill] sm:$0xff] %v7206_v25  ;;  %3480 = vrot.lane.b32.xlu1 %v6746_v24, %s4818_s14 }
 0x449   : > { %3354 = vrot.lane.b32.xlu0 %v6971_v43, %s4817_s30 }
 0x44a   : > { %v7212_v29 = vpop.permute.xlu1 %2958 }
 0x44b   : > { %v7214_v12 = vpop.permute.xlu0 %2956 }
 0x44c   : > { %3482 = vrot.lane.b32.xlu1 %v6741_v57, %s4818_s14 }
 0x44d   : > { %3100 = vrot.lane.b32.xlu0 %v6746_v24, %s4815_s28 }
 0x44e   : > { %v7220_v44 = vpop.permute.xlu1 %2962 }
 0x44f   : > { %v7222_v32 = vpop.permute.xlu0 %2960 }
 0x450   : > { %3102 = vrot.lane.b32.xlu1 %v6741_v57, %s4815_s28 }
 0x451   : > { %3608 = vrot.lane.b32.xlu0 %v6855_v40, %s4819_s17 }
 0x452   : > { %v7228_v25 = vpop.permute.xlu1 %2966 }
 0x453   : > { %v7230_v55 = vpop.permute.xlu0 %2964 }
 0x454   : > { %3610 = vrot.lane.b32.xlu1 %v6851_v61, %s4819_s17 }
 0x455   : > { %3228 = vrot.lane.b32.xlu0 %v6855_v40, %s4816_s29 }
 0x456   : > { %v7236_v24 = vpop.permute.xlu1 %2970 }
 0x457   : > { %v7238_v22 = vpop.permute.xlu0 %2968 }
 0x458   : > { %3356 = vrot.lane.b32.xlu1 %v6987_v45, %s4817_s30 }
 0x459   : > { %3230 = vrot.lane.b32.xlu0 %v6851_v61, %s4816_s29 }
 0x45a   : > { %v7244_v57 = vpop.permute.xlu1 %2974 }
 0x45b   : > { %v7246_v58 = vpop.permute.xlu0 %2972 }
 0x45c   : > { %3484 = vrot.lane.b32.xlu1 %v6758_v18, %s4818_s14 }
 0x45d   : > { %3358 = vrot.lane.b32.xlu0 %v6983_v28, %s4817_s30 }
 0x45e   : > { %v7252_v40 = vpop.permute.xlu1 %2978 }
 0x45f   : > { %8465 = vst [vmem:[#allocation101_spill] sm:$0xff] %v7252_v40  ;;  %v7254_v49 = vpop.permute.xlu0 %2976  ;;  %v2616_v40 = vld [vmem:[#allocation3 + $0xc1] sm:$0xff] }
 0x460   : > { %3486 = vrot.lane.b32.xlu1 %v6753_v19, %s4818_s14 }
 0x461   : > { %3104 = vrot.lane.b32.xlu0 %v6758_v18, %s4815_s28 }
 0x462   : > { %v7260_v61 = vpop.permute.xlu1 %2982 }
 0x463   : > { %8466 = vst [vmem:[#allocation70_spill] sm:$0xff] %v7260_v61  ;;  %v7262_v36 = vpop.permute.xlu0 %2980 }
 0x464   : > { %8467 = vst [vmem:[#allocation21_spill] sm:$0xff] %v7262_v36  ;;  %3106 = vrot.lane.b32.xlu1 %v6753_v19, %s4815_s28 }
 0x465   : > { %3612 = vrot.lane.b32.xlu0 %v6863_v59, %s4819_s17 }
 0x466   : > { %v7268_v14 = vpop.permute.xlu1 %2986 }
 0x467   : > { %8468 = vst [vmem:[#allocation140_spill] sm:$0xff] %v7268_v14  ;;  %v7270_v51 = vpop.permute.xlu0 %2984 }
 0x468   : > { %8469 = vst [vmem:[#allocation67_spill] sm:$0xff] %v7270_v51  ;;  %3614 = vrot.lane.b32.xlu1 %v6859_v39, %s4819_s17  ;;  %v2614_v51 = vld [vmem:[#allocation3 + $0xa9] sm:$0xff] }
 0x469   : > { %3232 = vrot.lane.b32.xlu0 %v6863_v59, %s4816_s29 }
 0x46a   : > { %v7276_v18 = vpop.permute.xlu1 %2990 }
 0x46b   : > { %8470 = vst [vmem:[#allocation139_spill] sm:$0xff] %v7276_v18  ;;  %v7278_v61 = vpop.permute.xlu0 %2988 }
 0x46c   : > { %8471 = vst [vmem:[#allocation38_spill] sm:$0xff] %v7278_v61  ;;  %3360 = vrot.lane.b32.xlu1 %v6999_v56, %s4817_s30  ;;  %v2615_v61 = vld [vmem:[#allocation3 + $0xb1] sm:$0xff] }
 0x46d   : > { %3234 = vrot.lane.b32.xlu0 %v6859_v39, %s4816_s29 }
 0x46e   : > { %v7284_v19 = vpop.permute.xlu1 %2994 }
 0x46f   : > { %8472 = vst [vmem:[#allocation83_spill] sm:$0xff] %v7284_v19  ;;  %v7286_v14 = vpop.permute.xlu0 %2992 }
 0x470   : > { %8473 = vst [vmem:[#allocation36_spill] sm:$0xff] %v7286_v14  ;;  %3488 = vrot.lane.b32.xlu1 %v2614_v51, %s4818_s14 }
 0x471   : > { %3362 = vrot.lane.b32.xlu0 %v6995_v9, %s4817_s30 }
 0x472   : > { %v3085_v59 = vpop.permute.xlu1 %3084 }
 0x473   : > { %v7291_v18 = vpop.permute.xlu0 %2996 }
 0x474   : > { %8474 = vst [vmem:[#allocation104_spill] sm:$0xff] %v7291_v18  ;;  %3490 = vrot.lane.b32.xlu1 %v2615_v61, %s4818_s14  ;;  %v2379_v18 = vld [vmem:[#allocation3] sm:$0xff] }
 0x475   : > { %3108 = vrot.lane.b32.xlu0 %v2614_v51, %s4815_s28  ;;  %v2380_v51 = vld [vmem:[#allocation3 + $0x8] sm:$0xff] }
 0x476   : > { %v3213_v56 = vpop.permute.xlu1 %3212  ;;  %v3693_v43 = vsel %vm225_vm0, %v2380_v51, %v6901_v3  ;;  %v2617_v51 = vld [vmem:[#allocation3 + $0xc9] sm:$0xff] }
 0x477   : > { %v3087_v39 = vpop.permute.xlu0 %3086 }
 0x478   : > { %3110 = vrot.lane.b32.xlu1 %v2615_v61, %s4815_s28  ;;  %v3692_v61 = vsel %vm225_vm0, %v2379_v18, %v6903_v0  ;;  %v3725_v0 = vsel %vm1691_vm3, %v3693_v43, %v7082_v37 }
 0x479   : > { %3616 = vrot.lane.b32.xlu0 %v6871_v10, %s4819_s17  ;;  %v3724_v36 = vsel %vm1691_vm3, %v3692_v61, %v7085_v27  ;;  %v3757_v27 = vsel %vm1724_vm4, %v3725_v0, %v7212_v29 }
 0x47a   : > { %v3341_v19 = vpop.permute.xlu1 %3340  ;;  %v3789_v3 = vsel %vm1757_vm5, %v3757_v27, %v3087_v39 }
 0x47b   : > { %v3215_v14 = vpop.permute.xlu0 %3214 }
 0x47c   : > { %3618 = vrot.lane.b32.xlu1 %v6867_v62, %s4819_s17  ;;  %v3821_v61 = vsel %vm1790_vm6, %v3789_v3, %v3215_v14 }
 0x47d   : > { %3236 = vrot.lane.b32.xlu0 %v6871_v10, %s4816_s29  ;;  %v3756_v10 = vsel %vm1724_vm4, %v3724_v36, %v7214_v12 }
 0x47e   : > { %v3469_v9 = vpop.permute.xlu1 %3468 }
 0x47f   : > { %v3343_v28 = vpop.permute.xlu0 %3342 }
 0x480   : > { %3364 = vrot.lane.b32.xlu1 %v7011_v1, %s4817_s30  ;;  %v3788_v1 = vsel %vm1757_vm5, %v3756_v10, %v3085_v59  ;;  %v3853_v43 = vsel %vm1823_vm7, %v3821_v61, %v3343_v28 }
 0x481   : > { %3238 = vrot.lane.b32.xlu0 %v6867_v62, %s4816_s29  ;;  %v3820_v62 = vsel %vm1790_vm6, %v3788_v1, %v3213_v56 }
 0x482   : > { %v3471_v13 = vpop.permute.xlu1 %3470  ;;  %v3852_v36 = vsel %vm1823_vm7, %v3820_v62, %v3341_v19  ;;  %v2618_v62 = vld [vmem:[#allocation3 + $0xd9] sm:$0xff] }
 0x483   : > { %v3089_v45 = vpop.permute.xlu0 %3088  ;;  %v3884_v18 = vsel %vm1856_vm8, %v3852_v36, %v3469_v9  ;;  %v3885_v56 = vsel %vm1856_vm8, %v3853_v43, %v3471_v13  ;;  %v2619_v36 = vld [vmem:[#allocation3 + $0xe1] sm:$0xff] }
 0x484   : > { %3492 = vrot.lane.b32.xlu1 %v2616_v40, %s4818_s14 }
 0x485   : > { %3366 = vrot.lane.b32.xlu0 %v7007_v53, %s4817_s30 }
 0x486   : > { %v3091_v12 = vpop.permute.xlu1 %3090 }
 0x487   : > { %v3597_v59 = vpop.permute.xlu0 %3596 }
 0x488   : > { %3494 = vrot.lane.b32.xlu1 %v2617_v51, %s4818_s14  ;;  %v3916_v1 = vsel %vm1889_vm9, %v3884_v18, %v3597_v59 }
 0x489   : > { %3112 = vrot.lane.b32.xlu0 %v2616_v40, %s4815_s28  ;;  %4690 = vmatprep.mubr.msk.f32.mxu1 %vm1934_vm10, %v3916_v1  ;;  %v3694_v40 = vsel %vm225_vm0, %v6927_v5, %v6910_v46 }
 0x48a   : > { %v3599_v37 = vpop.permute.xlu1 %3598  ;;  %v3726_v39 = vsel %vm1691_vm3, %v3694_v40, %v7094_v38 }
 0x48b   : > { %v3917_v29 = vsel %vm1889_vm9, %v3885_v56, %v3599_v37  ;;  %v3217_v9 = vpop.permute.xlu0 %3216  ;;  %v3758_v0 = vsel %vm1724_vm4, %v3726_v39, %v7222_v32  ;;  %v3696_v56 = vsel %vm225_vm0, %v6939_v7, %v6917_v33 }
 0x48c   : > { %3114 = vrot.lane.b32.xlu1 %v2617_v51, %s4815_s28  ;;  %4691 = vmatmul.mubr.msk.f32.vlgmr.msra.gmra.mrb[0].mxu1 %vm1934_vm10, %v3917_v29  ;;  %v3790_v27 = vsel %vm1757_vm5, %v3758_v0, %v3089_v45  ;;  %v3728_v37 = vsel %vm1691_vm3, %v3696_v56, %v7102_v60  ;;  %v2623_v56 = vld [vmem:[#allocation3 + $0x111] sm:$0xff] }
 0x48d   : > { %3620 = vrot.lane.b32.xlu0 %v6879_v23, %s4819_s17  ;;  %v3822_v46 = vsel %vm1790_vm6, %v3790_v27, %v3217_v9  ;;  %v3760_v9 = vsel %vm1724_vm4, %v3728_v37, %v7230_v55 }
 0x48e   : > { %v3345_v14 = vpop.permute.xlu1 %3344 }
 0x48f   : > { %v3219_v19 = vpop.permute.xlu0 %3218  ;;  %v3854_v38 = vsel %vm1823_vm7, %v3822_v46, %v3345_v14  ;;  %v2620_v14 = vld [vmem:[#allocation3 + $0xf1] sm:$0xff]  ;;  %v8476_v46 = vld [vmem:[#allocation7_spill] sm:$0xff] }
 0x490   : > { %3622 = vrot.lane.b32.xlu1 %v6875_v31, %s4819_s17 }
 0x491   : > { %3240 = vrot.lane.b32.xlu0 %v6879_v23, %s4816_s29 }
 0x492   : > { %v3473_v28 = vpop.permute.xlu1 %3472 }
 0x493   : > { %v3347_v13 = vpop.permute.xlu0 %3346 }
 0x494   : > { %3368 = vrot.lane.b32.xlu1 %v7023_v8, %s4817_s30  ;;  %v3695_v8 = vsel %vm225_vm0, %v6923_v30, %v6907_v63  ;;  %v3886_v30 = vsel %vm1856_vm8, %v3854_v38, %v3473_v28 }
 0x495   : > { %3242 = vrot.lane.b32.xlu0 %v6875_v31, %s4816_s29  ;;  %v3727_v31 = vsel %vm1691_vm3, %v3695_v8, %v7092_v54  ;;  %v8475_v8 = vld [vmem:[#allocation4_spill] sm:$0xff] }
 0x496   : > { %v3475_v10 = vpop.permute.xlu1 %3474  ;;  %v3759_v5 = vsel %vm1724_vm4, %v3727_v31, %v7220_v44 }
 0x497   : > { %v3093_v23 = vpop.permute.xlu0 %3092  ;;  %v3791_v63 = vsel %vm1757_vm5, %v3759_v5, %v3091_v12  ;;  %v3698_v5 = vsel %vm225_vm0, %v6951_v34, %v8476_v46 }
 0x498   : > { %3496 = vrot.lane.b32.xlu1 %v2618_v62, %s4818_s14  ;;  %v3823_v3 = vsel %vm1790_vm6, %v3791_v63, %v3219_v19  ;;  %v3792_v19 = vsel %vm1757_vm5, %v3760_v9, %v3093_v23  ;;  %v3730_v38 = vsel %vm1691_vm3, %v3698_v5, %v7110_v11 }
 0x499   : > { %3370 = vrot.lane.b32.xlu0 %v7019_v50, %s4817_s30  ;;  %v3855_v50 = vsel %vm1823_vm7, %v3823_v3, %v3347_v13  ;;  %v2621_v13 = vld [vmem:[#allocation3 + $0xf9] sm:$0xff]  ;;  %v3762_v63 = vsel %vm1724_vm4, %v3730_v38, %v7238_v22  ;;  %v2656_v38 = vld [vmem:[#allocation3 + $0x122] sm:$0xff] }
 0x49a   : > { %v3095_v32 = vpop.permute.xlu1 %3094  ;;  %v3887_v44 = vsel %vm1856_vm8, %v3855_v50, %v3475_v10 }
 0x49b   : > { %v3601_v45 = vpop.permute.xlu0 %3600 }
 0x49c   : > { %v3918_v54 = vsel %vm1889_vm9, %v3886_v30, %v3601_v45  ;;  %3498 = vrot.lane.b32.xlu1 %v2619_v36, %s4818_s14  ;;  %v2622_v30 = vld [vmem:[#allocation3 + $0x109] sm:$0xff]  ;;  %v8477_v45 = vld [vmem:[#allocation5_spill] sm:$0xff] }
 0x49d   : > { %3116 = vrot.lane.b32.xlu0 %v2618_v62, %s4815_s28  ;;  %4693 = vmatprep.mubr.msk.f32.mxu1 %vm1934_vm10, %v3918_v54 }
 0x49e   : > { %v3603_v18 = vpop.permute.xlu1 %3602 }
 0x49f   : > { %v3919_v12 = vsel %vm1889_vm9, %v3887_v44, %v3603_v18  ;;  %v3221_v59 = vpop.permute.xlu0 %3220 }
 0x4a0   : > { %3118 = vrot.lane.b32.xlu1 %v2619_v36, %s4815_s28  ;;  %4694 = vmatmul.mubr.msk.f32.gmra.mrb[2].mxu1 %vm1934_vm10, %v3919_v12  ;;  %v3824_v33 = vsel %vm1790_vm6, %v3792_v19, %v3221_v59  ;;  %v7440_v36 = vld [vmem:[#allocation3 + $0x110] sm:$0xff] }
 0x4a1   : > { %3624 = vrot.lane.b32.xlu0 %v6887_v4, %s4819_s17 }
 0x4a2   : > { %v3349_v51 = vpop.permute.xlu1 %3348 }
 0x4a3   : > { %v3223_v61 = vpop.permute.xlu0 %3222  ;;  %v3856_v60 = vsel %vm1823_vm7, %v3824_v33, %v3349_v51 }
 0x4a4   : > { %3626 = vrot.lane.b32.xlu1 %v6883_v2, %s4819_s17 }
 0x4a5   : > { %3244 = vrot.lane.b32.xlu0 %v6887_v4, %s4816_s29 }
 0x4a6   : > { %v3477_v1 = vpop.permute.xlu1 %3476 }
 0x4a7   : > { %v3351_v43 = vpop.permute.xlu0 %3350 }
 0x4a8   : > { %3372 = vrot.lane.b32.xlu1 %v7035_v17, %s4817_s30  ;;  %v3697_v17 = vsel %vm225_vm0, %v6935_v20, %v6915_v41  ;;  %v3888_v20 = vsel %vm1856_vm8, %v3856_v60, %v3477_v1 }
 0x4a9   : > { %3246 = vrot.lane.b32.xlu0 %v6883_v2, %s4816_s29  ;;  %v3729_v2 = vsel %vm1691_vm3, %v3697_v17, %v7100_v26  ;;  %v8478_v17 = vld [vmem:[#allocation9_spill] sm:$0xff] }
 0x4aa   : > { %v3479_v29 = vpop.permute.xlu1 %3478  ;;  %v3761_v7 = vsel %vm1724_vm4, %v3729_v2, %v7228_v25  ;;  %v3700_v19 = vsel %vm225_vm0, %v6963_v6, %v8478_v17  ;;  %v8480_v6 = vld [vmem:[#allocation61_spill] sm:$0xff] }
 0x4ab   : > { %v3097_v4 = vpop.permute.xlu0 %3096  ;;  %v3793_v41 = vsel %vm1757_vm5, %v3761_v7, %v3095_v32  ;;  %v3732_v2 = vsel %vm1691_vm3, %v3700_v19, %v7118_v16  ;;  %v7475_v7 = vld [vmem:[#allocation3 + $0x120] sm:$0xff] }
 0x4ac   : > { %3500 = vrot.lane.b32.xlu1 %v2620_v14, %s4818_s14  ;;  %v3825_v40 = vsel %vm1790_vm6, %v3793_v41, %v3223_v61  ;;  %v3794_v34 = vsel %vm1757_vm5, %v3762_v63, %v3097_v4  ;;  %v3764_v60 = vsel %vm1724_vm4, %v3732_v2, %v7246_v58  ;;  %v8479_v41 = vld [vmem:[#allocation13_spill] sm:$0xff] }
 0x4ad   : > { %3374 = vrot.lane.b32.xlu0 %v7031_v21, %s4817_s30  ;;  %v3857_v21 = vsel %vm1823_vm7, %v3825_v40, %v3351_v43  ;;  %v2654_v43 = vld [vmem:[#allocation3 + $0x10a] sm:$0xff]  ;;  %v2626_v2 = vld [vmem:[#allocation3 + $0x139] sm:$0xff] }
 0x4ae   : > { %v3099_v55 = vpop.permute.xlu1 %3098  ;;  %v3889_v25 = vsel %vm1856_vm8, %v3857_v21, %v3479_v29 }
 0x4af   : > { %v3605_v28 = vpop.permute.xlu0 %3604 }
 0x4b0   : > { %v3920_v26 = vsel %vm1889_vm9, %v3888_v20, %v3605_v28  ;;  %3502 = vrot.lane.b32.xlu1 %v2621_v13, %s4818_s14  ;;  %v3701_v20 = vsel %vm225_vm0, %v6959_v52, %v8479_v41 }
 0x4b1   : > { %3120 = vrot.lane.b32.xlu0 %v2620_v14, %s4815_s28  ;;  %4696 = vmatprep.mubr.msk.f32.mxu1 %vm1934_vm10, %v3920_v26  ;;  %v2560_v14 = vld [vmem:[#allocation3 + $0x112] sm:$0xff] }
 0x4b2   : > { %v3607_v39 = vpop.permute.xlu1 %3606 }
 0x4b3   : > { %v3921_v10 = vsel %vm1889_vm9, %v3889_v25, %v3607_v39  ;;  %v3225_v0 = vpop.permute.xlu0 %3224  ;;  %v2624_v39 = vld [vmem:[#allocation3 + $0x121] sm:$0xff] }
 0x4b4   : > { %3122 = vrot.lane.b32.xlu1 %v2621_v13, %s4815_s28  ;;  %4697 = vmatmul.mubr.msk.f32.gmra.mrb[4].mxu1 %vm1934_vm10, %v3921_v10  ;;  %v3826_v11 = vsel %vm1790_vm6, %v3794_v34, %v3225_v0  ;;  %v3733_v13 = vsel %vm1691_vm3, %v3701_v20, %v8480_v6  ;;  %v7495_v10 = vld [vmem:[#allocation3 + $0x128] sm:$0xff] }
 0x4b5   : > { %3628 = vrot.lane.b32.xlu0 %v6895_v47, %s4819_s17  ;;  %v3765_v58 = vsel %vm1724_vm4, %v3733_v13, %v7244_v57  ;;  %v2627_v6 = vld [vmem:[#allocation3 + $0x141] sm:$0xff]  ;;  %v8487_v13 = vld [vmem:[#allocation69_spill] sm:$0xff] }
 0x4b6   : > { %v3353_v23 = vpop.permute.xlu1 %3352 }
 0x4b7   : > { %v3227_v62 = vpop.permute.xlu0 %3226  ;;  %v3858_v54 = vsel %vm1823_vm7, %v3826_v11, %v3353_v23 }
 0x4b8   : > { %3630 = vrot.lane.b32.xlu1 %v8475_v8, %s4819_s17 }
 0x4b9   : > { %3248 = vrot.lane.b32.xlu0 %v6895_v47, %s4816_s29 }
 0x4ba   : > { %v3481_v27 = vpop.permute.xlu1 %3480 }
 0x4bb   : > { %v3355_v31 = vpop.permute.xlu0 %3354  ;;  %v3890_v44 = vsel %vm1856_vm8, %v3858_v54, %v3481_v27  ;;  %v2562_v54 = vld [vmem:[#allocation3 + $0x12a] sm:$0xff] }
 0x4bc   : > { %3376 = vrot.lane.b32.xlu1 %v7045_v15, %s4817_s30  ;;  %v3699_v15 = vsel %vm225_vm0, %v6947_v42, %v8477_v45 }
 0x4bd   : > { %3250 = vrot.lane.b32.xlu0 %v8475_v8, %s4816_s29  ;;  %v3731_v3 = vsel %vm1691_vm3, %v3699_v15, %v7108_v48  ;;  %v8482_v15 = vld [vmem:[#allocation136_spill] sm:$0xff] }
 0x4be   : > { %v3483_v32 = vpop.permute.xlu1 %3482  ;;  %v3763_v22 = vsel %vm1724_vm4, %v3731_v3, %v7236_v24 }
 0x4bf   : > { %v3101_v47 = vpop.permute.xlu0 %3100  ;;  %v3795_v50 = vsel %vm1757_vm5, %v3763_v22, %v3099_v55 }
 0x4c0   : > { %3504 = vrot.lane.b32.xlu1 %v2622_v30, %s4818_s14  ;;  %v3827_v12 = vsel %vm1790_vm6, %v3795_v50, %v3227_v62  ;;  %v3796_v28 = vsel %vm1757_vm5, %v3764_v60, %v3101_v47  ;;  %v8484_v50 = vld [vmem:[#allocation71_spill] sm:$0xff] }
 0x4c1   : > { %3378 = vrot.lane.b32.xlu0 %v7440_v36, %s4817_s30  ;;  %v3859_v59 = vsel %vm1823_vm7, %v3827_v12, %v3355_v31 }
 0x4c2   : > { %v3103_v42 = vpop.permute.xlu1 %3102  ;;  %v3891_v24 = vsel %vm1856_vm8, %v3859_v59, %v3483_v32  ;;  %v2625_v32 = vld [vmem:[#allocation3 + $0x129] sm:$0xff]  ;;  %v8486_v59 = vld [vmem:[#allocation101_spill] sm:$0xff] }
 0x4c3   : > { %v3609_v18 = vpop.permute.xlu0 %3608  ;;  %v3797_v52 = vsel %vm1757_vm5, %v3765_v58, %v3103_v42  ;;  %v8483_v42 = vld [vmem:[#allocation64_spill] sm:$0xff] }
 0x4c4   : > { %v3922_v48 = vsel %vm1889_vm9, %v3890_v44, %v3609_v18  ;;  %3124 = vrot.lane.b32.xlu1 %v2622_v30, %s4815_s28  ;;  %v8481_v30 = vld [vmem:[#allocation11_spill] sm:$0xff]  ;;  %v3703_v44 = vsel %vm225_vm0, %v8484_v50, %v8483_v42  ;;  %v2501_v50 = vld [vmem:[#allocation3 + $0x150] sm:$0xff] }
 0x4c5   : > { %2998 = vrot.lane.b32.xlu0 %v7440_v36, %s4814_s27  ;;  %4699 = vmatprep.mubr.msk.f32.mxu1 %vm1934_vm10, %v3922_v48  ;;  %v3702_v45 = vsel %vm225_vm0, %v6975_v35, %v8481_v30  ;;  %v8485_v35 = vld [vmem:[#allocation8_spill] sm:$0xff] }
 0x4c6   : > { %v3611_v51 = vpop.permute.xlu1 %3610  ;;  %v3734_v34 = vsel %vm1691_vm3, %v3702_v45, %v8482_v15  ;;  %v3735_v12 = vsel %vm1691_vm3, %v3703_v44, %v8485_v35  ;;  %v2564_v45 = vld [vmem:[#allocation3 + $0x142] sm:$0xff]  ;;  %v2628_v35 = vld [vmem:[#allocation3 + $0x151] sm:$0xff] }
 0x4c7   : > { %v3923_v61 = vsel %vm1889_vm9, %v3891_v24, %v3611_v51  ;;  %v3229_v1 = vpop.permute.xlu0 %3228  ;;  %v3766_v11 = vsel %vm1724_vm4, %v3734_v34, %v7254_v49  ;;  %v3767_v49 = vsel %vm1724_vm4, %v3735_v12, %v8486_v59  ;;  %v2597_v12 = vld [vmem:[#allocation3 + $0x158] sm:$0xff] }
 0x4c8   : > { %3632 = vrot.lane.b32.xlu1 %v2654_v43, %s4819_s17  ;;  %4700 = vmatmul.mubr.msk.f32.gmra.mrb[6].mxu1 %vm1934_vm10, %v3923_v61  ;;  %v3828_v16 = vsel %vm1790_vm6, %v3796_v28, %v3229_v1  ;;  %v7533_v61 = vld [vmem:[#allocation3 + $0x138] sm:$0xff] }
 0x4c9   : > { %3506 = vrot.lane.b32.xlu0 %v2623_v56, %s4818_s14  ;;  %v2658_v28 = vld [vmem:[#allocation3 + $0x13a] sm:$0xff] }
 0x4ca   : > { %v3357_v37 = vpop.permute.xlu1 %3356 }
 0x4cb   : > { %v3231_v29 = vpop.permute.xlu0 %3230  ;;  %v3860_v40 = vsel %vm1823_vm7, %v3828_v16, %v3357_v37  ;;  %v8488_v16 = vld [vmem:[#allocation73_spill] sm:$0xff] }
 0x4cc   : > { %3252 = vrot.lane.b32.xlu1 %v2654_v43, %s4816_s29  ;;  %v3829_v0 = vsel %vm1790_vm6, %v3797_v52, %v3231_v29  ;;  %v3704_v58 = vsel %vm225_vm0, %v8488_v16, %v8487_v13 }
 0x4cd   : > { %3126 = vrot.lane.b32.xlu0 %v2623_v56, %s4815_s28 }
 0x4ce   : > { %v3485_v9 = vpop.permute.xlu1 %3484 }
 0x4cf   : > { %v3359_v4 = vpop.permute.xlu0 %3358  ;;  %v3892_v21 = vsel %vm1856_vm8, %v3860_v40, %v3485_v9  ;;  %v8489_v40 = vld [vmem:[#allocation135_spill] sm:$0xff] }
 0x4d0   : > { %3254 = vrot.lane.b32.xlu1 %v2560_v14, %s4816_s29  ;;  %v3861_v62 = vsel %vm1823_vm7, %v3829_v0, %v3359_v4  ;;  %v8491_v0 = vld [vmem:[#allocation19_spill] sm:$0xff] }
 0x4d1   : > { %3634 = vrot.lane.b32.xlu0 %v2560_v14, %s4819_s17 }
 0x4d2   : > { %v3487_v33 = vpop.permute.xlu1 %3486 }
 0x4d3   : > { %v3105_v55 = vpop.permute.xlu0 %3104  ;;  %v3893_v57 = vsel %vm1856_vm8, %v3861_v62, %v3487_v33  ;;  %v2595_v33 = vld [vmem:[#allocation3 + $0x140] sm:$0xff] }
 0x4d4   : > { %3000 = vrot.lane.b32.xlu1 %v7475_v7, %s4814_s27  ;;  %v3798_v18 = vsel %vm1757_vm5, %v3766_v11, %v3105_v55 }
 0x4d5   : > { %3380 = vrot.lane.b32.xlu0 %v7475_v7, %s4817_s30 }
 0x4d6   : > { %v3107_v26 = vpop.permute.xlu1 %3106 }
 0x4d7   : > { %v3613_v25 = vpop.permute.xlu0 %3612  ;;  %v3799_v1 = vsel %vm1757_vm5, %v3767_v49, %v3107_v26  ;;  %v3736_v26 = vsel %vm1691_vm3, %v3704_v58, %v8489_v40  ;;  %v8495_v49 = vld [vmem:[#allocation72_spill] sm:$0xff] }
 0x4d8   : > { %v3924_v23 = vsel %vm1889_vm9, %v3892_v21, %v3613_v25  ;;  %3508 = vrot.lane.b32.xlu1 %v2624_v39, %s4818_s14  ;;  %v8490_v21 = vld [vmem:[#allocation21_spill] sm:$0xff] }
 0x4d9   : > { %3382 = vrot.lane.b32.xlu0 %v7495_v10, %s4817_s30  ;;  %4702 = vmatprep.mubr.msk.f32.mxu1 %vm1934_vm10, %v3924_v23  ;;  %v3768_v25 = vsel %vm1724_vm4, %v3736_v26, %v8490_v21  ;;  %v8492_v23 = vld [vmem:[#allocation74_spill] sm:$0xff] }
 0x4da   : > { %v3615_v8 = vpop.permute.xlu1 %3614  ;;  %v3705_v62 = vsel %vm225_vm0, %v8492_v23, %v8491_v0 }
 0x4db   : > { %v3925_v27 = vsel %vm1889_vm9, %v3893_v57, %v3615_v8  ;;  %v3233_v31 = vpop.permute.xlu0 %3232  ;;  %v8493_v8 = vld [vmem:[#allocation59_spill] sm:$0xff] }
 0x4dc   : > { %3128 = vrot.lane.b32.xlu1 %v2624_v39, %s4815_s28  ;;  %4703 = vmatmul.mubr.msk.f32.gmra.mrb[8].mxu1 %vm1934_vm10, %v3925_v27  ;;  %v3830_v48 = vsel %vm1790_vm6, %v3798_v18, %v3233_v31  ;;  %v3737_v27 = vsel %vm1691_vm3, %v3705_v62, %v8493_v8  ;;  %v2566_v62 = vld [vmem:[#allocation3 + $0x15a] sm:$0xff] }
 0x4dd   : > { %3002 = vrot.lane.b32.xlu0 %v7495_v10, %s4814_s27 }
 0x4de   : > { %v3361_v46 = vpop.permute.xlu1 %3360 }
 0x4df   : > { %v3235_v5 = vpop.permute.xlu0 %3234  ;;  %v3862_v24 = vsel %vm1823_vm7, %v3830_v48, %v3361_v46  ;;  %v8494_v46 = vld [vmem:[#allocation70_spill] sm:$0xff] }
 0x4e0   : > { %3636 = vrot.lane.b32.xlu1 %v2656_v38, %s4819_s17  ;;  %v3831_v37 = vsel %vm1790_vm6, %v3799_v1, %v3235_v5  ;;  %v3769_v5 = vsel %vm1724_vm4, %v3737_v27, %v8494_v46  ;;  %v8497_v1 = vld [vmem:[#allocation79_spill] sm:$0xff] }
 0x4e1   : > { %3510 = vrot.lane.b32.xlu0 %v2625_v32, %s4818_s14  ;;  %v2503_v27 = vld [vmem:[#allocation3 + $0x168] sm:$0xff] }
 0x4e2   : > { %v3489_v63 = vpop.permute.xlu1 %3488 }
 0x4e3   : > { %v3363_v47 = vpop.permute.xlu0 %3362  ;;  %v3894_v43 = vsel %vm1856_vm8, %v3862_v24, %v3489_v63  ;;  %v8496_v24 = vld [vmem:[#allocation22_spill] sm:$0xff] }
 0x4e4   : > { %3256 = vrot.lane.b32.xlu1 %v2656_v38, %s4816_s29  ;;  %v3863_v9 = vsel %vm1823_vm7, %v3831_v37, %v3363_v47  ;;  %v8498_v37 = vld [vmem:[#allocation67_spill] sm:$0xff] }
 0x4e5   : > { %3130 = vrot.lane.b32.xlu0 %v2625_v32, %s4815_s28 }
 0x4e6   : > { %v3491_v3 = vpop.permute.xlu1 %3490 }
 0x4e7   : > { %v3109_v22 = vpop.permute.xlu0 %3108  ;;  %v3895_v4 = vsel %vm1856_vm8, %v3863_v9, %v3491_v3 }
 0x4e8   : > { %3258 = vrot.lane.b32.xlu1 %v2562_v54, %s4816_s29  ;;  %v3800_v57 = vsel %vm1757_vm5, %v3768_v25, %v3109_v22 }
 0x4e9   : > { %3638 = vrot.lane.b32.xlu0 %v2562_v54, %s4819_s17 }
 0x4ea   : > { %v3111_v51 = vpop.permute.xlu1 %3110 }
 0x4eb   : > { %v3617_v56 = vpop.permute.xlu0 %3616  ;;  %v3801_v63 = vsel %vm1757_vm5, %v3769_v5, %v3111_v51  ;;  %v3706_v51 = vsel %vm225_vm0, %v8496_v24, %v8495_v49  ;;  %v2630_v5 = vld [vmem:[#allocation3 + $0x169] sm:$0xff] }
 0x4ec   : > { %v3926_v29 = vsel %vm1889_vm9, %v3894_v43, %v3617_v56  ;;  %3004 = vrot.lane.b32.xlu1 %v7533_v61, %s4814_s27  ;;  %v3738_v43 = vsel %vm1691_vm3, %v3706_v51, %v8497_v1  ;;  %v2662_v51 = vld [vmem:[#allocation3 + $0x16a] sm:$0xff] }
 0x4ed   : > { %3384 = vrot.lane.b32.xlu0 %v7533_v61, %s4817_s30  ;;  %4705 = vmatprep.mubr.msk.f32.mxu1 %vm1934_vm10, %v3926_v29  ;;  %v3770_v29 = vsel %vm1724_vm4, %v3738_v43, %v8498_v37 }
 0x4ee   : > { %v3619_v14 = vpop.permute.xlu1 %3618 }
 0x4ef   : > { %v3927_v17 = vsel %vm1889_vm9, %v3895_v4, %v3619_v14  ;;  %v3237_v19 = vpop.permute.xlu0 %3236  ;;  %v2660_v4 = vld [vmem:[#allocation3 + $0x152] sm:$0xff] }
 0x4f0   : > { %3512 = vrot.lane.b32.xlu1 %v2626_v2, %s4818_s14  ;;  %4706 = vmatmul.mubr.msk.f32.gmra.mrb[10].mxu1 %vm1934_vm10, %v3927_v17  ;;  %v3832_v31 = vsel %vm1790_vm6, %v3800_v57, %v3237_v19  ;;  %v8499_v14 = vld [vmem:[#allocation68_spill] sm:$0xff] }
 0x4f1   : > { %3386 = vrot.lane.b32.xlu0 %v2595_v33, %s4817_s30  ;;  %v8500_v17 = vld [vmem:[#allocation16_spill] sm:$0xff] }
 0x4f2   : > { %v3365_v60 = vpop.permute.xlu1 %3364  ;;  %v3707_v19 = vsel %vm225_vm0, %v8500_v17, %v8499_v14 }
 0x4f3   : > { %v3239_v55 = vpop.permute.xlu0 %3238  ;;  %v3864_v38 = vsel %vm1823_vm7, %v3832_v31, %v3365_v60  ;;  %v8501_v60 = vld [vmem:[#allocation30_spill] sm:$0xff] }
 0x4f4   : > { %3132 = vrot.lane.b32.xlu1 %v2626_v2, %s4815_s28  ;;  %v3833_v15 = vsel %vm1790_vm6, %v3801_v63, %v3239_v55  ;;  %v3739_v55 = vsel %vm1691_vm3, %v3707_v19, %v8501_v60  ;;  %v8504_v63 = vld [vmem:[#allocation6_spill] sm:$0xff] }
 0x4f5   : > { %3006 = vrot.lane.b32.xlu0 %v2595_v33, %s4814_s27  ;;  %v2629_v33 = vld [vmem:[#allocation3 + $0x159] sm:$0xff] }
 0x4f6   : > { %v3493_v41 = vpop.permute.xlu1 %3492 }
 0x4f7   : > { %v3367_v20 = vpop.permute.xlu0 %3366  ;;  %v3896_v47 = vsel %vm1856_vm8, %v3864_v38, %v3493_v41  ;;  %v2599_v38 = vld [vmem:[#allocation3 + $0x170] sm:$0xff] }
 0x4f8   : > { %3640 = vrot.lane.b32.xlu1 %v2658_v28, %s4819_s17  ;;  %v3865_v3 = vsel %vm1823_vm7, %v3833_v15, %v3367_v20  ;;  %v8502_v20 = vld [vmem:[#allocation140_spill] sm:$0xff] }
 0x4f9   : > { %3514 = vrot.lane.b32.xlu0 %v2627_v6, %s4818_s14 }
 0x4fa   : > { %v3495_v52 = vpop.permute.xlu1 %3494 }
 0x4fb   : > { %v3113_v39 = vpop.permute.xlu0 %3112  ;;  %v3897_v11 = vsel %vm1856_vm8, %v3865_v3, %v3495_v52 }
 0x4fc   : > { %3260 = vrot.lane.b32.xlu1 %v2658_v28, %s4816_s29  ;;  %v3802_v2 = vsel %vm1757_vm5, %v3770_v29, %v3113_v39  ;;  %v3771_v28 = vsel %vm1724_vm4, %v3739_v55, %v8502_v20  ;;  %v2505_v55 = vld [vmem:[#allocation3 + $0x180] sm:$0xff]  ;;  %v8510_v20 = vld [vmem:[#allocation75_spill] sm:$0xff] }
 0x4fd   : > { %3134 = vrot.lane.b32.xlu0 %v2627_v6, %s4815_s28 }
 0x4fe   : > { %v3115_v32 = vpop.permute.xlu1 %3114 }
 0x4ff   : > { %v3621_v30 = vpop.permute.xlu0 %3620  ;;  %v3803_v16 = vsel %vm1757_vm5, %v3771_v28, %v3115_v32  ;;  %v8503_v32 = vld [vmem:[#allocation12_spill] sm:$0xff] }
 0x500   : > { %v3928_v34 = vsel %vm1889_vm9, %v3896_v47, %v3621_v30  ;;  %3262 = vrot.lane.b32.xlu1 %v2564_v45, %s4816_s29  ;;  %v3708_v47 = vsel %vm225_vm0, %v8504_v63, %v8503_v32  ;;  %v8505_v30 = vld [vmem:[#allocation100_spill] sm:$0xff]  ;;  %v8515_v63 = vld [vmem:[#allocation83_spill] sm:$0xff] }
 0x501   : > { %3642 = vrot.lane.b32.xlu0 %v2564_v45, %s4819_s17  ;;  %4708 = vmatprep.mubr.msk.f32.mxu1 %vm1934_vm10, %v3928_v34  ;;  %v3740_v45 = vsel %vm1691_vm3, %v3708_v47, %v8505_v30  ;;  %v8506_v34 = vld [vmem:[#allocation38_spill] sm:$0xff] }
 0x502   : > { %v3623_v22 = vpop.permute.xlu1 %3622  ;;  %v3772_v3 = vsel %vm1724_vm4, %v3740_v45, %v8506_v34  ;;  %v2664_v45 = vld [vmem:[#allocation3 + $0x182] sm:$0xff] }
 0x503   : > { %v3929_v54 = vsel %vm1889_vm9, %v3897_v11, %v3623_v22  ;;  %v3241_v42 = vpop.permute.xlu0 %3240  ;;  %v8507_v22 = vld [vmem:[#allocation15_spill] sm:$0xff] }
 0x504   : > { %3008 = vrot.lane.b32.xlu1 %v2501_v50, %s4814_s27  ;;  %4709 = vmatmul.mubr.msk.f32.gmra.mrb[12].mxu1 %vm1934_vm10, %v3929_v54  ;;  %v3834_v41 = vsel %vm1790_vm6, %v3802_v2, %v3241_v42  ;;  %v3709_v54 = vsel %vm225_vm0, %v7007_v53, %v8507_v22  ;;  %v2568_v2 = vld [vmem:[#allocation3 + $0x172] sm:$0xff]  ;;  %v2633_v34 = vld [vmem:[#allocation3 + $0x189] sm:$0xff] }
 0x505   : > { %3388 = vrot.lane.b32.xlu0 %v2501_v50, %s4817_s30  ;;  %v8508_v50 = vld [vmem:[#allocation28_spill] sm:$0xff] }
 0x506   : > { %v3369_v44 = vpop.permute.xlu1 %3368 }
 0x507   : > { %v3243_v18 = vpop.permute.xlu0 %3242  ;;  %v3866_v6 = vsel %vm1823_vm7, %v3834_v41, %v3369_v44  ;;  %v3741_v44 = vsel %vm1691_vm3, %v3709_v54, %v8508_v50  ;;  %v4798_v41 = vld [vmem:[#allocation3 + $0xd8] sm:$0xff] }
 0x508   : > { %3516 = vrot.lane.b32.xlu1 %v2628_v35, %s4818_s14  ;;  %v3835_v26 = vsel %vm1790_vm6, %v3803_v16, %v3243_v18  ;;  %v3710_v28 = vsel %vm225_vm0, %v4798_v41, %v8510_v20  ;;  %v8512_v16 = vld [vmem:[#allocation36_spill] sm:$0xff]  ;;  %v2666_v41 = vld [vmem:[#allocation3 + $0x19a] sm:$0xff] }
 0x509   : > { %3390 = vrot.lane.b32.xlu0 %v2597_v12, %s4817_s30 }
 0x50a   : > { %v3497_v48 = vpop.permute.xlu1 %3496 }
 0x50b   : > { %v3371_v59 = vpop.permute.xlu0 %3370  ;;  %v3898_v58 = vsel %vm1856_vm8, %v3866_v6, %v3497_v48  ;;  %v8511_v6 = vld [vmem:[#allocation17_spill] sm:$0xff] }
 0x50c   : > { %3136 = vrot.lane.b32.xlu1 %v2628_v35, %s4815_s28  ;;  %v3867_v21 = vsel %vm1823_vm7, %v3835_v26, %v3371_v59  ;;  %v8509_v35 = vld [vmem:[#allocation139_spill] sm:$0xff] }
 0x50d   : > { %3010 = vrot.lane.b32.xlu0 %v2597_v12, %s4814_s27  ;;  %v3773_v12 = vsel %vm1724_vm4, %v3741_v44, %v8509_v35  ;;  %v2570_v35 = vld [vmem:[#allocation3 + $0x18a] sm:$0xff] }
 0x50e   : > { %v3499_v56 = vpop.permute.xlu1 %3498 }
 0x50f   : > { %v3117_v9 = vpop.permute.xlu0 %3116  ;;  %v3899_v25 = vsel %vm1856_vm8, %v3867_v21, %v3499_v56  ;;  %v2631_v56 = vld [vmem:[#allocation3 + $0x171] sm:$0xff]  ;;  %v2632_v21 = vld [vmem:[#allocation3 + $0x181] sm:$0xff] }
 0x510   : > { %3644 = vrot.lane.b32.xlu1 %v2660_v4, %s4819_s17  ;;  %v3804_v42 = vsel %vm1757_vm5, %v3772_v3, %v3117_v9 }
 0x511   : > { %3518 = vrot.lane.b32.xlu0 %v2629_v33, %s4818_s14 }
 0x512   : > { %v3119_v13 = vpop.permute.xlu1 %3118 }
 0x513   : > { %v3625_v40 = vpop.permute.xlu0 %3624  ;;  %v3805_v49 = vsel %vm1757_vm5, %v3773_v12, %v3119_v13  ;;  %v3742_v13 = vsel %vm1691_vm3, %v3710_v28, %v8511_v6  ;;  %v2603_v12 = vld [vmem:[#allocation3 + $0x1a0] sm:$0xff]  ;;  %v4801_v6 = vld [vmem:[#allocation3 + $0xf8] sm:$0xff] }
 0x514   : > { %v3930_v52 = vsel %vm1889_vm9, %v3898_v58, %v3625_v40  ;;  %3264 = vrot.lane.b32.xlu1 %v2660_v4, %s4816_s29  ;;  %v3774_v58 = vsel %vm1724_vm4, %v3742_v13, %v8512_v16  ;;  %v8519_v13 = vld [vmem:[#allocation20_spill] sm:$0xff] }
 0x515   : > { %3138 = vrot.lane.b32.xlu0 %v2629_v33, %s4815_s28  ;;  %4711 = vmatprep.mubr.msk.f32.mxu1 %vm1934_vm10, %v3930_v52  ;;  %v3713_v16 = vsel %vm225_vm0, %v4801_v6, %v8519_v13 }
 0x516   : > { %v3627_v39 = vpop.permute.xlu1 %3626 }
 0x517   : > { %v3931_v0 = vsel %vm1889_vm9, %v3899_v25, %v3627_v39  ;;  %v3245_v23 = vpop.permute.xlu0 %3244  ;;  %v2601_v39 = vld [vmem:[#allocation3 + $0x188] sm:$0xff] }
 0x518   : > { %3266 = vrot.lane.b32.xlu1 %v2566_v62, %s4816_s29  ;;  %4712 = vmatmul.mubr.msk.f32.gmra.mrb[14].mxu1 %vm1934_vm10, %v3931_v0  ;;  %v3836_v18 = vsel %vm1790_vm6, %v3804_v42, %v3245_v23 }
 0x519   : > { %3646 = vrot.lane.b32.xlu0 %v2566_v62, %s4819_s17 }
 0x51a   : > { %v3373_v57 = vpop.permute.xlu1 %3372 }
 0x51b   : > { %v3247_v8 = vpop.permute.xlu0 %3246  ;;  %v3868_v48 = vsel %vm1823_vm7, %v3836_v18, %v3373_v57 }
 0x51c   : > { %3012 = vrot.lane.b32.xlu1 %v2503_v27, %s4814_s27  ;;  %v3837_v1 = vsel %vm1790_vm6, %v3805_v49, %v3247_v8 }
 0x51d   : > { %3392 = vrot.lane.b32.xlu0 %v2503_v27, %s4817_s30  ;;  %v4799_v27 = vld [vmem:[#allocation3 + $0xe0] sm:$0xff] }
 0x51e   : > { %v3501_v31 = vpop.permute.xlu1 %3500 }
 0x51f   : > { %v3375_v46 = vpop.permute.xlu0 %3374  ;;  %v3900_v53 = vsel %vm1856_vm8, %v3868_v48, %v3501_v31  ;;  %v8513_v31 = vld [vmem:[#allocation18_spill] sm:$0xff] }
 0x520   : > { %3520 = vrot.lane.b32.xlu1 %v2630_v5, %s4818_s14  ;;  %v3869_v37 = vsel %vm1823_vm7, %v3837_v1, %v3375_v46  ;;  %v3711_v46 = vsel %vm225_vm0, %v4799_v27, %v8513_v31  ;;  %v8517_v1 = vld [vmem:[#allocation65_spill] sm:$0xff] }
 0x521   : > { %3394 = vrot.lane.b32.xlu0 %v2599_v38, %s4817_s30 }
 0x522   : > { %v3503_v15 = vpop.permute.xlu1 %3502 }
 0x523   : > { %v3121_v11 = vpop.permute.xlu0 %3120  ;;  %v3901_v29 = vsel %vm1856_vm8, %v3869_v37, %v3503_v15  ;;  %v8518_v37 = vld [vmem:[#allocation104_spill] sm:$0xff] }
 0x524   : > { %3140 = vrot.lane.b32.xlu1 %v2630_v5, %s4815_s28  ;;  %v3806_v26 = vsel %vm1757_vm5, %v3774_v58, %v3121_v11  ;;  %v8514_v5 = vld [vmem:[#allocation78_spill] sm:$0xff]  ;;  %v8520_v58 = vld [vmem:[#allocation99_spill] sm:$0xff] }
 0x525   : > { %3014 = vrot.lane.b32.xlu0 %v2599_v38, %s4814_s27  ;;  %v3743_v38 = vsel %vm1691_vm3, %v3711_v46, %v8514_v5  ;;  %v4285_v5 = vld [vmem:[%s5092_s24 + $0x8] sm:$0xff] }
 0x526   : > { %v3123_v59 = vpop.permute.xlu1 %3122  ;;  %v3775_v47 = vsel %vm1724_vm4, %v3743_v38, %v8515_v63 }
 0x527   : > { %v3629_v24 = vpop.permute.xlu0 %3628  ;;  %v3807_v15 = vsel %vm1757_vm5, %v3775_v47, %v3123_v59  ;;  %v2602_v59 = vld [vmem:[#allocation3 + $0x198] sm:$0xff]  ;;  %v4284_v47 = vld [vmem:[%s5092_s24] sm:$0xff] }
 0x528   : > { %v3932_v43 = vsel %vm1889_vm9, %v3900_v53, %v3629_v24  ;;  %3648 = vrot.lane.b32.xlu1 %v2662_v51, %s4819_s17  ;;  %v4800_v53 = vld [vmem:[#allocation3 + $0xf0] sm:$0xff]  ;;  %v8516_v24 = vld [vmem:[#allocation57_spill] sm:$0xff] }
 0x529   : > { %3522 = vrot.lane.b32.xlu0 %v2631_v56, %s4818_s14  ;;  %4714 = vmatprep.mubr.msk.f32.mxu1 %vm1934_vm10, %v3932_v43 }
 0x52a   : > { %v3631_v9 = vpop.permute.xlu1 %3630 }
 0x52b   : > { %v3933_v4 = vsel %vm1889_vm9, %v3901_v29, %v3631_v9  ;;  %v3249_v14 = vpop.permute.xlu0 %3248 }
 0x52c   : > { %3268 = vrot.lane.b32.xlu1 %v2662_v51, %s4816_s29  ;;  %4715 = vmatmul.mubr.msk.f32.gmra.mrb[16].mxu1 %vm1934_vm10, %v3933_v4  ;;  %v3838_v25 = vsel %vm1790_vm6, %v3806_v26, %v3249_v14  ;;  %v3712_v51 = vsel %vm225_vm0, %v4800_v53, %v8516_v24  ;;  %v2634_v4 = vld [vmem:[#allocation3 + $0x199] sm:$0xff] }
 0x52d   : > { %3142 = vrot.lane.b32.xlu0 %v2631_v56, %s4815_s28  ;;  %v3744_v43 = vsel %vm1691_vm3, %v3712_v51, %v8517_v1  ;;  %v2635_v56 = vld [vmem:[#allocation3 + $0x1a1] sm:$0xff] }
 0x52e   : > { %v3377_v17 = vpop.permute.xlu1 %3376  ;;  %v3776_v29 = vsel %vm1724_vm4, %v3744_v43, %v8518_v37 }
 0x52f   : > { %v3251_v19 = vpop.permute.xlu0 %3250  ;;  %v3870_v0 = vsel %vm1823_vm7, %v3838_v25, %v3377_v17 }
 0x530   : > { %3270 = vrot.lane.b32.xlu1 %v2568_v2, %s4816_s29  ;;  %v3839_v3 = vsel %vm1790_vm6, %v3807_v15, %v3251_v19 }
 0x531   : > { %3650 = vrot.lane.b32.xlu0 %v2568_v2, %s4819_s17 }
 0x532   : > { %v3505_v33 = vpop.permute.xlu1 %3504 }
 0x533   : > { %v3379_v60 = vpop.permute.xlu0 %3378  ;;  %v3902_v23 = vsel %vm1856_vm8, %v3870_v0, %v3505_v33  ;;  %v2667_v33 = vld [vmem:[#allocation3 + $0x1a2] sm:$0xff] }
 0x534   : > { %3016 = vrot.lane.b32.xlu1 %v2505_v55, %s4814_s27  ;;  %v3871_v11 = vsel %vm1823_vm7, %v3839_v3, %v3379_v60 }
 0x535   : > { %3396 = vrot.lane.b32.xlu0 %v2505_v55, %s4817_s30 }
 0x536   : > { %v3125_v40 = vpop.permute.xlu1 %3124 }
 0x537   : > { %v7669_v52 = vpop.permute.xlu0 %2998  ;;  %v3808_v14 = vsel %vm1757_vm5, %v3776_v29, %v3125_v40  ;;  %v3745_v40 = vsel %vm1691_vm3, %v3713_v16, %v8520_v58  ;;  %v8524_v29 = vld [vmem:[#allocation14_spill] sm:$0xff] }
 0x538   : > { %3524 = vrot.lane.b32.xlu1 %v2632_v21, %s4818_s14  ;;  %v4286_v16 = vld [vmem:[%s5092_s24 + $0x10] sm:$0xff] }
 0x539   : > { %3398 = vrot.lane.b32.xlu0 %v2601_v39, %s4817_s30 }
 0x53a   : > { %v3633_v62 = vpop.permute.xlu1 %3632 }
 0x53b   : > { %v3934_v57 = vsel %vm1889_vm9, %v3902_v23, %v3633_v62  ;;  %v3507_v8 = vpop.permute.xlu0 %3506 }
 0x53c   : > { %3144 = vrot.lane.b32.xlu1 %v2632_v21, %s4815_s28  ;;  %4717 = vmatprep.mubr.msk.f32.mxu1 %vm1934_vm10, %v3934_v57  ;;  %v3903_v54 = vsel %vm1856_vm8, %v3871_v11, %v3507_v8  ;;  %v3777_v21 = vsel %vm1724_vm4, %v3745_v40, %v7669_v52  ;;  %v7735_v52 = vld [vmem:[%s8001_s4] ss:$0 sm:$0xff]  ;;  %v4802_v11 = vld [vmem:[#allocation3 + $0x108] sm:$0xff] }
 0x53d   : > { %3018 = vrot.lane.b32.xlu0 %v2601_v39, %s4814_s27 }
 0x53e   : > { %v3253_v32 = vpop.permute.xlu1 %3252 }
 0x53f   : > { %v3127_v30 = vpop.permute.xlu0 %3126  ;;  %v3840_v19 = vsel %vm1790_vm6, %v3808_v14, %v3253_v32 }
 0x540   : > { %3652 = vrot.lane.b32.xlu1 %v2664_v45, %s4819_s17  ;;  %v3809_v39 = vsel %vm1757_vm5, %v3777_v21, %v3127_v30 }
 0x541   : > { %3526 = vrot.lane.b32.xlu0 %v2633_v34, %s4818_s14 }
 0x542   : > { %v3255_v22 = vpop.permute.xlu1 %3254 }
 0x543   : > { %v3635_v42 = vpop.permute.xlu0 %3634  ;;  %v3841_v0 = vsel %vm1790_vm6, %v3809_v39, %v3255_v22  ;;  %v8521_v22 = vld [vmem:[#allocation55_spill] sm:$0xff] }
 0x544   : > { %v3935_v50 = vsel %vm1889_vm9, %v3903_v54, %v3635_v42  ;;  %3272 = vrot.lane.b32.xlu1 %v2664_v45, %s4816_s29  ;;  %v3714_v54 = vsel %vm225_vm0, %v4802_v11, %v8521_v22  ;;  %v8528_v11 = vld [vmem:[#allocation63_spill] sm:$0xff] }
 0x545   : > { %3146 = vrot.lane.b32.xlu0 %v2633_v34, %s4815_s28  ;;  %4718 = vmatmul.mubr.msk.f32.gmra.mrb[18].mxu1 %vm1934_vm10, %v3935_v50  ;;  %v8522_v50 = vld [vmem:[#allocation138_spill] sm:$0xff] }
 0x546   : > { %v7696_v44 = vpop.permute.xlu1 %3000 }
 0x547   : > { %v3381_v18 = vpop.permute.xlu0 %3380 }
 0x548   : > { %3274 = vrot.lane.b32.xlu1 %v2570_v35, %s4816_s29  ;;  %v3872_v2 = vsel %vm1823_vm7, %v3840_v19, %v3381_v18  ;;  %v3746_v18 = vsel %vm1691_vm3, %v3714_v54, %v8522_v50 }
 0x549   : > { %3654 = vrot.lane.b32.xlu0 %v2570_v35, %s4819_s17 }
 0x54a   : > { %v3509_v48 = vpop.permute.xlu1 %3508 }
 0x54b   : > { %v3383_v49 = vpop.permute.xlu0 %3382  ;;  %v3904_v60 = vsel %vm1856_vm8, %v3872_v2, %v3509_v48 }
 0x54c   : > { %3402 = vrot.lane.b32.xlu1 %v2603_v12, %s4817_s30  ;;  %v3873_v23 = vsel %vm1823_vm7, %v3841_v0, %v3383_v49  ;;  %v3778_v12 = vsel %vm1724_vm4, %v3746_v18, %v7696_v44  ;;  %v8523_v44 = vld [vmem:[#allocation134_spill] sm:$0xff] }
 0x54d   : > { %3400 = vrot.lane.b32.xlu0 %v2602_v59, %s4817_s30  ;;  %v3715_v37 = vsel %vm225_vm0, %v7440_v36, %v8523_v44 }
 0x54e   : > { %v3129_v9 = vpop.permute.xlu1 %3128 }
 0x54f   : > { %v7709_v17 = vpop.permute.xlu0 %3002  ;;  %v3810_v59 = vsel %vm1757_vm5, %v3778_v12, %v3129_v9  ;;  %v3747_v9 = vsel %vm1691_vm3, %v3715_v37, %v8524_v29 }
 0x550   : > { %3530 = vrot.lane.b32.xlu1 %v2635_v56, %s4818_s14  ;;  %v3779_v14 = vsel %vm1724_vm4, %v3747_v9, %v7709_v17 }
 0x551   : > { %3528 = vrot.lane.b32.xlu0 %v2634_v4, %s4818_s14 }
 0x552   : > { %v3637_v55 = vpop.permute.xlu1 %3636 }
 0x553   : > { %v3936_v20 = vsel %vm1889_vm9, %v3904_v60, %v3637_v55  ;;  %v3511_v28 = vpop.permute.xlu0 %3510 }
 0x554   : > { %3658 = vrot.lane.b32.xlu1 %v2667_v33, %s4819_s17  ;;  %4720 = vmatprep.mubr.msk.f32.mxu1 %vm1934_vm10, %v3936_v20  ;;  %v3905_v57 = vsel %vm1856_vm8, %v3873_v23, %v3511_v28  ;;  %v4287_v20 = vld [vmem:[%s5092_s24 + $0x18] sm:$0xff] }
 0x555   : > { %3656 = vrot.lane.b32.xlu0 %v2666_v41, %s4819_s17 }
 0x556   : > { %v3257_v26 = vpop.permute.xlu1 %3256 }
 0x557   : > { %v3131_v25 = vpop.permute.xlu0 %3130  ;;  %v3842_v53 = vsel %vm1790_vm6, %v3810_v59, %v3257_v26 }
 0x558   : > { %v3811_v2 = vsel %vm1757_vm5, %v3779_v14, %v3131_v25 }
 0x55a   : > { %v3259_v62 = vpop.permute.xlu1 %3258 }
 0x55b   : > { %v3639_v8 = vpop.permute.xlu0 %3638  ;;  %v3843_v33 = vsel %vm1790_vm6, %v3811_v2, %v3259_v62 }
 0x55c   : > { %v3937_v27 = vsel %vm1889_vm9, %v3905_v57, %v3639_v8  ;;  %v8525_v57 = vld [vmem:[#allocation26_spill] sm:$0xff] }
 0x55d   : > { %4721 = vmatmul.mubr.msk.f32.gmra.mrb[20].mxu1 %vm1934_vm10, %v3937_v27  ;;  %v3716_v8 = vsel %vm225_vm0, %v7475_v7, %v8525_v57  ;;  %v8526_v27 = vld [vmem:[#allocation137_spill] sm:$0xff] }
 0x55e   : > { %v7737_v31 = vpop.permute.xlu1 %3004 }
 0x55f   : > { %v4692_v46 = vpop.f32.mrb[0].mxu1  ;;  %v3385_v38 = vpop.permute.xlu0 %3384 }
 0x560   : > { %v4131_v32 = vadd.f32 %v4692_v46, %v7735_v52  ;;  %v4125_v63 = vpop.f32.mrb[1].mxu1  ;;  %v3874_v24 = vsel %vm1823_vm7, %v3842_v53, %v3385_v38  ;;  %v3748_v46 = vsel %vm1691_vm3, %v3716_v8, %v8526_v27  ;;  %v4288_v53 = vld [vmem:[%s5092_s24 + $0x20] sm:$0xff]  ;;  %v8532_v27 = vld [vmem:[#allocation34_spill] sm:$0xff] }
 0x561   : > { %v4126_v30 = vadd.f32 %v7735_v52, %v4125_v63 }
 0x562   : > { %v4317_v45 = vadd.f32 %v4285_v5, %v4131_v32  ;;  %v3513_v15 = vpop.permute.xlu1 %3512  ;;  %v3780_v5 = vsel %vm1724_vm4, %v3748_v46, %v7737_v31 }
 0x563   : > { %v4316_v34 = vadd.f32 %v4284_v47, %v4126_v30  ;;  %v3387_v3 = vpop.permute.xlu0 %3386  ;;  %v3906_v51 = vsel %vm1856_vm8, %v3874_v24, %v3513_v15 }
 0x564   : > { %v4349_v42 = vmax.f32 %v4317_v45, 0.0  ;;  %v3875_v60 = vsel %vm1823_vm7, %v3843_v33, %v3387_v3  ;;  %v8527_v3 = vld [vmem:[#allocation133_spill] sm:$0xff]  ;;  %v8529_v33 = vld [vmem:[#allocation24_spill] sm:$0xff] }
 0x565   : > { %v4348_v35 = vmax.f32 %v4316_v34, 0.0  ;;  %v3717_v31 = vsel %vm225_vm0, %v7495_v10, %v8527_v3 }
 0x566   : > { %4381 = vst.msk [vmem:[%s7748_s13 + $0x8] sm:$0xff] %vm225_vm0, %v4349_v42  ;;  %v3133_v48 = vpop.permute.xlu1 %3132  ;;  %v3749_v22 = vsel %vm1691_vm3, %v3717_v31, %v8528_v11 }
 0x567   : > { %4380 = vst.msk [vmem:[%s7748_s13] sm:$0xff] %vm225_vm0, %v4348_v35  ;;  %v3007_v49 = vpop.permute.xlu0 %3006  ;;  %v3812_v32 = vsel %vm1757_vm5, %v3780_v5, %v3133_v48  ;;  %v4289_v35 = vld [vmem:[%s5092_s24 + $0x28] sm:$0xff] }
 0x568   : > { %v3781_v42 = vsel %vm1724_vm4, %v3749_v22, %v3007_v49 }
 0x56a   : > { %v3641_v1 = vpop.permute.xlu1 %3640 }
 0x56b   : > { %v3938_v43 = vsel %vm1889_vm9, %v3906_v51, %v3641_v1  ;;  %v3515_v56 = vpop.permute.xlu0 %3514 }
 0x56c   : > { %4723 = vmatprep.mubr.msk.f32.mxu1 %vm1934_vm10, %v3938_v43  ;;  %v3907_v41 = vsel %vm1856_vm8, %v3875_v60, %v3515_v56  ;;  %v3718_v60 = vsel %vm225_vm0, %v7533_v61, %v8529_v33 }
 0x56e   : > { %v3261_v4 = vpop.permute.xlu1 %3260 }
 0x56f   : > { %v3135_v19 = vpop.permute.xlu0 %3134  ;;  %v3844_v47 = vsel %vm1790_vm6, %v3812_v32, %v3261_v4 }
 0x570   : > { %v3813_v12 = vsel %vm1757_vm5, %v3781_v42, %v3135_v19 }
 0x572   : > { %v3263_v55 = vpop.permute.xlu1 %3262 }
 0x573   : > { %v4695_v36 = vpop.f32.mrb[2].mxu1  ;;  %v3643_v28 = vpop.permute.xlu0 %3642  ;;  %v3845_v24 = vsel %vm1790_vm6, %v3813_v12, %v3263_v55  ;;  %v8530_v55 = vld [vmem:[#allocation81_spill] sm:$0xff]  ;;  %v8533_v12 = vld [vmem:[#allocation76_spill] sm:$0xff] }
 0x574   : > { %v4141_v6 = vadd.f32 %v4695_v36, %v7735_v52  ;;  %v3939_v13 = vsel %vm1889_vm9, %v3907_v41, %v3643_v28  ;;  %v4135_v17 = vpop.f32.mrb[3].mxu1  ;;  %v3750_v41 = vsel %vm1691_vm3, %v3718_v60, %v8530_v55 }
 0x575   : > { %v4136_v58 = vadd.f32 %v7735_v52, %v4135_v17  ;;  %4724 = vmatmul.mubr.msk.f32.gmra.mrb[22].mxu1 %vm1934_vm10, %v3939_v13 }
 0x576   : > { %v4319_v40 = vadd.f32 %v4287_v20, %v4141_v6  ;;  %v3009_v26 = vpop.permute.xlu1 %3008 }
 0x577   : > { %v4318_v21 = vadd.f32 %v4286_v16, %v4136_v58  ;;  %v3389_v25 = vpop.permute.xlu0 %3388  ;;  %v3782_v36 = vsel %vm1724_vm4, %v3750_v41, %v3009_v26  ;;  %v2408_v41 = vld [vmem:[#allocation3 + $0x158] sm:$0xff] }
 0x578   : > { %v4351_v39 = vmax.f32 %v4319_v40, 0.0  ;;  %v3876_v30 = vsel %vm1823_vm7, %v3844_v47, %v3389_v25  ;;  %v4291_v25 = vld [vmem:[%s5092_s24 + $0x38] sm:$0xff] }
 0x579   : > { %v4350_v0 = vmax.f32 %v4318_v21, 0.0 }
 0x57a   : > { %4383 = vst.msk [vmem:[%s7748_s13 + $0x18] sm:$0xff] %vm225_vm0, %v4351_v39  ;;  %v3517_v23 = vpop.permute.xlu1 %3516  ;;  %v2406_v39 = vld [vmem:[#allocation3 + $0x140] sm:$0xff] }
 0x57b   : > { %4382 = vst.msk [vmem:[%s7748_s13 + $0x10] sm:$0xff] %vm225_vm0, %v4350_v0  ;;  %v3391_v62 = vpop.permute.xlu0 %3390  ;;  %v3908_v45 = vsel %vm1856_vm8, %v3876_v30, %v3517_v23  ;;  %v4290_v23 = vld [vmem:[%s5092_s24 + $0x30] sm:$0xff] }
 0x57c   : > { %v3877_v51 = vsel %vm1823_vm7, %v3845_v24, %v3391_v62  ;;  %v8531_v62 = vld [vmem:[#allocation77_spill] sm:$0xff] }
 0x57d   : > { %v3719_v57 = vsel %vm225_vm0, %v2406_v39, %v8531_v62 }
 0x57e   : > { %v3137_v38 = vpop.permute.xlu1 %3136  ;;  %v3751_v46 = vsel %vm1691_vm3, %v3719_v57, %v8532_v27  ;;  %v2410_v27 = vld [vmem:[#allocation3 + $0x170] sm:$0xff] }
 0x57f   : > { %v3011_v63 = vpop.permute.xlu0 %3010  ;;  %v3814_v28 = vsel %vm1757_vm5, %v3782_v36, %v3137_v38 }
 0x580   : > { %v3783_v32 = vsel %vm1724_vm4, %v3751_v46, %v3011_v63  ;;  %v8537_v46 = vld [vmem:[#allocation97_spill] sm:$0xff] }
 0x582   : > { %v3645_v15 = vpop.permute.xlu1 %3644 }
 0x583   : > { %v3940_v7 = vsel %vm1889_vm9, %v3908_v45, %v3645_v15  ;;  %v3519_v34 = vpop.permute.xlu0 %3518 }
 0x584   : > { %4726 = vmatprep.mubr.msk.f32.mxu1 %vm1934_vm10, %v3940_v7  ;;  %v3909_v49 = vsel %vm1856_vm8, %v3877_v51, %v3519_v34 }
 0x586   : > { %v3265_v54 = vpop.permute.xlu1 %3264 }
 0x587   : > { %v3139_v50 = vpop.permute.xlu0 %3138  ;;  %v4698_v18 = vpop.f32.mrb[4].mxu1  ;;  %v3846_v13 = vsel %vm1790_vm6, %v3814_v28, %v3265_v54 }
 0x588   : > { %v4151_v48 = vadd.f32 %v4698_v18, %v7735_v52  ;;  %v4145_v59 = vpop.f32.mrb[5].mxu1  ;;  %v3815_v45 = vsel %vm1757_vm5, %v3783_v32, %v3139_v50  ;;  %v2407_v18 = vld [vmem:[#allocation3 + $0x150] sm:$0xff] }
 0x589   : > { %v4146_v10 = vadd.f32 %v7735_v52, %v4145_v59  ;;  %v8534_v59 = vld [vmem:[#allocation102_spill] sm:$0xff] }
 0x58a   : > { %v4321_v1 = vadd.f32 %v4289_v35, %v4151_v48  ;;  %v3267_v43 = vpop.permute.xlu1 %3266  ;;  %v3720_v48 = vsel %vm225_vm0, %v2407_v18, %v8533_v12  ;;  %v4294_v18 = vld [vmem:[%s5092_s24 + $0x50] sm:$0xff] }
 0x58b   : > { %v4320_v56 = vadd.f32 %v4288_v53, %v4146_v10  ;;  %v3647_v44 = vpop.permute.xlu0 %3646  ;;  %v3847_v7 = vsel %vm1790_vm6, %v3815_v45, %v3267_v43  ;;  %v3752_v53 = vsel %vm1691_vm3, %v3720_v48, %v8534_v59 }
 0x58c   : > { %v4353_v37 = vmax.f32 %v4321_v1, 0.0  ;;  %v3941_v29 = vsel %vm1889_vm9, %v3909_v49, %v3647_v44  ;;  %v4293_v49 = vld [vmem:[%s5092_s24 + $0x48] sm:$0xff] }
 0x58d   : > { %v4352_v9 = vmax.f32 %v4320_v56, 0.0  ;;  %4727 = vmatmul.mubr.msk.f32.gmra.mrb[24].mxu1 %vm1934_vm10, %v3941_v29  ;;  %v4292_v29 = vld [vmem:[%s5092_s24 + $0x40] sm:$0xff] }
 0x58e   : > { %4385 = vst.msk [vmem:[%s7748_s13 + $0x28] sm:$0xff] %vm225_vm0, %v4353_v37  ;;  %v3013_v4 = vpop.permute.xlu1 %3012 }
 0x58f   : > { %4384 = vst.msk [vmem:[%s7748_s13 + $0x20] sm:$0xff] %vm225_vm0, %v4352_v9  ;;  %v3393_v14 = vpop.permute.xlu0 %3392  ;;  %v3784_v24 = vsel %vm1724_vm4, %v3752_v53, %v3013_v4 }
 0x590   : > { %v3878_v17 = vsel %vm1823_vm7, %v3846_v13, %v3393_v14 }
 0x592   : > { %v3521_v19 = vpop.permute.xlu1 %3520 }
 0x593   : > { %v3395_v2 = vpop.permute.xlu0 %3394  ;;  %v3910_v16 = vsel %vm1856_vm8, %v3878_v17, %v3521_v19  ;;  %v8536_v17 = vld [vmem:[#allocation32_spill] sm:$0xff] }
 0x594   : > { %v3879_v3 = vsel %vm1823_vm7, %v3847_v7, %v3395_v2 }
 0x596   : > { %v3141_v20 = vpop.permute.xlu1 %3140 }
 0x597   : > { %v7827_v6 = vpop.permute.xlu0 %3014  ;;  %v3816_v51 = vsel %vm1757_vm5, %v3784_v24, %v3141_v20  ;;  %v8535_v20 = vld [vmem:[#allocation98_spill] sm:$0xff] }
 0x598   : > { %v3721_v28 = vsel %vm225_vm0, %v2408_v41, %v8535_v20 }
 0x59a   : > { %v3649_v58 = vpop.permute.xlu1 %3648 }
 0x59b   : > { %v3942_v61 = vsel %vm1889_vm9, %v3910_v16, %v3649_v58  ;;  %v3523_v40 = vpop.permute.xlu0 %3522  ;;  %v4701_v21 = vpop.f32.mrb[6].mxu1  ;;  %v3753_v16 = vsel %vm1691_vm3, %v3721_v28, %v8536_v17  ;;  %v4299_v28 = vld [vmem:[%s5092_s24 + $0x78] sm:$0xff] }
 0x59c   : > { %v4161_v26 = vadd.f32 %v4701_v21, %v7735_v52  ;;  %v4155_v0 = vpop.f32.mrb[7].mxu1  ;;  %4729 = vmatprep.mubr.msk.f32.mxu1 %vm1934_vm10, %v3942_v61  ;;  %v3911_v11 = vsel %vm1856_vm8, %v3879_v3, %v3523_v40  ;;  %v3785_v61 = vsel %vm1724_vm4, %v3753_v16, %v7827_v6  ;;  %v4298_v16 = vld [vmem:[%s5092_s24 + $0x70] sm:$0xff] }
 0x59d   : > { %v4156_v8 = vadd.f32 %v7735_v52, %v4155_v0 }
 0x59e   : > { %v4323_v5 = vadd.f32 %v4291_v25, %v4161_v26  ;;  %v3269_v38 = vpop.permute.xlu1 %3268 }
 0x59f   : > { %v4322_v47 = vadd.f32 %v4290_v23, %v4156_v8  ;;  %v3143_v30 = vpop.permute.xlu0 %3142  ;;  %v3848_v56 = vsel %vm1790_vm6, %v3816_v51, %v3269_v38  ;;  %v2409_v8 = vld [vmem:[#allocation3 + $0x168] sm:$0xff]  ;;  %v8538_v38 = vld [vmem:[#allocation10_spill] sm:$0xff] }
 0x5a0   : > { %v4355_v15 = vmax.f32 %v4323_v5, 0.0  ;;  %v3817_v21 = vsel %vm1757_vm5, %v3785_v61, %v3143_v30  ;;  %v3722_v5 = vsel %vm225_vm0, %v2409_v8, %v8537_v46  ;;  %v3723_v32 = vsel %vm225_vm0, %v2410_v27, %v8538_v38  ;;  %v4303_v38 = vld [vmem:[%s5092_s24 + $0x98] sm:$0xff] }
 0x5a1   : > { %v4354_v34 = vmax.f32 %v4322_v47, 0.0  ;;  %v8539_v47 = vld [vmem:[#allocation23_spill] sm:$0xff] }
 0x5a2   : > { %4387 = vst.msk [vmem:[%s7748_s13 + $0x38] sm:$0xff] %vm225_vm0, %v4355_v15  ;;  %v3271_v31 = vpop.permute.xlu1 %3270  ;;  %v3754_v30 = vsel %vm1691_vm3, %v3722_v5, %v8539_v47  ;;  %v8540_v15 = vld [vmem:[#allocation80_spill] sm:$0xff] }
 0x5a3   : > { %4386 = vst.msk [vmem:[%s7748_s13 + $0x30] sm:$0xff] %vm225_vm0, %v4354_v34  ;;  %v3651_v22 = vpop.permute.xlu0 %3650  ;;  %v3849_v25 = vsel %vm1790_vm6, %v3817_v21, %v3271_v31  ;;  %v3755_v7 = vsel %vm1691_vm3, %v3723_v32, %v8540_v15 }
 0x5a4   : > { %v3943_v63 = vsel %vm1889_vm9, %v3911_v11, %v3651_v22  ;;  %v4295_v11 = vld [vmem:[%s5092_s24 + $0x58] sm:$0xff] }
 0x5a5   : > { %4730 = vmatmul.mubr.msk.f32.gmra.mrb[26].mxu1 %vm1934_vm10, %v3943_v63 }
 0x5a6   : > { %v3017_v54 = vpop.permute.xlu1 %3016 }
 0x5a7   : > { %v3397_v42 = vpop.permute.xlu0 %3396  ;;  %v3786_v34 = vsel %vm1724_vm4, %v3754_v30, %v3017_v54  ;;  %v4302_v30 = vld [vmem:[%s5092_s24 + $0x90] sm:$0xff] }
 0x5a8   : > { %v3880_v9 = vsel %vm1823_vm7, %v3848_v56, %v3397_v42 }
 0x5aa   : > { %v3525_v50 = vpop.permute.xlu1 %3524 }
 0x5ab   : > { %v3399_v35 = vpop.permute.xlu0 %3398  ;;  %v3912_v4 = vsel %vm1856_vm8, %v3880_v9, %v3525_v50 }
 0x5ac   : > { %v3881_v39 = vsel %vm1823_vm7, %v3849_v25, %v3399_v35 }
 0x5ae   : > { %v3145_v10 = vpop.permute.xlu1 %3144 }
 0x5af   : > { %v3019_v1 = vpop.permute.xlu0 %3018  ;;  %v4704_v43 = vpop.f32.mrb[8].mxu1  ;;  %v3818_v22 = vsel %vm1757_vm5, %v3786_v34, %v3145_v10 }
 0x5b0   : > { %v4171_v44 = vadd.f32 %v4704_v43, %v7735_v52  ;;  %v4165_v37 = vpop.f32.mrb[9].mxu1  ;;  %v3787_v63 = vsel %vm1724_vm4, %v3755_v7, %v3019_v1 }
 0x5b1   : > { %v4166_v14 = vadd.f32 %v7735_v52, %v4165_v37 }
 0x5b2   : > { %v4325_v19 = vadd.f32 %v4293_v49, %v4171_v44  ;;  %v3653_v2 = vpop.permute.xlu1 %3652 }
 0x5b3   : > { %v4324_v33 = vadd.f32 %v4292_v29, %v4166_v14  ;;  %v3944_v60 = vsel %vm1889_vm9, %v3912_v4, %v3653_v2  ;;  %v3527_v55 = vpop.permute.xlu0 %3526  ;;  %v4297_v14 = vld [vmem:[%s5092_s24 + $0x68] sm:$0xff]  ;;  %v4296_v2 = vld [vmem:[%s5092_s24 + $0x60] sm:$0xff] }
 0x5b4   : > { %v4357_v36 = vmax.f32 %v4325_v19, 0.0  ;;  %4732 = vmatprep.mubr.msk.f32.mxu1 %vm1934_vm10, %v3944_v60  ;;  %v3913_v0 = vsel %vm1856_vm8, %v3881_v39, %v3527_v55 }
 0x5b5   : > { %v4356_v13 = vmax.f32 %v4324_v33, 0.0 }
 0x5b6   : > { %4389 = vst.msk [vmem:[%s7748_s13 + $0x48] sm:$0xff] %vm225_vm0, %v4357_v36  ;;  %v3273_v58 = vpop.permute.xlu1 %3272 }
 0x5b7   : > { %4388 = vst.msk [vmem:[%s7748_s13 + $0x40] sm:$0xff] %vm225_vm0, %v4356_v13  ;;  %v3147_v40 = vpop.permute.xlu0 %3146  ;;  %v3850_v35 = vsel %vm1790_vm6, %v3818_v22, %v3273_v58 }
 0x5b8   : > { %v3819_v12 = vsel %vm1757_vm5, %v3787_v63, %v3147_v40 }
 0x5ba   : > { %v3275_v26 = vpop.permute.xlu1 %3274 }
 0x5bb   : > { %v3655_v23 = vpop.permute.xlu0 %3654  ;;  %v3851_v54 = vsel %vm1790_vm6, %v3819_v12, %v3275_v26  ;;  %v4301_v26 = vld [vmem:[%s5092_s24 + $0x88] sm:$0xff] }
 0x5bc   : > { %v3945_v62 = vsel %vm1889_vm9, %v3913_v0, %v3655_v23 }
 0x5bd   : > { %4733 = vmatmul.mubr.msk.f32.gmra.mrb[28].mxu1 %vm1934_vm10, %v3945_v62  ;;  %v4300_v62 = vld [vmem:[%s5092_s24 + $0x80] sm:$0xff] }
 0x5be   : > { %v3403_v57 = vpop.permute.xlu1 %3402 }
 0x5bf   : > { %v3401_v6 = vpop.permute.xlu0 %3400  ;;  %v3883_v10 = vsel %vm1823_vm7, %v3851_v54, %v3403_v57 }
 0x5c0   : > { %v3882_v59 = vsel %vm1823_vm7, %v3850_v35, %v3401_v6 }
 0x5c2   : > { %v3531_v45 = vpop.permute.xlu1 %3530 }
 0x5c3   : > { %v3529_v3 = vpop.permute.xlu0 %3528  ;;  %v4707_v31 = vpop.f32.mrb[10].mxu1  ;;  %v3915_v49 = vsel %vm1856_vm8, %v3883_v10, %v3531_v45  ;;  %v4306_v10 = vld [vmem:[%s5092_s24 + $0xb0] sm:$0xff] }
 0x5c4   : > { %v4181_v42 = vadd.f32 %v4707_v31, %v7735_v52  ;;  %v4175_v50 = vpop.f32.mrb[11].mxu1  ;;  %v3914_v51 = vsel %vm1856_vm8, %v3882_v59, %v3529_v3  ;;  %v4307_v59 = vld [vmem:[%s5092_s24 + $0xb8] sm:$0xff] }
 0x5c5   : > { %v4176_v48 = vadd.f32 %v7735_v52, %v4175_v50 }
 0x5c6   : > { %v4327_v53 = vadd.f32 %v4295_v11, %v4181_v42  ;;  %v3659_v24 = vpop.permute.xlu1 %3658  ;;  %v4305_v11 = vld [vmem:[%s5092_s24 + $0xa8] sm:$0xff]  ;;  %v4304_v42 = vld [vmem:[%s5092_s24 + $0xa0] sm:$0xff] }
 0x5c7   : > { %v4326_v1 = vadd.f32 %v4294_v18, %v4176_v48  ;;  %v3657_v43 = vpop.permute.xlu0 %3656  ;;  %v3947_v29 = vsel %vm1889_vm9, %v3915_v49, %v3659_v24 }
 0x5c8   : > { %v4359_v56 = vmax.f32 %v4327_v53, 0.0  ;;  %v3946_v44 = vsel %vm1889_vm9, %v3914_v51, %v3657_v43 }
 0x5c9   : > { %v4358_v37 = vmax.f32 %v4326_v1, 0.0  ;;  %4735 = vmatprep.mubr.msk.f32.mxu1 %vm1934_vm10, %v3946_v44 }
 0x5ca   : > { %4391 = vst.msk [vmem:[%s7748_s13 + $0x58] sm:$0xff] %vm225_vm0, %v4359_v56  ;;  %4736 = vmatmul.mubr.msk.f32.gmra.mrb[30].mxu1 %vm1934_vm10, %v3947_v29 }
 0x5cb   : > { %4390 = vst.msk [vmem:[%s7748_s13 + $0x50] sm:$0xff] %vm225_vm0, %v4358_v37  ;;  %v4309_v37 = vld [vmem:[%s5092_s24 + $0xc8] sm:$0xff] }
 0x5d7   : > { %v4710_v9 = vpop.f32.mrb[12].mxu1 }
 0x5d8   : > { %v4191_v4 = vadd.f32 %v4710_v9, %v7735_v52  ;;  %v4185_v19 = vpop.f32.mrb[13].mxu1 }
 0x5d9   : > { %v4186_v33 = vadd.f32 %v7735_v52, %v4185_v19 }
 0x5da   : > { %v4329_v60 = vadd.f32 %v4297_v14, %v4191_v4  ;;  %v4308_v14 = vld [vmem:[%s5092_s24 + $0xc0] sm:$0xff] }
 0x5db   : > { %v4328_v55 = vadd.f32 %v4296_v2, %v4186_v33 }
 0x5dc   : > { %v4361_v41 = vmax.f32 %v4329_v60, 0.0 }
 0x5dd   : > { %v4360_v36 = vmax.f32 %v4328_v55, 0.0 }
 0x5de   : > { %4393 = vst.msk [vmem:[%s7748_s13 + $0x68] sm:$0xff] %vm225_vm0, %v4361_v41  ;;  %v4311_v41 = vld [vmem:[%s5092_s24 + $0xd8] sm:$0xff] }
 0x5df   : > { %4392 = vst.msk [vmem:[%s7748_s13 + $0x60] sm:$0xff] %vm225_vm0, %v4360_v36 }
 0x5eb   : > { %v4713_v20 = vpop.f32.mrb[14].mxu1 }
 0x5ec   : > { %v4201_v13 = vadd.f32 %v4713_v20, %v7735_v52  ;;  %v4195_v17 = vpop.f32.mrb[15].mxu1 }
 0x5ed   : > { %v4196_v58 = vadd.f32 %v7735_v52, %v4195_v17 }
 0x5ee   : > { %v4331_v61 = vadd.f32 %v4299_v28, %v4201_v13  ;;  %v4310_v28 = vld [vmem:[%s5092_s24 + $0xd0] sm:$0xff] }
 0x5ef   : > { %v4330_v40 = vadd.f32 %v4298_v16, %v4196_v58 }
 0x5f0   : > { %v4363_v21 = vmax.f32 %v4331_v61, 0.0 }
 0x5f1   : > { %v4362_v25 = vmax.f32 %v4330_v40, 0.0 }
 0x5f2   : > { %4395 = vst.msk [vmem:[%s7748_s13 + $0x78] sm:$0xff] %vm225_vm0, %v4363_v21  ;;  %v4313_v21 = vld [vmem:[%s5092_s24 + $0xe8] sm:$0xff] }
 0x5f3   : > { %4394 = vst.msk [vmem:[%s7748_s13 + $0x70] sm:$0xff] %vm225_vm0, %v4362_v25 }
 0x5ff   : > { %v4716_v39 = vpop.f32.mrb[16].mxu1 }
 0x600   : > { %v4211_v0 = vadd.f32 %v4716_v39, %v7735_v52  ;;  %v4205_v23 = vpop.f32.mrb[17].mxu1 }
 0x601   : > { %v4206_v57 = vadd.f32 %v7735_v52, %v4205_v23 }
 0x602   : > { %v4333_v6 = vadd.f32 %v4301_v26, %v4211_v0  ;;  %v4312_v26 = vld [vmem:[%s5092_s24 + $0xe0] sm:$0xff] }
 0x603   : > { %v4332_v8 = vadd.f32 %v4300_v62, %v4206_v57 }
 0x604   : > { %v4365_v27 = vmax.f32 %v4333_v6, 0.0 }
 0x605   : > { %v4364_v46 = vmax.f32 %v4332_v8, 0.0 }
 0x606   : > { %4397 = vst.msk [vmem:[%s7748_s13 + $0x88] sm:$0xff] %vm225_vm0, %v4365_v27  ;;  %v4315_v27 = vld [vmem:[%s5092_s24 + $0xf8] sm:$0xff] }
 0x607   : > { %4396 = vst.msk [vmem:[%s7748_s13 + $0x80] sm:$0xff] %vm225_vm0, %v4364_v46 }
 0x618   : > { %v4719_v5 = vpop.f32.mrb[18].mxu1 }
 0x619   : > { %v4221_v32 = vadd.f32 %v4719_v5, %v7735_v52  ;;  %v4215_v47 = vpop.f32.mrb[19].mxu1 }
 0x61a   : > { %v4216_v45 = vadd.f32 %v7735_v52, %v4215_v47 }
 0x61b   : > { %v4335_v15 = vadd.f32 %v4303_v38, %v4221_v32  ;;  %v4314_v38 = vld [vmem:[%s5092_s24 + $0xf0] sm:$0xff] }
 0x61c   : > { %v4334_v7 = vadd.f32 %v4302_v30, %v4216_v45 }
 0x61d   : > { %v4367_v34 = vmax.f32 %v4335_v15, 0.0 }
 0x61e   : > { %v4366_v3 = vmax.f32 %v4334_v7, 0.0 }
 0x61f   : > { %4399 = vst.msk [vmem:[%s7748_s13 + $0x98] sm:$0xff] %vm225_vm0, %v4367_v34 }
 0x620   : > { %4398 = vst.msk [vmem:[%s7748_s13 + $0x90] sm:$0xff] %vm225_vm0, %v4366_v3 }
 0x630   : > { %v4722_v31 = vpop.f32.mrb[20].mxu1 }
 0x631   : > { %v4231_v22 = vadd.f32 %v4722_v31, %v7735_v52  ;;  %v4225_v63 = vpop.f32.mrb[21].mxu1 }
 0x632   : > { %v4226_v50 = vadd.f32 %v7735_v52, %v4225_v63 }
 0x633   : > { %v4337_v18 = vadd.f32 %v4305_v11, %v4231_v22 }
 0x634   : > { %v4336_v35 = vadd.f32 %v4304_v42, %v4226_v50 }
 0x635   : > { %v4369_v12 = vmax.f32 %v4337_v18, 0.0 }
 0x636   : > { %v4368_v48 = vmax.f32 %v4336_v35, 0.0 }
 0x637   : > { %4401 = vst.msk [vmem:[%s7748_s13 + $0xa8] sm:$0xff] %vm225_vm0, %v4369_v12 }
 0x638   : > { %4400 = vst.msk [vmem:[%s7748_s13 + $0xa0] sm:$0xff] %vm225_vm0, %v4368_v48 }
 0x648   : > { %v4725_v54 = vpop.f32.mrb[22].mxu1 }
 0x649   : > { %v4241_v53 = vadd.f32 %v4725_v54, %v7735_v52  ;;  %v4235_v24 = vpop.f32.mrb[23].mxu1 }
 0x64a   : > { %v4236_v51 = vadd.f32 %v7735_v52, %v4235_v24 }
 0x64b   : > { %v4339_v1 = vadd.f32 %v4307_v59, %v4241_v53 }
 0x64c   : > { %v4338_v43 = vadd.f32 %v4306_v10, %v4236_v51 }
 0x64d   : > { %v4371_v49 = vmax.f32 %v4339_v1, 0.0 }
 0x64e   : > { %v4370_v56 = vmax.f32 %v4338_v43, 0.0 }
 0x64f   : > { %4403 = vst.msk [vmem:[%s7748_s13 + $0xb8] sm:$0xff] %vm225_vm0, %v4371_v49 }
 0x650   : > { %4402 = vst.msk [vmem:[%s7748_s13 + $0xb0] sm:$0xff] %vm225_vm0, %v4370_v56 }
 0x660   : > { %v4728_v44 = vpop.f32.mrb[24].mxu1 }
 0x661   : > { %v4251_v29 = vadd.f32 %v4728_v44, %v7735_v52  ;;  %v4245_v9 = vpop.f32.mrb[25].mxu1 }
 0x662   : > { %v4246_v4 = vadd.f32 %v7735_v52, %v4245_v9 }
 0x663   : > { %v4341_v19 = vadd.f32 %v4309_v37, %v4251_v29 }
 0x664   : > { %v4340_v2 = vadd.f32 %v4308_v14, %v4246_v4 }
 0x665   : > { %v4373_v33 = vmax.f32 %v4341_v19, 0.0 }
 0x666   : > { %v4372_v60 = vmax.f32 %v4340_v2, 0.0 }
 0x667   : > { %4405 = vst.msk [vmem:[%s7748_s13 + $0xc8] sm:$0xff] %vm225_vm0, %v4373_v33 }
 0x668   : > { %4404 = vst.msk [vmem:[%s7748_s13 + $0xc0] sm:$0xff] %vm225_vm0, %v4372_v60 }
 0x678   : > { %v4731_v55 = vpop.f32.mrb[26].mxu1 }
 0x679   : > { %v4261_v36 = vadd.f32 %v4731_v55, %v7735_v52  ;;  %v4255_v20 = vpop.f32.mrb[27].mxu1 }
 0x67a   : > { %v4256_v13 = vadd.f32 %v7735_v52, %v4255_v20 }
 0x67b   : > { %v4343_v17 = vadd.f32 %v4311_v41, %v4261_v36 }
 0x67c   : > { %v4342_v16 = vadd.f32 %v4310_v28, %v4256_v13 }
 0x67d   : > { %v4375_v58 = vmax.f32 %v4343_v17, 0.0 }
 0x67e   : > { %v4374_v61 = vmax.f32 %v4342_v16, 0.0 }
 0x67f   : > { %4407 = vst.msk [vmem:[%s7748_s13 + $0xd8] sm:$0xff] %vm225_vm0, %v4375_v58 }
 0x680   : > { %4406 = vst.msk [vmem:[%s7748_s13 + $0xd0] sm:$0xff] %vm225_vm0, %v4374_v61 }
 0x690   : > { %v4734_v40 = vpop.f32.mrb[28].mxu1 }
 0x691   : > { %v4271_v25 = vadd.f32 %v4734_v40, %v7735_v52  ;;  %v4265_v39 = vpop.f32.mrb[29].mxu1 }
 0x692   : > { %v4266_v0 = vadd.f32 %v7735_v52, %v4265_v39 }
 0x693   : > { %v4345_v23 = vadd.f32 %v4313_v21, %v4271_v25 }
 0x694   : > { %v4344_v62 = vadd.f32 %v4312_v26, %v4266_v0 }
 0x695   : > { %v4377_v57 = vmax.f32 %v4345_v23, 0.0 }
 0x696   : > { %v4376_v6 = vmax.f32 %v4344_v62, 0.0 }
 0x697   : > { %4409 = vst.msk [vmem:[%s7748_s13 + $0xe8] sm:$0xff] %vm225_vm0, %v4377_v57 }
 0x698   : > { %4408 = vst.msk [vmem:[%s7748_s13 + $0xe0] sm:$0xff] %vm225_vm0, %v4376_v6 }
 0x69d   : > { %v4737_v8 = vpop.f32.mrb[30].mxu1 }
 0x69e   : > { %v4281_v46 = vadd.f32 %v4737_v8, %v7735_v52  ;;  %v4275_v5 = vpop.f32.mrb[31].mxu1 }
 0x69f   : > { %v4276_v32 = vadd.f32 %v7735_v52, %v4275_v5 }
 0x6a0   : > { %v4347_v47 = vadd.f32 %v4315_v27, %v4281_v46 }
 0x6a1   : > { %v4346_v30 = vadd.f32 %v4314_v38, %v4276_v32 }
 0x6a2   : > { %v4379_v45 = vmax.f32 %v4347_v47, 0.0 }
 0x6a3   : > { %v4378_v15 = vmax.f32 %v4346_v30, 0.0 }
 0x6a4   : > { %4411 = vst.msk [vmem:[%s7748_s13 + $0xf8] sm:$0xff] %vm225_vm0, %v4379_v45 }
 0x6a5   : > { %4410 = vst.msk [vmem:[%s7748_s13 + $0xf0] sm:$0xff] %vm225_vm0, %v4378_v15 }
 0x6a6 PF: > { %s15_s18 = sadd.s32 1, %s4809_s18  }
 0x6a7   : > { %p12_p4 = scmp.ge.s32.totalorder %s15_s18, 4  }
 0x6a9   :  { %14 = sbr.rel (!%p12_p4) target bundleno = 1 (0x1), region = 74 }

</bundles_post_ra>
